<compile_context>
chip_gen: v5e
topology: v5e:2x2
jax: 0.10.0
libtpu: 0.0.40
codegen_flags: <defaults>
</compile_context>

<pallas_src>
import functools
import math

import jax
import jax.numpy as jnp
from jax.experimental import pallas as pl
from jax.experimental.pallas import tpu as pltpu


# ----------------------------------------------------------------------------
# Pallas kernel (entire network)
# ----------------------------------------------------------------------------
def _layernorm(x, w, b, eps=1e-5):
    # single-pass moments + fused (rsqrt * gamma) multiplier
    mu = jnp.mean(x, axis=-1, keepdims=True)
    var = jnp.mean(x * x, axis=-1, keepdims=True) - mu * mu
    mult = jax.lax.rsqrt(var + eps) * w
    return (x - mu) * mult + b


_L_REFS = 16  # refs per encoder layer


def fused_transformer_kernel(*refs, num_layers, num_heads, batch, seq):
    tok_ref, emb_ref, pos_ref = refs[0], refs[1], refs[2]
    layer_refs = refs[3:3 + _L_REFS * num_layers]
    fcw_ref = refs[3 + _L_REFS * num_layers]
    fcb_ref = refs[4 + _L_REFS * num_layers]
    o_ref = refs[-1]

    vocab, E = emb_ref.shape
    B, S = batch, seq
    BS = B * S
    H = num_heads
    D = E // H

    # --- embedding gather (exact one-hot matmul, bf16 operands / f32 acc) ---
    tok = tok_ref[...]                                              # (BS, 1) int32
    iota = jax.lax.broadcasted_iota(jnp.int32, (BS, vocab), 1)
    onehot = (iota == tok).astype(jnp.bfloat16)                     # exact 0/1 -> lossless in bf16
    x = jnp.dot(onehot, emb_ref[...], preferred_element_type=jnp.float32)   # (BS, E) f32

    # --- positional encoding: broadcast add on a (B,S,E) view (no concat/copy) ---
    x = (x.reshape(B, S, E) + pos_ref[...]).reshape(BS, E)

    # --- num_layers post-norm encoder layers, fully unrolled inside the kernel ---
    for li in range(num_layers):
        (wq, wk, wv, bq, bk, bv, wo, bo, ln1w, ln1b,
         w1, b1, w2, b2, ln2w, ln2b) = layer_refs[_L_REFS * li:_L_REFS * (li + 1)]

        x_bf = x.astype(jnp.bfloat16)                               # (BS, E) MXU operand

        # Multi-head attention with per-head weight stacks: no activation lane slices,
        # no concatenates.  Per head: tiny 2-D matmuls + single-batch-dim 3-D einsums.
        attn = jnp.zeros((BS, E), jnp.float32)
        for h in range(H):
            # 1/sqrt(D) is folded into wq/bq at build time.
            q = jnp.dot(x_bf, wq[h], preferred_element_type=jnp.float32) + bq[h]   # (BS, D)
            k = jnp.dot(x_bf, wk[h], preferred_element_type=jnp.float32) + bk[h]
            v = jnp.dot(x_bf, wv[h], preferred_element_type=jnp.float32) + bv[h]
            q3 = q.reshape(B, S, D).astype(jnp.bfloat16)
            k3 = k.reshape(B, S, D).astype(jnp.bfloat16)
            v3 = v.reshape(B, S, D).astype(jnp.bfloat16)

            s = jnp.einsum('bsd,btd->bst', q3, k3,
                           preferred_element_type=jnp.float32)      # (B, S, S) f32
            m = jnp.max(s, axis=-1, keepdims=True)
            e = jnp.exp(s - m)
            p = e * pl.reciprocal(jnp.sum(e, axis=-1, keepdims=True), approx=True)
            oh = jnp.einsum('bst,btd->bsd', p.astype(jnp.bfloat16), v3,
                            preferred_element_type=jnp.float32)     # (B, S, D)

            # concat(heads) @ Wo  ==  sum_h head_h @ Wo[h]   (Wo pre-split per head)
            attn = attn + jnp.dot(oh.reshape(BS, D).astype(jnp.bfloat16), wo[h],
                                  preferred_element_type=jnp.float32)

        # residual + out-proj bias + LayerNorm1 (post-norm)
        h1 = _layernorm(x + attn + bo[...], ln1w[...], ln1b[...])

        # feed-forward (relu) + residual + LayerNorm2
        f = jnp.dot(h1.astype(jnp.bfloat16), w1[...],
                    preferred_element_type=jnp.float32) + b1[...]
        f = jnp.maximum(f, 0.0)
        f = jnp.dot(f.astype(jnp.bfloat16), w2[...],
                    preferred_element_type=jnp.float32) + b2[...]
        x = _layernorm(h1 + f, ln2w[...], ln2b[...])

    # --- mean pool over sequence -> fc(E->1) as VPU multiply + lane reduce -> sigmoid ---
    pooled = jnp.mean(x.reshape(B, S, E), axis=1)                   # (B, E)
    logits = jnp.sum(pooled * fcw_ref[...], axis=-1, keepdims=True) + fcb_ref[...]
    o_ref[...] = 1.0 / (1.0 + jnp.exp(-logits))


# ----------------------------------------------------------------------------
# Wrapper: single gridless pallas_call for the whole forward pass
# ----------------------------------------------------------------------------
_VMEM = pl.BlockSpec(memory_space=pltpu.MemorySpace.VMEM)

_LAYER_KEYS = ("wq", "wk", "wv", "bq", "bk", "bv", "wo", "bo",
               "ln1w", "ln1b", "w1", "b1", "w2", "b2", "ln2w", "ln2b")


def tiny_transformer_forward(tokens, params, num_heads):
    B, S = tokens.shape
    tok2d = tokens.reshape(B * S, 1).astype(jnp.int32)
    pos = params["pos_encoding"][0, :S, :]                          # (S, E)

    args = [tok2d, params["embedding"], pos]
    for lp in params["layers"]:
        args += [lp[k] for k in _LAYER_KEYS]
    args += [params["fc_w"], params["fc_b"]]

    kernel = functools.partial(
        fused_transformer_kernel,
        num_layers=len(params["layers"]), num_heads=num_heads, batch=B, seq=S)

    # TODO(synk): at larger B add grid=(B,) with dimension_semantics=("parallel",) to use v7x's
    # second TensorCore, and stream per-layer weights via BlockSpecs once VMEM gets tight on v7x.
    return pl.pallas_call(
        kernel,
        out_shape=jax.ShapeDtypeStruct((B, 1), jnp.float32),
        in_specs=[_VMEM] * len(args),
        out_specs=_VMEM,
    )(*args)


# ----------------------------------------------------------------------------
# Deterministic parameter construction
#   * linear weights pre-transposed to [in, out] and stored bf16 (MXU operands)
#   * Q/K/V and Wo pre-split per head; 1/sqrt(D) folded into the Q projection
# ----------------------------------------------------------------------------
def make_params(key, vocab_size, embed_dim, num_heads, ff_dim, num_layers):
    E, F, H = embed_dim, ff_dim, num_heads
    D = E // H
    scale = 1.0 / math.sqrt(D)

    def rnd(k, shape, s=0.02):
        return (s * jax.random.normal(k, shape)).astype(jnp.float32)

    def split_heads(w_t):
        # w_t: (E_in, E_out) with head-major output columns -> (H, E_in, D)
        return w_t.reshape(E, H, D).transpose(1, 0, 2)

    keys = jax.random.split(key, 3 + num_layers)
    params = {
        # bf16 table: the one-hot gather matmul then runs with pure bf16 operands.
        "embedding": rnd(keys[0], (vocab_size, E), s=0.1).astype(jnp.bfloat16),
        # matches nn.Parameter(torch.zeros(1, 512, embed_dim))
        "pos_encoding": jnp.zeros((1, 512, E), jnp.float32),
        "fc_w": rnd(keys[1], (1, E)),
        "fc_b": jnp.zeros((1, 1), jnp.float32),
        "layers": [],
    }
    for li in range(num_layers):
        lk = jax.random.split(keys[3 + li], 6)
        # PyTorch stores [out, in]; transpose to [in, out] so the kernel does x @ W with no .T.
        wq, wk, wv = rnd(lk[0], (E, E)), rnd(lk[1], (E, E)), rnd(lk[2], (E, E))
        wo, w1, w2 = rnd(lk[3], (E, E)), rnd(lk[4], (F, E)), rnd(lk[5], (E, F))
        params["layers"].append({
            "wq": (split_heads(wq.T) * scale).astype(jnp.bfloat16),     # (H, E, D), scale folded
            "wk": split_heads(wk.T).astype(jnp.bfloat16),               # (H, E, D)
            "wv": split_heads(wv.T).astype(jnp.bfloat16),               # (H, E, D)
            "bq": jnp.zeros((H, 1, D), jnp.float32),                    # (scale folded; zeros anyway)
            "bk": jnp.zeros((H, 1, D), jnp.float32),
            "bv": jnp.zeros((H, 1, D), jnp.float32),
            "wo": wo.T.reshape(H, D, E).astype(jnp.bfloat16),           # (H, D, E): per-head rows of Wo^T
            "bo": jnp.zeros((1, E), jnp.float32),
            "ln1w": jnp.ones((1, E), jnp.float32), "ln1b": jnp.zeros((1, E), jnp.float32),
            "w1": w1.T.astype(jnp.bfloat16),                            # (E, F)
            "b1": jnp.zeros((1, F), jnp.float32),
            "w2": w2.T.astype(jnp.bfloat16),                            # (F, E)
            "b2": jnp.zeros((1, E), jnp.float32),
            "ln2w": jnp.ones((1, E), jnp.float32), "ln2b": jnp.zeros((1, E), jnp.float32),
        })
    return params


# ----------------------------------------------------------------------------
# main
# ----------------------------------------------------------------------------
if __name__ == "__main__":
    VOCAB, EMBED, HEADS, FF, LAYERS = 32, 32, 4, 64, 2
    BATCH, SEQ = 2, 8

    key = jax.random.PRNGKey(0)
    pkey, tkey = jax.random.split(key)
    params = make_params(pkey, VOCAB, EMBED, HEADS, FF, LAYERS)
    tokens = jax.random.randint(tkey, (BATCH, SEQ), 0, VOCAB, dtype=jnp.int32)

    fwd = jax.jit(lambda t, p: tiny_transformer_forward(t, p, HEADS))
    out = fwd(tokens, params)
    out = jax.block_until_ready(out)

    assert out.shape == (BATCH, 1)
    assert bool(jnp.all(jnp.isfinite(out)))
    assert bool(jnp.all((out >= 0.0) & (out <= 1.0)))
    print("KERNEL_OK")
</pallas_src>

<mosaic_0001>
module attributes {stable_mosaic.version = 11 : i64} {
  func.func @fused_transformer_kernel(%arg0: memref<16x1xi32, #tpu.memory_space<vmem>>, %arg1: memref<32x32xbf16, #tpu.memory_space<vmem>>, %arg2: memref<8x32xf32, #tpu.memory_space<vmem>>, %arg3: memref<4x32x8xbf16, #tpu.memory_space<vmem>>, %arg4: memref<4x32x8xbf16, #tpu.memory_space<vmem>>, %arg5: memref<4x32x8xbf16, #tpu.memory_space<vmem>>, %arg6: memref<4x1x8xf32, #tpu.memory_space<vmem>>, %arg7: memref<4x1x8xf32, #tpu.memory_space<vmem>>, %arg8: memref<4x1x8xf32, #tpu.memory_space<vmem>>, %arg9: memref<4x8x32xbf16, #tpu.memory_space<vmem>>, %arg10: memref<1x32xf32, #tpu.memory_space<vmem>>, %arg11: memref<1x32xf32, #tpu.memory_space<vmem>>, %arg12: memref<1x32xf32, #tpu.memory_space<vmem>>, %arg13: memref<32x64xbf16, #tpu.memory_space<vmem>>, %arg14: memref<1x64xf32, #tpu.memory_space<vmem>>, %arg15: memref<64x32xbf16, #tpu.memory_space<vmem>>, %arg16: memref<1x32xf32, #tpu.memory_space<vmem>>, %arg17: memref<1x32xf32, #tpu.memory_space<vmem>>, %arg18: memref<1x32xf32, #tpu.memory_space<vmem>>, %arg19: memref<4x32x8xbf16, #tpu.memory_space<vmem>>, %arg20: memref<4x32x8xbf16, #tpu.memory_space<vmem>>, %arg21: memref<4x32x8xbf16, #tpu.memory_space<vmem>>, %arg22: memref<4x1x8xf32, #tpu.memory_space<vmem>>, %arg23: memref<4x1x8xf32, #tpu.memory_space<vmem>>, %arg24: memref<4x1x8xf32, #tpu.memory_space<vmem>>, %arg25: memref<4x8x32xbf16, #tpu.memory_space<vmem>>, %arg26: memref<1x32xf32, #tpu.memory_space<vmem>>, %arg27: memref<1x32xf32, #tpu.memory_space<vmem>>, %arg28: memref<1x32xf32, #tpu.memory_space<vmem>>, %arg29: memref<32x64xbf16, #tpu.memory_space<vmem>>, %arg30: memref<1x64xf32, #tpu.memory_space<vmem>>, %arg31: memref<64x32xbf16, #tpu.memory_space<vmem>>, %arg32: memref<1x32xf32, #tpu.memory_space<vmem>>, %arg33: memref<1x32xf32, #tpu.memory_space<vmem>>, %arg34: memref<1x32xf32, #tpu.memory_space<vmem>>, %arg35: memref<1x32xf32, #tpu.memory_space<vmem>>, %arg36: memref<1x1xf32, #tpu.memory_space<vmem>>, %arg37: memref<2x1xf32, #tpu.memory_space<vmem>>) attributes {dimension_semantics = [], scalar_prefetch = 0 : i64, scratch_operands = 0 : i64, tpu.core_type = #tpu.core_type<tc>} {
    %c0 = arith.constant 0 : index
    %c0_0 = arith.constant 0 : index
    %0 = vector.load %arg0[%c0, %c0_0] : memref<16x1xi32, #tpu.memory_space<vmem>>, vector<16x1xi32>
    %1 = tpu.iota {dimensions = array<i32: 1>} : vector<16x32xi32>
    %2 = vector.broadcast %0 : vector<16x1xi32> to vector<16x32xi32>
    %3 = arith.cmpi eq, %1, %2 : vector<16x32xi32>
    %4 = arith.extui %3 : vector<16x32xi1> to vector<16x32xi32>
    %5 = arith.sitofp %4 : vector<16x32xi32> to vector<16x32xf32>
    %6 = arith.truncf %5 : vector<16x32xf32> to vector<16x32xbf16>
    %c0_1 = arith.constant 0 : index
    %c0_2 = arith.constant 0 : index
    %7 = vector.load %arg1[%c0_1, %c0_2] : memref<32x32xbf16, #tpu.memory_space<vmem>>, vector<32x32xbf16>
    %cst = arith.constant dense<0.000000e+00> : vector<16x32xf32>
    %8 = tpu.matmul %6, %7, %cst {dimension_numbers = #tpu.dot_dimension_numbers<[1], [0], [0], [1], [0, 0, 1, 1], [], []>} : vector<16x32xbf16>, vector<32x32xbf16>, vector<16x32xf32> -> vector<16x32xf32>
    %9 = vector.shape_cast %8 : vector<16x32xf32> to vector<2x8x32xf32>
    %c0_3 = arith.constant 0 : index
    %c0_4 = arith.constant 0 : index
    %10 = vector.load %arg2[%c0_3, %c0_4] : memref<8x32xf32, #tpu.memory_space<vmem>>, vector<8x32xf32>
    %11 = vector.shape_cast %10 : vector<8x32xf32> to vector<1x8x32xf32>
    %12 = vector.broadcast %11 : vector<1x8x32xf32> to vector<2x8x32xf32>
    %13 = arith.addf %9, %12 : vector<2x8x32xf32>
    %14 = vector.shape_cast %13 : vector<2x8x32xf32> to vector<16x32xf32>
    %15 = arith.truncf %14 : vector<16x32xf32> to vector<16x32xbf16>
    %cst_5 = arith.constant 0.000000e+00 : f32
    %16 = vector.broadcast %cst_5 : f32 to vector<16x32xf32>
    %c0_6 = arith.constant 0 : index
    %c0_7 = arith.constant 0 : index
    %c0_8 = arith.constant 0 : index
    %17 = vector.load %arg3[%c0_6, %c0_7, %c0_8] : memref<4x32x8xbf16, #tpu.memory_space<vmem>>, vector<1x32x8xbf16>
    %18 = vector.shape_cast %17 : vector<1x32x8xbf16> to vector<32x8xbf16>
    %cst_9 = arith.constant dense<0.000000e+00> : vector<16x8xf32>
    %19 = tpu.matmul %15, %18, %cst_9 {dimension_numbers = #tpu.dot_dimension_numbers<[1], [0], [0], [1], [0, 0, 1, 1], [], []>} : vector<16x32xbf16>, vector<32x8xbf16>, vector<16x8xf32> -> vector<16x8xf32>
    %c0_10 = arith.constant 0 : index
    %c0_11 = arith.constant 0 : index
    %c0_12 = arith.constant 0 : index
    %20 = vector.load %arg6[%c0_10, %c0_11, %c0_12] : memref<4x1x8xf32, #tpu.memory_space<vmem>>, vector<1x1x8xf32>
    %21 = vector.shape_cast %20 : vector<1x1x8xf32> to vector<1x8xf32>
    %22 = vector.broadcast %21 : vector<1x8xf32> to vector<16x8xf32>
    %23 = arith.addf %19, %22 : vector<16x8xf32>
    %c0_13 = arith.constant 0 : index
    %c0_14 = arith.constant 0 : index
    %c0_15 = arith.constant 0 : index
    %24 = vector.load %arg4[%c0_13, %c0_14, %c0_15] : memref<4x32x8xbf16, #tpu.memory_space<vmem>>, vector<1x32x8xbf16>
    %25 = vector.shape_cast %24 : vector<1x32x8xbf16> to vector<32x8xbf16>
    %cst_16 = arith.constant dense<0.000000e+00> : vector<16x8xf32>
    %26 = tpu.matmul %15, %25, %cst_16 {dimension_numbers = #tpu.dot_dimension_numbers<[1], [0], [0], [1], [0, 0, 1, 1], [], []>} : vector<16x32xbf16>, vector<32x8xbf16>, vector<16x8xf32> -> vector<16x8xf32>
    %c0_17 = arith.constant 0 : index
    %c0_18 = arith.constant 0 : index
    %c0_19 = arith.constant 0 : index
    %27 = vector.load %arg7[%c0_17, %c0_18, %c0_19] : memref<4x1x8xf32, #tpu.memory_space<vmem>>, vector<1x1x8xf32>
    %28 = vector.shape_cast %27 : vector<1x1x8xf32> to vector<1x8xf32>
    %29 = vector.broadcast %28 : vector<1x8xf32> to vector<16x8xf32>
    %30 = arith.addf %26, %29 : vector<16x8xf32>
    %c0_20 = arith.constant 0 : index
    %c0_21 = arith.constant 0 : index
    %c0_22 = arith.constant 0 : index
    %31 = vector.load %arg5[%c0_20, %c0_21, %c0_22] : memref<4x32x8xbf16, #tpu.memory_space<vmem>>, vector<1x32x8xbf16>
    %32 = vector.shape_cast %31 : vector<1x32x8xbf16> to vector<32x8xbf16>
    %cst_23 = arith.constant dense<0.000000e+00> : vector<16x8xf32>
    %33 = tpu.matmul %15, %32, %cst_23 {dimension_numbers = #tpu.dot_dimension_numbers<[1], [0], [0], [1], [0, 0, 1, 1], [], []>} : vector<16x32xbf16>, vector<32x8xbf16>, vector<16x8xf32> -> vector<16x8xf32>
    %c0_24 = arith.constant 0 : index
    %c0_25 = arith.constant 0 : index
    %c0_26 = arith.constant 0 : index
    %34 = vector.load %arg8[%c0_24, %c0_25, %c0_26] : memref<4x1x8xf32, #tpu.memory_space<vmem>>, vector<1x1x8xf32>
    %35 = vector.shape_cast %34 : vector<1x1x8xf32> to vector<1x8xf32>
    %36 = vector.broadcast %35 : vector<1x8xf32> to vector<16x8xf32>
    %37 = arith.addf %33, %36 : vector<16x8xf32>
    %38 = vector.shape_cast %23 : vector<16x8xf32> to vector<2x8x8xf32>
    %39 = arith.truncf %38 : vector<2x8x8xf32> to vector<2x8x8xbf16>
    %40 = vector.shape_cast %30 : vector<16x8xf32> to vector<2x8x8xf32>
    %41 = arith.truncf %40 : vector<2x8x8xf32> to vector<2x8x8xbf16>
    %42 = vector.shape_cast %37 : vector<16x8xf32> to vector<2x8x8xf32>
    %43 = arith.truncf %42 : vector<2x8x8xf32> to vector<2x8x8xbf16>
    "tpu.trace_start"() <{level = 10 : i32, message = "bsd,btd->bst"}> : () -> ()
    %cst_27 = arith.constant dense<0.000000e+00> : vector<2x8x8xf32>
    %44 = tpu.matmul %39, %41, %cst_27 {dimension_numbers = #tpu.dot_dimension_numbers<[2], [2], [1], [1], [0, 0, 0, 1, 1, 1], [0], [0]>} : vector<2x8x8xbf16>, vector<2x8x8xbf16>, vector<2x8x8xf32> -> vector<2x8x8xf32>
    "tpu.trace_stop"() : () -> ()
    %cst_28 = arith.constant dense<0xFF800000> : vector<2x8xf32>
    %45 = vector.multi_reduction <maximumf>, %44, %cst_28 [2] : vector<2x8x8xf32> to vector<2x8xf32>
    %46 = vector.shape_cast %45 : vector<2x8xf32> to vector<2x8x1xf32>
    %47 = vector.broadcast %46 : vector<2x8x1xf32> to vector<2x8x8xf32>
    %48 = arith.subf %44, %47 : vector<2x8x8xf32>
    %49 = math.exp %48 : vector<2x8x8xf32>
    %cst_29 = arith.constant dense<0.000000e+00> : vector<2x8xf32>
    %50 = vector.multi_reduction <add>, %49, %cst_29 [2] : vector<2x8x8xf32> to vector<2x8xf32>
    %51 = vector.shape_cast %50 : vector<2x8xf32> to vector<2x8x1xf32>
    %52 = tpu.reciprocal %51 {approx = true} : vector<2x8x1xf32> -> vector<2x8x1xf32>
    %53 = vector.broadcast %52 : vector<2x8x1xf32> to vector<2x8x8xf32>
    %54 = arith.mulf %49, %53 : vector<2x8x8xf32>
    %55 = arith.truncf %54 : vector<2x8x8xf32> to vector<2x8x8xbf16>
    "tpu.trace_start"() <{level = 10 : i32, message = "bst,btd->bsd"}> : () -> ()
    %cst_30 = arith.constant dense<0.000000e+00> : vector<2x8x8xf32>
    %56 = tpu.matmul %55, %43, %cst_30 {dimension_numbers = #tpu.dot_dimension_numbers<[2], [1], [1], [2], [0, 0, 0, 1, 1, 2], [0], [0]>} : vector<2x8x8xbf16>, vector<2x8x8xbf16>, vector<2x8x8xf32> -> vector<2x8x8xf32>
    "tpu.trace_stop"() : () -> ()
    %57 = vector.shape_cast %56 : vector<2x8x8xf32> to vector<16x8xf32>
    %58 = arith.truncf %57 : vector<16x8xf32> to vector<16x8xbf16>
    %c0_31 = arith.constant 0 : index
    %c0_32 = arith.constant 0 : index
    %c0_33 = arith.constant 0 : index
    %59 = vector.load %arg9[%c0_31, %c0_32, %c0_33] : memref<4x8x32xbf16, #tpu.memory_space<vmem>>, vector<1x8x32xbf16>
    %60 = vector.shape_cast %59 : vector<1x8x32xbf16> to vector<8x32xbf16>
    %cst_34 = arith.constant dense<0.000000e+00> : vector<16x32xf32>
    %61 = tpu.matmul %58, %60, %cst_34 {dimension_numbers = #tpu.dot_dimension_numbers<[1], [0], [0], [1], [0, 0, 1, 1], [], []>} : vector<16x8xbf16>, vector<8x32xbf16>, vector<16x32xf32> -> vector<16x32xf32>
    %62 = arith.addf %16, %61 : vector<16x32xf32>
    %c1 = arith.constant 1 : index
    %c0_35 = arith.constant 0 : index
    %c0_36 = arith.constant 0 : index
    %63 = vector.load %arg3[%c1, %c0_35, %c0_36] : memref<4x32x8xbf16, #tpu.memory_space<vmem>>, vector<1x32x8xbf16>
    %64 = vector.shape_cast %63 : vector<1x32x8xbf16> to vector<32x8xbf16>
    %cst_37 = arith.constant dense<0.000000e+00> : vector<16x8xf32>
    %65 = tpu.matmul %15, %64, %cst_37 {dimension_numbers = #tpu.dot_dimension_numbers<[1], [0], [0], [1], [0, 0, 1, 1], [], []>} : vector<16x32xbf16>, vector<32x8xbf16>, vector<16x8xf32> -> vector<16x8xf32>
    %c1_38 = arith.constant 1 : index
    %c0_39 = arith.constant 0 : index
    %c0_40 = arith.constant 0 : index
    %66 = vector.load %arg6[%c1_38, %c0_39, %c0_40] : memref<4x1x8xf32, #tpu.memory_space<vmem>>, vector<1x1x8xf32>
    %67 = vector.shape_cast %66 : vector<1x1x8xf32> to vector<1x8xf32>
    %68 = vector.broadcast %67 : vector<1x8xf32> to vector<16x8xf32>
    %69 = arith.addf %65, %68 : vector<16x8xf32>
    %c1_41 = arith.constant 1 : index
    %c0_42 = arith.constant 0 : index
    %c0_43 = arith.constant 0 : index
    %70 = vector.load %arg4[%c1_41, %c0_42, %c0_43] : memref<4x32x8xbf16, #tpu.memory_space<vmem>>, vector<1x32x8xbf16>
    %71 = vector.shape_cast %70 : vector<1x32x8xbf16> to vector<32x8xbf16>
    %cst_44 = arith.constant dense<0.000000e+00> : vector<16x8xf32>
    %72 = tpu.matmul %15, %71, %cst_44 {dimension_numbers = #tpu.dot_dimension_numbers<[1], [0], [0], [1], [0, 0, 1, 1], [], []>} : vector<16x32xbf16>, vector<32x8xbf16>, vector<16x8xf32> -> vector<16x8xf32>
    %c1_45 = arith.constant 1 : index
    %c0_46 = arith.constant 0 : index
    %c0_47 = arith.constant 0 : index
    %73 = vector.load %arg7[%c1_45, %c0_46, %c0_47] : memref<4x1x8xf32, #tpu.memory_space<vmem>>, vector<1x1x8xf32>
    %74 = vector.shape_cast %73 : vector<1x1x8xf32> to vector<1x8xf32>
    %75 = vector.broadcast %74 : vector<1x8xf32> to vector<16x8xf32>
    %76 = arith.addf %72, %75 : vector<16x8xf32>
    %c1_48 = arith.constant 1 : index
    %c0_49 = arith.constant 0 : index
    %c0_50 = arith.constant 0 : index
    %77 = vector.load %arg5[%c1_48, %c0_49, %c0_50] : memref<4x32x8xbf16, #tpu.memory_space<vmem>>, vector<1x32x8xbf16>
    %78 = vector.shape_cast %77 : vector<1x32x8xbf16> to vector<32x8xbf16>
    %cst_51 = arith.constant dense<0.000000e+00> : vector<16x8xf32>
    %79 = tpu.matmul %15, %78, %cst_51 {dimension_numbers = #tpu.dot_dimension_numbers<[1], [0], [0], [1], [0, 0, 1, 1], [], []>} : vector<16x32xbf16>, vector<32x8xbf16>, vector<16x8xf32> -> vector<16x8xf32>
    %c1_52 = arith.constant 1 : index
    %c0_53 = arith.constant 0 : index
    %c0_54 = arith.constant 0 : index
    %80 = vector.load %arg8[%c1_52, %c0_53, %c0_54] : memref<4x1x8xf32, #tpu.memory_space<vmem>>, vector<1x1x8xf32>
    %81 = vector.shape_cast %80 : vector<1x1x8xf32> to vector<1x8xf32>
    %82 = vector.broadcast %81 : vector<1x8xf32> to vector<16x8xf32>
    %83 = arith.addf %79, %82 : vector<16x8xf32>
    %84 = vector.shape_cast %69 : vector<16x8xf32> to vector<2x8x8xf32>
    %85 = arith.truncf %84 : vector<2x8x8xf32> to vector<2x8x8xbf16>
    %86 = vector.shape_cast %76 : vector<16x8xf32> to vector<2x8x8xf32>
    %87 = arith.truncf %86 : vector<2x8x8xf32> to vector<2x8x8xbf16>
    %88 = vector.shape_cast %83 : vector<16x8xf32> to vector<2x8x8xf32>
    %89 = arith.truncf %88 : vector<2x8x8xf32> to vector<2x8x8xbf16>
    "tpu.trace_start"() <{level = 10 : i32, message = "bsd,btd->bst"}> : () -> ()
    %cst_55 = arith.constant dense<0.000000e+00> : vector<2x8x8xf32>
    %90 = tpu.matmul %85, %87, %cst_55 {dimension_numbers = #tpu.dot_dimension_numbers<[2], [2], [1], [1], [0, 0, 0, 1, 1, 1], [0], [0]>} : vector<2x8x8xbf16>, vector<2x8x8xbf16>, vector<2x8x8xf32> -> vector<2x8x8xf32>
    "tpu.trace_stop"() : () -> ()
    %cst_56 = arith.constant dense<0xFF800000> : vector<2x8xf32>
    %91 = vector.multi_reduction <maximumf>, %90, %cst_56 [2] : vector<2x8x8xf32> to vector<2x8xf32>
    %92 = vector.shape_cast %91 : vector<2x8xf32> to vector<2x8x1xf32>
    %93 = vector.broadcast %92 : vector<2x8x1xf32> to vector<2x8x8xf32>
    %94 = arith.subf %90, %93 : vector<2x8x8xf32>
    %95 = math.exp %94 : vector<2x8x8xf32>
    %cst_57 = arith.constant dense<0.000000e+00> : vector<2x8xf32>
    %96 = vector.multi_reduction <add>, %95, %cst_57 [2] : vector<2x8x8xf32> to vector<2x8xf32>
    %97 = vector.shape_cast %96 : vector<2x8xf32> to vector<2x8x1xf32>
    %98 = tpu.reciprocal %97 {approx = true} : vector<2x8x1xf32> -> vector<2x8x1xf32>
    %99 = vector.broadcast %98 : vector<2x8x1xf32> to vector<2x8x8xf32>
    %100 = arith.mulf %95, %99 : vector<2x8x8xf32>
    %101 = arith.truncf %100 : vector<2x8x8xf32> to vector<2x8x8xbf16>
    "tpu.trace_start"() <{level = 10 : i32, message = "bst,btd->bsd"}> : () -> ()
    %cst_58 = arith.constant dense<0.000000e+00> : vector<2x8x8xf32>
    %102 = tpu.matmul %101, %89, %cst_58 {dimension_numbers = #tpu.dot_dimension_numbers<[2], [1], [1], [2], [0, 0, 0, 1, 1, 2], [0], [0]>} : vector<2x8x8xbf16>, vector<2x8x8xbf16>, vector<2x8x8xf32> -> vector<2x8x8xf32>
    "tpu.trace_stop"() : () -> ()
    %103 = vector.shape_cast %102 : vector<2x8x8xf32> to vector<16x8xf32>
    %104 = arith.truncf %103 : vector<16x8xf32> to vector<16x8xbf16>
    %c1_59 = arith.constant 1 : index
    %c0_60 = arith.constant 0 : index
    %c0_61 = arith.constant 0 : index
    %105 = vector.load %arg9[%c1_59, %c0_60, %c0_61] : memref<4x8x32xbf16, #tpu.memory_space<vmem>>, vector<1x8x32xbf16>
    %106 = vector.shape_cast %105 : vector<1x8x32xbf16> to vector<8x32xbf16>
    %cst_62 = arith.constant dense<0.000000e+00> : vector<16x32xf32>
    %107 = tpu.matmul %104, %106, %cst_62 {dimension_numbers = #tpu.dot_dimension_numbers<[1], [0], [0], [1], [0, 0, 1, 1], [], []>} : vector<16x8xbf16>, vector<8x32xbf16>, vector<16x32xf32> -> vector<16x32xf32>
    %108 = arith.addf %62, %107 : vector<16x32xf32>
    %c2 = arith.constant 2 : index
    %c0_63 = arith.constant 0 : index
    %c0_64 = arith.constant 0 : index
    %109 = vector.load %arg3[%c2, %c0_63, %c0_64] : memref<4x32x8xbf16, #tpu.memory_space<vmem>>, vector<1x32x8xbf16>
    %110 = vector.shape_cast %109 : vector<1x32x8xbf16> to vector<32x8xbf16>
    %cst_65 = arith.constant dense<0.000000e+00> : vector<16x8xf32>
    %111 = tpu.matmul %15, %110, %cst_65 {dimension_numbers = #tpu.dot_dimension_numbers<[1], [0], [0], [1], [0, 0, 1, 1], [], []>} : vector<16x32xbf16>, vector<32x8xbf16>, vector<16x8xf32> -> vector<16x8xf32>
    %c2_66 = arith.constant 2 : index
    %c0_67 = arith.constant 0 : index
    %c0_68 = arith.constant 0 : index
    %112 = vector.load %arg6[%c2_66, %c0_67, %c0_68] : memref<4x1x8xf32, #tpu.memory_space<vmem>>, vector<1x1x8xf32>
    %113 = vector.shape_cast %112 : vector<1x1x8xf32> to vector<1x8xf32>
    %114 = vector.broadcast %113 : vector<1x8xf32> to vector<16x8xf32>
    %115 = arith.addf %111, %114 : vector<16x8xf32>
    %c2_69 = arith.constant 2 : index
    %c0_70 = arith.constant 0 : index
    %c0_71 = arith.constant 0 : index
    %116 = vector.load %arg4[%c2_69, %c0_70, %c0_71] : memref<4x32x8xbf16, #tpu.memory_space<vmem>>, vector<1x32x8xbf16>
    %117 = vector.shape_cast %116 : vector<1x32x8xbf16> to vector<32x8xbf16>
    %cst_72 = arith.constant dense<0.000000e+00> : vector<16x8xf32>
    %118 = tpu.matmul %15, %117, %cst_72 {dimension_numbers = #tpu.dot_dimension_numbers<[1], [0], [0], [1], [0, 0, 1, 1], [], []>} : vector<16x32xbf16>, vector<32x8xbf16>, vector<16x8xf32> -> vector<16x8xf32>
    %c2_73 = arith.constant 2 : index
    %c0_74 = arith.constant 0 : index
    %c0_75 = arith.constant 0 : index
    %119 = vector.load %arg7[%c2_73, %c0_74, %c0_75] : memref<4x1x8xf32, #tpu.memory_space<vmem>>, vector<1x1x8xf32>
    %120 = vector.shape_cast %119 : vector<1x1x8xf32> to vector<1x8xf32>
    %121 = vector.broadcast %120 : vector<1x8xf32> to vector<16x8xf32>
    %122 = arith.addf %118, %121 : vector<16x8xf32>
    %c2_76 = arith.constant 2 : index
    %c0_77 = arith.constant 0 : index
    %c0_78 = arith.constant 0 : index
    %123 = vector.load %arg5[%c2_76, %c0_77, %c0_78] : memref<4x32x8xbf16, #tpu.memory_space<vmem>>, vector<1x32x8xbf16>
    %124 = vector.shape_cast %123 : vector<1x32x8xbf16> to vector<32x8xbf16>
    %cst_79 = arith.constant dense<0.000000e+00> : vector<16x8xf32>
    %125 = tpu.matmul %15, %124, %cst_79 {dimension_numbers = #tpu.dot_dimension_numbers<[1], [0], [0], [1], [0, 0, 1, 1], [], []>} : vector<16x32xbf16>, vector<32x8xbf16>, vector<16x8xf32> -> vector<16x8xf32>
    %c2_80 = arith.constant 2 : index
    %c0_81 = arith.constant 0 : index
    %c0_82 = arith.constant 0 : index
    %126 = vector.load %arg8[%c2_80, %c0_81, %c0_82] : memref<4x1x8xf32, #tpu.memory_space<vmem>>, vector<1x1x8xf32>
    %127 = vector.shape_cast %126 : vector<1x1x8xf32> to vector<1x8xf32>
    %128 = vector.broadcast %127 : vector<1x8xf32> to vector<16x8xf32>
    %129 = arith.addf %125, %128 : vector<16x8xf32>
    %130 = vector.shape_cast %115 : vector<16x8xf32> to vector<2x8x8xf32>
    %131 = arith.truncf %130 : vector<2x8x8xf32> to vector<2x8x8xbf16>
    %132 = vector.shape_cast %122 : vector<16x8xf32> to vector<2x8x8xf32>
    %133 = arith.truncf %132 : vector<2x8x8xf32> to vector<2x8x8xbf16>
    %134 = vector.shape_cast %129 : vector<16x8xf32> to vector<2x8x8xf32>
    %135 = arith.truncf %134 : vector<2x8x8xf32> to vector<2x8x8xbf16>
    "tpu.trace_start"() <{level = 10 : i32, message = "bsd,btd->bst"}> : () -> ()
    %cst_83 = arith.constant dense<0.000000e+00> : vector<2x8x8xf32>
    %136 = tpu.matmul %131, %133, %cst_83 {dimension_numbers = #tpu.dot_dimension_numbers<[2], [2], [1], [1], [0, 0, 0, 1, 1, 1], [0], [0]>} : vector<2x8x8xbf16>, vector<2x8x8xbf16>, vector<2x8x8xf32> -> vector<2x8x8xf32>
    "tpu.trace_stop"() : () -> ()
    %cst_84 = arith.constant dense<0xFF800000> : vector<2x8xf32>
    %137 = vector.multi_reduction <maximumf>, %136, %cst_84 [2] : vector<2x8x8xf32> to vector<2x8xf32>
    %138 = vector.shape_cast %137 : vector<2x8xf32> to vector<2x8x1xf32>
    %139 = vector.broadcast %138 : vector<2x8x1xf32> to vector<2x8x8xf32>
    %140 = arith.subf %136, %139 : vector<2x8x8xf32>
    %141 = math.exp %140 : vector<2x8x8xf32>
    %cst_85 = arith.constant dense<0.000000e+00> : vector<2x8xf32>
    %142 = vector.multi_reduction <add>, %141, %cst_85 [2] : vector<2x8x8xf32> to vector<2x8xf32>
    %143 = vector.shape_cast %142 : vector<2x8xf32> to vector<2x8x1xf32>
    %144 = tpu.reciprocal %143 {approx = true} : vector<2x8x1xf32> -> vector<2x8x1xf32>
    %145 = vector.broadcast %144 : vector<2x8x1xf32> to vector<2x8x8xf32>
    %146 = arith.mulf %141, %145 : vector<2x8x8xf32>
    %147 = arith.truncf %146 : vector<2x8x8xf32> to vector<2x8x8xbf16>
    "tpu.trace_start"() <{level = 10 : i32, message = "bst,btd->bsd"}> : () -> ()
    %cst_86 = arith.constant dense<0.000000e+00> : vector<2x8x8xf32>
    %148 = tpu.matmul %147, %135, %cst_86 {dimension_numbers = #tpu.dot_dimension_numbers<[2], [1], [1], [2], [0, 0, 0, 1, 1, 2], [0], [0]>} : vector<2x8x8xbf16>, vector<2x8x8xbf16>, vector<2x8x8xf32> -> vector<2x8x8xf32>
    "tpu.trace_stop"() : () -> ()
    %149 = vector.shape_cast %148 : vector<2x8x8xf32> to vector<16x8xf32>
    %150 = arith.truncf %149 : vector<16x8xf32> to vector<16x8xbf16>
    %c2_87 = arith.constant 2 : index
    %c0_88 = arith.constant 0 : index
    %c0_89 = arith.constant 0 : index
    %151 = vector.load %arg9[%c2_87, %c0_88, %c0_89] : memref<4x8x32xbf16, #tpu.memory_space<vmem>>, vector<1x8x32xbf16>
    %152 = vector.shape_cast %151 : vector<1x8x32xbf16> to vector<8x32xbf16>
    %cst_90 = arith.constant dense<0.000000e+00> : vector<16x32xf32>
    %153 = tpu.matmul %150, %152, %cst_90 {dimension_numbers = #tpu.dot_dimension_numbers<[1], [0], [0], [1], [0, 0, 1, 1], [], []>} : vector<16x8xbf16>, vector<8x32xbf16>, vector<16x32xf32> -> vector<16x32xf32>
    %154 = arith.addf %108, %153 : vector<16x32xf32>
    %c3 = arith.constant 3 : index
    %c0_91 = arith.constant 0 : index
    %c0_92 = arith.constant 0 : index
    %155 = vector.load %arg3[%c3, %c0_91, %c0_92] : memref<4x32x8xbf16, #tpu.memory_space<vmem>>, vector<1x32x8xbf16>
    %156 = vector.shape_cast %155 : vector<1x32x8xbf16> to vector<32x8xbf16>
    %cst_93 = arith.constant dense<0.000000e+00> : vector<16x8xf32>
    %157 = tpu.matmul %15, %156, %cst_93 {dimension_numbers = #tpu.dot_dimension_numbers<[1], [0], [0], [1], [0, 0, 1, 1], [], []>} : vector<16x32xbf16>, vector<32x8xbf16>, vector<16x8xf32> -> vector<16x8xf32>
    %c3_94 = arith.constant 3 : index
    %c0_95 = arith.constant 0 : index
    %c0_96 = arith.constant 0 : index
    %158 = vector.load %arg6[%c3_94, %c0_95, %c0_96] : memref<4x1x8xf32, #tpu.memory_space<vmem>>, vector<1x1x8xf32>
    %159 = vector.shape_cast %158 : vector<1x1x8xf32> to vector<1x8xf32>
    %160 = vector.broadcast %159 : vector<1x8xf32> to vector<16x8xf32>
    %161 = arith.addf %157, %160 : vector<16x8xf32>
    %c3_97 = arith.constant 3 : index
    %c0_98 = arith.constant 0 : index
    %c0_99 = arith.constant 0 : index
    %162 = vector.load %arg4[%c3_97, %c0_98, %c0_99] : memref<4x32x8xbf16, #tpu.memory_space<vmem>>, vector<1x32x8xbf16>
    %163 = vector.shape_cast %162 : vector<1x32x8xbf16> to vector<32x8xbf16>
    %cst_100 = arith.constant dense<0.000000e+00> : vector<16x8xf32>
    %164 = tpu.matmul %15, %163, %cst_100 {dimension_numbers = #tpu.dot_dimension_numbers<[1], [0], [0], [1], [0, 0, 1, 1], [], []>} : vector<16x32xbf16>, vector<32x8xbf16>, vector<16x8xf32> -> vector<16x8xf32>
    %c3_101 = arith.constant 3 : index
    %c0_102 = arith.constant 0 : index
    %c0_103 = arith.constant 0 : index
    %165 = vector.load %arg7[%c3_101, %c0_102, %c0_103] : memref<4x1x8xf32, #tpu.memory_space<vmem>>, vector<1x1x8xf32>
    %166 = vector.shape_cast %165 : vector<1x1x8xf32> to vector<1x8xf32>
    %167 = vector.broadcast %166 : vector<1x8xf32> to vector<16x8xf32>
    %168 = arith.addf %164, %167 : vector<16x8xf32>
    %c3_104 = arith.constant 3 : index
    %c0_105 = arith.constant 0 : index
    %c0_106 = arith.constant 0 : index
    %169 = vector.load %arg5[%c3_104, %c0_105, %c0_106] : memref<4x32x8xbf16, #tpu.memory_space<vmem>>, vector<1x32x8xbf16>
    %170 = vector.shape_cast %169 : vector<1x32x8xbf16> to vector<32x8xbf16>
    %cst_107 = arith.constant dense<0.000000e+00> : vector<16x8xf32>
    %171 = tpu.matmul %15, %170, %cst_107 {dimension_numbers = #tpu.dot_dimension_numbers<[1], [0], [0], [1], [0, 0, 1, 1], [], []>} : vector<16x32xbf16>, vector<32x8xbf16>, vector<16x8xf32> -> vector<16x8xf32>
    %c3_108 = arith.constant 3 : index
    %c0_109 = arith.constant 0 : index
    %c0_110 = arith.constant 0 : index
    %172 = vector.load %arg8[%c3_108, %c0_109, %c0_110] : memref<4x1x8xf32, #tpu.memory_space<vmem>>, vector<1x1x8xf32>
    %173 = vector.shape_cast %172 : vector<1x1x8xf32> to vector<1x8xf32>
    %174 = vector.broadcast %173 : vector<1x8xf32> to vector<16x8xf32>
    %175 = arith.addf %171, %174 : vector<16x8xf32>
    %176 = vector.shape_cast %161 : vector<16x8xf32> to vector<2x8x8xf32>
    %177 = arith.truncf %176 : vector<2x8x8xf32> to vector<2x8x8xbf16>
    %178 = vector.shape_cast %168 : vector<16x8xf32> to vector<2x8x8xf32>
    %179 = arith.truncf %178 : vector<2x8x8xf32> to vector<2x8x8xbf16>
    %180 = vector.shape_cast %175 : vector<16x8xf32> to vector<2x8x8xf32>
    %181 = arith.truncf %180 : vector<2x8x8xf32> to vector<2x8x8xbf16>
    "tpu.trace_start"() <{level = 10 : i32, message = "bsd,btd->bst"}> : () -> ()
    %cst_111 = arith.constant dense<0.000000e+00> : vector<2x8x8xf32>
    %182 = tpu.matmul %177, %179, %cst_111 {dimension_numbers = #tpu.dot_dimension_numbers<[2], [2], [1], [1], [0, 0, 0, 1, 1, 1], [0], [0]>} : vector<2x8x8xbf16>, vector<2x8x8xbf16>, vector<2x8x8xf32> -> vector<2x8x8xf32>
    "tpu.trace_stop"() : () -> ()
    %cst_112 = arith.constant dense<0xFF800000> : vector<2x8xf32>
    %183 = vector.multi_reduction <maximumf>, %182, %cst_112 [2] : vector<2x8x8xf32> to vector<2x8xf32>
    %184 = vector.shape_cast %183 : vector<2x8xf32> to vector<2x8x1xf32>
    %185 = vector.broadcast %184 : vector<2x8x1xf32> to vector<2x8x8xf32>
    %186 = arith.subf %182, %185 : vector<2x8x8xf32>
    %187 = math.exp %186 : vector<2x8x8xf32>
    %cst_113 = arith.constant dense<0.000000e+00> : vector<2x8xf32>
    %188 = vector.multi_reduction <add>, %187, %cst_113 [2] : vector<2x8x8xf32> to vector<2x8xf32>
    %189 = vector.shape_cast %188 : vector<2x8xf32> to vector<2x8x1xf32>
    %190 = tpu.reciprocal %189 {approx = true} : vector<2x8x1xf32> -> vector<2x8x1xf32>
    %191 = vector.broadcast %190 : vector<2x8x1xf32> to vector<2x8x8xf32>
    %192 = arith.mulf %187, %191 : vector<2x8x8xf32>
    %193 = arith.truncf %192 : vector<2x8x8xf32> to vector<2x8x8xbf16>
    "tpu.trace_start"() <{level = 10 : i32, message = "bst,btd->bsd"}> : () -> ()
    %cst_114 = arith.constant dense<0.000000e+00> : vector<2x8x8xf32>
    %194 = tpu.matmul %193, %181, %cst_114 {dimension_numbers = #tpu.dot_dimension_numbers<[2], [1], [1], [2], [0, 0, 0, 1, 1, 2], [0], [0]>} : vector<2x8x8xbf16>, vector<2x8x8xbf16>, vector<2x8x8xf32> -> vector<2x8x8xf32>
    "tpu.trace_stop"() : () -> ()
    %195 = vector.shape_cast %194 : vector<2x8x8xf32> to vector<16x8xf32>
    %196 = arith.truncf %195 : vector<16x8xf32> to vector<16x8xbf16>
    %c3_115 = arith.constant 3 : index
    %c0_116 = arith.constant 0 : index
    %c0_117 = arith.constant 0 : index
    %197 = vector.load %arg9[%c3_115, %c0_116, %c0_117] : memref<4x8x32xbf16, #tpu.memory_space<vmem>>, vector<1x8x32xbf16>
    %198 = vector.shape_cast %197 : vector<1x8x32xbf16> to vector<8x32xbf16>
    %cst_118 = arith.constant dense<0.000000e+00> : vector<16x32xf32>
    %199 = tpu.matmul %196, %198, %cst_118 {dimension_numbers = #tpu.dot_dimension_numbers<[1], [0], [0], [1], [0, 0, 1, 1], [], []>} : vector<16x8xbf16>, vector<8x32xbf16>, vector<16x32xf32> -> vector<16x32xf32>
    %200 = arith.addf %154, %199 : vector<16x32xf32>
    %201 = arith.addf %14, %200 : vector<16x32xf32>
    %c0_119 = arith.constant 0 : index
    %c0_120 = arith.constant 0 : index
    %202 = vector.load %arg10[%c0_119, %c0_120] : memref<1x32xf32, #tpu.memory_space<vmem>>, vector<1x32xf32>
    %203 = vector.broadcast %202 : vector<1x32xf32> to vector<16x32xf32>
    %204 = arith.addf %201, %203 : vector<16x32xf32>
    %c0_121 = arith.constant 0 : index
    %c0_122 = arith.constant 0 : index
    %205 = vector.load %arg11[%c0_121, %c0_122] : memref<1x32xf32, #tpu.memory_space<vmem>>, vector<1x32xf32>
    %c0_123 = arith.constant 0 : index
    %c0_124 = arith.constant 0 : index
    %206 = vector.load %arg12[%c0_123, %c0_124] : memref<1x32xf32, #tpu.memory_space<vmem>>, vector<1x32xf32>
    %cst_125 = arith.constant dense<0.000000e+00> : vector<16xf32>
    %207 = vector.multi_reduction <add>, %204, %cst_125 [1] : vector<16x32xf32> to vector<16xf32>
    %208 = vector.shape_cast %207 : vector<16xf32> to vector<16x1xf32>
    %cst_126 = arith.constant 3.200000e+01 : f32
    %209 = vector.broadcast %cst_126 : f32 to vector<16x1xf32>
    %210 = arith.divf %208, %209 : vector<16x1xf32>
    %211 = arith.mulf %204, %204 : vector<16x32xf32>
    %cst_127 = arith.constant dense<0.000000e+00> : vector<16xf32>
    %212 = vector.multi_reduction <add>, %211, %cst_127 [1] : vector<16x32xf32> to vector<16xf32>
    %213 = vector.shape_cast %212 : vector<16xf32> to vector<16x1xf32>
    %cst_128 = arith.constant 3.200000e+01 : f32
    %214 = vector.broadcast %cst_128 : f32 to vector<16x1xf32>
    %215 = arith.divf %213, %214 : vector<16x1xf32>
    %216 = arith.mulf %210, %210 : vector<16x1xf32>
    %217 = arith.subf %215, %216 : vector<16x1xf32>
    %cst_129 = arith.constant 9.99999974E-6 : f32
    %218 = vector.broadcast %cst_129 : f32 to vector<16x1xf32>
    %219 = arith.addf %217, %218 : vector<16x1xf32>
    %220 = math.rsqrt %219 : vector<16x1xf32>
    %221 = vector.broadcast %220 : vector<16x1xf32> to vector<16x32xf32>
    %222 = vector.broadcast %205 : vector<1x32xf32> to vector<16x32xf32>
    %223 = arith.mulf %221, %222 : vector<16x32xf32>
    %224 = vector.broadcast %210 : vector<16x1xf32> to vector<16x32xf32>
    %225 = arith.subf %204, %224 : vector<16x32xf32>
    %226 = arith.mulf %225, %223 : vector<16x32xf32>
    %227 = vector.broadcast %206 : vector<1x32xf32> to vector<16x32xf32>
    %228 = arith.addf %226, %227 : vector<16x32xf32>
    %229 = arith.truncf %228 : vector<16x32xf32> to vector<16x32xbf16>
    %c0_130 = arith.constant 0 : index
    %c0_131 = arith.constant 0 : index
    %230 = vector.load %arg13[%c0_130, %c0_131] : memref<32x64xbf16, #tpu.memory_space<vmem>>, vector<32x64xbf16>
    %cst_132 = arith.constant dense<0.000000e+00> : vector<16x64xf32>
    %231 = tpu.matmul %229, %230, %cst_132 {dimension_numbers = #tpu.dot_dimension_numbers<[1], [0], [0], [1], [0, 0, 1, 1], [], []>} : vector<16x32xbf16>, vector<32x64xbf16>, vector<16x64xf32> -> vector<16x64xf32>
    %c0_133 = arith.constant 0 : index
    %c0_134 = arith.constant 0 : index
    %232 = vector.load %arg14[%c0_133, %c0_134] : memref<1x64xf32, #tpu.memory_space<vmem>>, vector<1x64xf32>
    %233 = vector.broadcast %232 : vector<1x64xf32> to vector<16x64xf32>
    %234 = arith.addf %231, %233 : vector<16x64xf32>
    %cst_135 = arith.constant 0.000000e+00 : f32
    %235 = vector.broadcast %cst_135 : f32 to vector<16x64xf32>
    %236 = arith.maximumf %234, %235 : vector<16x64xf32>
    %237 = arith.truncf %236 : vector<16x64xf32> to vector<16x64xbf16>
    %c0_136 = arith.constant 0 : index
    %c0_137 = arith.constant 0 : index
    %238 = vector.load %arg15[%c0_136, %c0_137] : memref<64x32xbf16, #tpu.memory_space<vmem>>, vector<64x32xbf16>
    %cst_138 = arith.constant dense<0.000000e+00> : vector<16x32xf32>
    %239 = tpu.matmul %237, %238, %cst_138 {dimension_numbers = #tpu.dot_dimension_numbers<[1], [0], [0], [1], [0, 0, 1, 1], [], []>} : vector<16x64xbf16>, vector<64x32xbf16>, vector<16x32xf32> -> vector<16x32xf32>
    %c0_139 = arith.constant 0 : index
    %c0_140 = arith.constant 0 : index
    %240 = vector.load %arg16[%c0_139, %c0_140] : memref<1x32xf32, #tpu.memory_space<vmem>>, vector<1x32xf32>
    %241 = vector.broadcast %240 : vector<1x32xf32> to vector<16x32xf32>
    %242 = arith.addf %239, %241 : vector<16x32xf32>
    %243 = arith.addf %228, %242 : vector<16x32xf32>
    %c0_141 = arith.constant 0 : index
    %c0_142 = arith.constant 0 : index
    %244 = vector.load %arg17[%c0_141, %c0_142] : memref<1x32xf32, #tpu.memory_space<vmem>>, vector<1x32xf32>
    %c0_143 = arith.constant 0 : index
    %c0_144 = arith.constant 0 : index
    %245 = vector.load %arg18[%c0_143, %c0_144] : memref<1x32xf32, #tpu.memory_space<vmem>>, vector<1x32xf32>
    %cst_145 = arith.constant dense<0.000000e+00> : vector<16xf32>
    %246 = vector.multi_reduction <add>, %243, %cst_145 [1] : vector<16x32xf32> to vector<16xf32>
    %247 = vector.shape_cast %246 : vector<16xf32> to vector<16x1xf32>
    %cst_146 = arith.constant 3.200000e+01 : f32
    %248 = vector.broadcast %cst_146 : f32 to vector<16x1xf32>
    %249 = arith.divf %247, %248 : vector<16x1xf32>
    %250 = arith.mulf %243, %243 : vector<16x32xf32>
    %cst_147 = arith.constant dense<0.000000e+00> : vector<16xf32>
    %251 = vector.multi_reduction <add>, %250, %cst_147 [1] : vector<16x32xf32> to vector<16xf32>
    %252 = vector.shape_cast %251 : vector<16xf32> to vector<16x1xf32>
    %cst_148 = arith.constant 3.200000e+01 : f32
    %253 = vector.broadcast %cst_148 : f32 to vector<16x1xf32>
    %254 = arith.divf %252, %253 : vector<16x1xf32>
    %255 = arith.mulf %249, %249 : vector<16x1xf32>
    %256 = arith.subf %254, %255 : vector<16x1xf32>
    %cst_149 = arith.constant 9.99999974E-6 : f32
    %257 = vector.broadcast %cst_149 : f32 to vector<16x1xf32>
    %258 = arith.addf %256, %257 : vector<16x1xf32>
    %259 = math.rsqrt %258 : vector<16x1xf32>
    %260 = vector.broadcast %259 : vector<16x1xf32> to vector<16x32xf32>
    %261 = vector.broadcast %244 : vector<1x32xf32> to vector<16x32xf32>
    %262 = arith.mulf %260, %261 : vector<16x32xf32>
    %263 = vector.broadcast %249 : vector<16x1xf32> to vector<16x32xf32>
    %264 = arith.subf %243, %263 : vector<16x32xf32>
    %265 = arith.mulf %264, %262 : vector<16x32xf32>
    %266 = vector.broadcast %245 : vector<1x32xf32> to vector<16x32xf32>
    %267 = arith.addf %265, %266 : vector<16x32xf32>
    %268 = arith.truncf %267 : vector<16x32xf32> to vector<16x32xbf16>
    %cst_150 = arith.constant 0.000000e+00 : f32
    %269 = vector.broadcast %cst_150 : f32 to vector<16x32xf32>
    %c0_151 = arith.constant 0 : index
    %c0_152 = arith.constant 0 : index
    %c0_153 = arith.constant 0 : index
    %270 = vector.load %arg19[%c0_151, %c0_152, %c0_153] : memref<4x32x8xbf16, #tpu.memory_space<vmem>>, vector<1x32x8xbf16>
    %271 = vector.shape_cast %270 : vector<1x32x8xbf16> to vector<32x8xbf16>
    %cst_154 = arith.constant dense<0.000000e+00> : vector<16x8xf32>
    %272 = tpu.matmul %268, %271, %cst_154 {dimension_numbers = #tpu.dot_dimension_numbers<[1], [0], [0], [1], [0, 0, 1, 1], [], []>} : vector<16x32xbf16>, vector<32x8xbf16>, vector<16x8xf32> -> vector<16x8xf32>
    %c0_155 = arith.constant 0 : index
    %c0_156 = arith.constant 0 : index
    %c0_157 = arith.constant 0 : index
    %273 = vector.load %arg22[%c0_155, %c0_156, %c0_157] : memref<4x1x8xf32, #tpu.memory_space<vmem>>, vector<1x1x8xf32>
    %274 = vector.shape_cast %273 : vector<1x1x8xf32> to vector<1x8xf32>
    %275 = vector.broadcast %274 : vector<1x8xf32> to vector<16x8xf32>
    %276 = arith.addf %272, %275 : vector<16x8xf32>
    %c0_158 = arith.constant 0 : index
    %c0_159 = arith.constant 0 : index
    %c0_160 = arith.constant 0 : index
    %277 = vector.load %arg20[%c0_158, %c0_159, %c0_160] : memref<4x32x8xbf16, #tpu.memory_space<vmem>>, vector<1x32x8xbf16>
    %278 = vector.shape_cast %277 : vector<1x32x8xbf16> to vector<32x8xbf16>
    %cst_161 = arith.constant dense<0.000000e+00> : vector<16x8xf32>
    %279 = tpu.matmul %268, %278, %cst_161 {dimension_numbers = #tpu.dot_dimension_numbers<[1], [0], [0], [1], [0, 0, 1, 1], [], []>} : vector<16x32xbf16>, vector<32x8xbf16>, vector<16x8xf32> -> vector<16x8xf32>
    %c0_162 = arith.constant 0 : index
    %c0_163 = arith.constant 0 : index
    %c0_164 = arith.constant 0 : index
    %280 = vector.load %arg23[%c0_162, %c0_163, %c0_164] : memref<4x1x8xf32, #tpu.memory_space<vmem>>, vector<1x1x8xf32>
    %281 = vector.shape_cast %280 : vector<1x1x8xf32> to vector<1x8xf32>
    %282 = vector.broadcast %281 : vector<1x8xf32> to vector<16x8xf32>
    %283 = arith.addf %279, %282 : vector<16x8xf32>
    %c0_165 = arith.constant 0 : index
    %c0_166 = arith.constant 0 : index
    %c0_167 = arith.constant 0 : index
    %284 = vector.load %arg21[%c0_165, %c0_166, %c0_167] : memref<4x32x8xbf16, #tpu.memory_space<vmem>>, vector<1x32x8xbf16>
    %285 = vector.shape_cast %284 : vector<1x32x8xbf16> to vector<32x8xbf16>
    %cst_168 = arith.constant dense<0.000000e+00> : vector<16x8xf32>
    %286 = tpu.matmul %268, %285, %cst_168 {dimension_numbers = #tpu.dot_dimension_numbers<[1], [0], [0], [1], [0, 0, 1, 1], [], []>} : vector<16x32xbf16>, vector<32x8xbf16>, vector<16x8xf32> -> vector<16x8xf32>
    %c0_169 = arith.constant 0 : index
    %c0_170 = arith.constant 0 : index
    %c0_171 = arith.constant 0 : index
    %287 = vector.load %arg24[%c0_169, %c0_170, %c0_171] : memref<4x1x8xf32, #tpu.memory_space<vmem>>, vector<1x1x8xf32>
    %288 = vector.shape_cast %287 : vector<1x1x8xf32> to vector<1x8xf32>
    %289 = vector.broadcast %288 : vector<1x8xf32> to vector<16x8xf32>
    %290 = arith.addf %286, %289 : vector<16x8xf32>
    %291 = vector.shape_cast %276 : vector<16x8xf32> to vector<2x8x8xf32>
    %292 = arith.truncf %291 : vector<2x8x8xf32> to vector<2x8x8xbf16>
    %293 = vector.shape_cast %283 : vector<16x8xf32> to vector<2x8x8xf32>
    %294 = arith.truncf %293 : vector<2x8x8xf32> to vector<2x8x8xbf16>
    %295 = vector.shape_cast %290 : vector<16x8xf32> to vector<2x8x8xf32>
    %296 = arith.truncf %295 : vector<2x8x8xf32> to vector<2x8x8xbf16>
    "tpu.trace_start"() <{level = 10 : i32, message = "bsd,btd->bst"}> : () -> ()
    %cst_172 = arith.constant dense<0.000000e+00> : vector<2x8x8xf32>
    %297 = tpu.matmul %292, %294, %cst_172 {dimension_numbers = #tpu.dot_dimension_numbers<[2], [2], [1], [1], [0, 0, 0, 1, 1, 1], [0], [0]>} : vector<2x8x8xbf16>, vector<2x8x8xbf16>, vector<2x8x8xf32> -> vector<2x8x8xf32>
    "tpu.trace_stop"() : () -> ()
    %cst_173 = arith.constant dense<0xFF800000> : vector<2x8xf32>
    %298 = vector.multi_reduction <maximumf>, %297, %cst_173 [2] : vector<2x8x8xf32> to vector<2x8xf32>
    %299 = vector.shape_cast %298 : vector<2x8xf32> to vector<2x8x1xf32>
    %300 = vector.broadcast %299 : vector<2x8x1xf32> to vector<2x8x8xf32>
    %301 = arith.subf %297, %300 : vector<2x8x8xf32>
    %302 = math.exp %301 : vector<2x8x8xf32>
    %cst_174 = arith.constant dense<0.000000e+00> : vector<2x8xf32>
    %303 = vector.multi_reduction <add>, %302, %cst_174 [2] : vector<2x8x8xf32> to vector<2x8xf32>
    %304 = vector.shape_cast %303 : vector<2x8xf32> to vector<2x8x1xf32>
    %305 = tpu.reciprocal %304 {approx = true} : vector<2x8x1xf32> -> vector<2x8x1xf32>
    %306 = vector.broadcast %305 : vector<2x8x1xf32> to vector<2x8x8xf32>
    %307 = arith.mulf %302, %306 : vector<2x8x8xf32>
    %308 = arith.truncf %307 : vector<2x8x8xf32> to vector<2x8x8xbf16>
    "tpu.trace_start"() <{level = 10 : i32, message = "bst,btd->bsd"}> : () -> ()
    %cst_175 = arith.constant dense<0.000000e+00> : vector<2x8x8xf32>
    %309 = tpu.matmul %308, %296, %cst_175 {dimension_numbers = #tpu.dot_dimension_numbers<[2], [1], [1], [2], [0, 0, 0, 1, 1, 2], [0], [0]>} : vector<2x8x8xbf16>, vector<2x8x8xbf16>, vector<2x8x8xf32> -> vector<2x8x8xf32>
    "tpu.trace_stop"() : () -> ()
    %310 = vector.shape_cast %309 : vector<2x8x8xf32> to vector<16x8xf32>
    %311 = arith.truncf %310 : vector<16x8xf32> to vector<16x8xbf16>
    %c0_176 = arith.constant 0 : index
    %c0_177 = arith.constant 0 : index
    %c0_178 = arith.constant 0 : index
    %312 = vector.load %arg25[%c0_176, %c0_177, %c0_178] : memref<4x8x32xbf16, #tpu.memory_space<vmem>>, vector<1x8x32xbf16>
    %313 = vector.shape_cast %312 : vector<1x8x32xbf16> to vector<8x32xbf16>
    %cst_179 = arith.constant dense<0.000000e+00> : vector<16x32xf32>
    %314 = tpu.matmul %311, %313, %cst_179 {dimension_numbers = #tpu.dot_dimension_numbers<[1], [0], [0], [1], [0, 0, 1, 1], [], []>} : vector<16x8xbf16>, vector<8x32xbf16>, vector<16x32xf32> -> vector<16x32xf32>
    %315 = arith.addf %269, %314 : vector<16x32xf32>
    %c1_180 = arith.constant 1 : index
    %c0_181 = arith.constant 0 : index
    %c0_182 = arith.constant 0 : index
    %316 = vector.load %arg19[%c1_180, %c0_181, %c0_182] : memref<4x32x8xbf16, #tpu.memory_space<vmem>>, vector<1x32x8xbf16>
    %317 = vector.shape_cast %316 : vector<1x32x8xbf16> to vector<32x8xbf16>
    %cst_183 = arith.constant dense<0.000000e+00> : vector<16x8xf32>
    %318 = tpu.matmul %268, %317, %cst_183 {dimension_numbers = #tpu.dot_dimension_numbers<[1], [0], [0], [1], [0, 0, 1, 1], [], []>} : vector<16x32xbf16>, vector<32x8xbf16>, vector<16x8xf32> -> vector<16x8xf32>
    %c1_184 = arith.constant 1 : index
    %c0_185 = arith.constant 0 : index
    %c0_186 = arith.constant 0 : index
    %319 = vector.load %arg22[%c1_184, %c0_185, %c0_186] : memref<4x1x8xf32, #tpu.memory_space<vmem>>, vector<1x1x8xf32>
    %320 = vector.shape_cast %319 : vector<1x1x8xf32> to vector<1x8xf32>
    %321 = vector.broadcast %320 : vector<1x8xf32> to vector<16x8xf32>
    %322 = arith.addf %318, %321 : vector<16x8xf32>
    %c1_187 = arith.constant 1 : index
    %c0_188 = arith.constant 0 : index
    %c0_189 = arith.constant 0 : index
    %323 = vector.load %arg20[%c1_187, %c0_188, %c0_189] : memref<4x32x8xbf16, #tpu.memory_space<vmem>>, vector<1x32x8xbf16>
    %324 = vector.shape_cast %323 : vector<1x32x8xbf16> to vector<32x8xbf16>
    %cst_190 = arith.constant dense<0.000000e+00> : vector<16x8xf32>
    %325 = tpu.matmul %268, %324, %cst_190 {dimension_numbers = #tpu.dot_dimension_numbers<[1], [0], [0], [1], [0, 0, 1, 1], [], []>} : vector<16x32xbf16>, vector<32x8xbf16>, vector<16x8xf32> -> vector<16x8xf32>
    %c1_191 = arith.constant 1 : index
    %c0_192 = arith.constant 0 : index
    %c0_193 = arith.constant 0 : index
    %326 = vector.load %arg23[%c1_191, %c0_192, %c0_193] : memref<4x1x8xf32, #tpu.memory_space<vmem>>, vector<1x1x8xf32>
    %327 = vector.shape_cast %326 : vector<1x1x8xf32> to vector<1x8xf32>
    %328 = vector.broadcast %327 : vector<1x8xf32> to vector<16x8xf32>
    %329 = arith.addf %325, %328 : vector<16x8xf32>
    %c1_194 = arith.constant 1 : index
    %c0_195 = arith.constant 0 : index
    %c0_196 = arith.constant 0 : index
    %330 = vector.load %arg21[%c1_194, %c0_195, %c0_196] : memref<4x32x8xbf16, #tpu.memory_space<vmem>>, vector<1x32x8xbf16>
    %331 = vector.shape_cast %330 : vector<1x32x8xbf16> to vector<32x8xbf16>
    %cst_197 = arith.constant dense<0.000000e+00> : vector<16x8xf32>
    %332 = tpu.matmul %268, %331, %cst_197 {dimension_numbers = #tpu.dot_dimension_numbers<[1], [0], [0], [1], [0, 0, 1, 1], [], []>} : vector<16x32xbf16>, vector<32x8xbf16>, vector<16x8xf32> -> vector<16x8xf32>
    %c1_198 = arith.constant 1 : index
    %c0_199 = arith.constant 0 : index
    %c0_200 = arith.constant 0 : index
    %333 = vector.load %arg24[%c1_198, %c0_199, %c0_200] : memref<4x1x8xf32, #tpu.memory_space<vmem>>, vector<1x1x8xf32>
    %334 = vector.shape_cast %333 : vector<1x1x8xf32> to vector<1x8xf32>
    %335 = vector.broadcast %334 : vector<1x8xf32> to vector<16x8xf32>
    %336 = arith.addf %332, %335 : vector<16x8xf32>
    %337 = vector.shape_cast %322 : vector<16x8xf32> to vector<2x8x8xf32>
    %338 = arith.truncf %337 : vector<2x8x8xf32> to vector<2x8x8xbf16>
    %339 = vector.shape_cast %329 : vector<16x8xf32> to vector<2x8x8xf32>
    %340 = arith.truncf %339 : vector<2x8x8xf32> to vector<2x8x8xbf16>
    %341 = vector.shape_cast %336 : vector<16x8xf32> to vector<2x8x8xf32>
    %342 = arith.truncf %341 : vector<2x8x8xf32> to vector<2x8x8xbf16>
    "tpu.trace_start"() <{level = 10 : i32, message = "bsd,btd->bst"}> : () -> ()
    %cst_201 = arith.constant dense<0.000000e+00> : vector<2x8x8xf32>
    %343 = tpu.matmul %338, %340, %cst_201 {dimension_numbers = #tpu.dot_dimension_numbers<[2], [2], [1], [1], [0, 0, 0, 1, 1, 1], [0], [0]>} : vector<2x8x8xbf16>, vector<2x8x8xbf16>, vector<2x8x8xf32> -> vector<2x8x8xf32>
    "tpu.trace_stop"() : () -> ()
    %cst_202 = arith.constant dense<0xFF800000> : vector<2x8xf32>
    %344 = vector.multi_reduction <maximumf>, %343, %cst_202 [2] : vector<2x8x8xf32> to vector<2x8xf32>
    %345 = vector.shape_cast %344 : vector<2x8xf32> to vector<2x8x1xf32>
    %346 = vector.broadcast %345 : vector<2x8x1xf32> to vector<2x8x8xf32>
    %347 = arith.subf %343, %346 : vector<2x8x8xf32>
    %348 = math.exp %347 : vector<2x8x8xf32>
    %cst_203 = arith.constant dense<0.000000e+00> : vector<2x8xf32>
    %349 = vector.multi_reduction <add>, %348, %cst_203 [2] : vector<2x8x8xf32> to vector<2x8xf32>
    %350 = vector.shape_cast %349 : vector<2x8xf32> to vector<2x8x1xf32>
    %351 = tpu.reciprocal %350 {approx = true} : vector<2x8x1xf32> -> vector<2x8x1xf32>
    %352 = vector.broadcast %351 : vector<2x8x1xf32> to vector<2x8x8xf32>
    %353 = arith.mulf %348, %352 : vector<2x8x8xf32>
    %354 = arith.truncf %353 : vector<2x8x8xf32> to vector<2x8x8xbf16>
    "tpu.trace_start"() <{level = 10 : i32, message = "bst,btd->bsd"}> : () -> ()
    %cst_204 = arith.constant dense<0.000000e+00> : vector<2x8x8xf32>
    %355 = tpu.matmul %354, %342, %cst_204 {dimension_numbers = #tpu.dot_dimension_numbers<[2], [1], [1], [2], [0, 0, 0, 1, 1, 2], [0], [0]>} : vector<2x8x8xbf16>, vector<2x8x8xbf16>, vector<2x8x8xf32> -> vector<2x8x8xf32>
    "tpu.trace_stop"() : () -> ()
    %356 = vector.shape_cast %355 : vector<2x8x8xf32> to vector<16x8xf32>
    %357 = arith.truncf %356 : vector<16x8xf32> to vector<16x8xbf16>
    %c1_205 = arith.constant 1 : index
    %c0_206 = arith.constant 0 : index
    %c0_207 = arith.constant 0 : index
    %358 = vector.load %arg25[%c1_205, %c0_206, %c0_207] : memref<4x8x32xbf16, #tpu.memory_space<vmem>>, vector<1x8x32xbf16>
    %359 = vector.shape_cast %358 : vector<1x8x32xbf16> to vector<8x32xbf16>
    %cst_208 = arith.constant dense<0.000000e+00> : vector<16x32xf32>
    %360 = tpu.matmul %357, %359, %cst_208 {dimension_numbers = #tpu.dot_dimension_numbers<[1], [0], [0], [1], [0, 0, 1, 1], [], []>} : vector<16x8xbf16>, vector<8x32xbf16>, vector<16x32xf32> -> vector<16x32xf32>
    %361 = arith.addf %315, %360 : vector<16x32xf32>
    %c2_209 = arith.constant 2 : index
    %c0_210 = arith.constant 0 : index
    %c0_211 = arith.constant 0 : index
    %362 = vector.load %arg19[%c2_209, %c0_210, %c0_211] : memref<4x32x8xbf16, #tpu.memory_space<vmem>>, vector<1x32x8xbf16>
    %363 = vector.shape_cast %362 : vector<1x32x8xbf16> to vector<32x8xbf16>
    %cst_212 = arith.constant dense<0.000000e+00> : vector<16x8xf32>
    %364 = tpu.matmul %268, %363, %cst_212 {dimension_numbers = #tpu.dot_dimension_numbers<[1], [0], [0], [1], [0, 0, 1, 1], [], []>} : vector<16x32xbf16>, vector<32x8xbf16>, vector<16x8xf32> -> vector<16x8xf32>
    %c2_213 = arith.constant 2 : index
    %c0_214 = arith.constant 0 : index
    %c0_215 = arith.constant 0 : index
    %365 = vector.load %arg22[%c2_213, %c0_214, %c0_215] : memref<4x1x8xf32, #tpu.memory_space<vmem>>, vector<1x1x8xf32>
    %366 = vector.shape_cast %365 : vector<1x1x8xf32> to vector<1x8xf32>
    %367 = vector.broadcast %366 : vector<1x8xf32> to vector<16x8xf32>
    %368 = arith.addf %364, %367 : vector<16x8xf32>
    %c2_216 = arith.constant 2 : index
    %c0_217 = arith.constant 0 : index
    %c0_218 = arith.constant 0 : index
    %369 = vector.load %arg20[%c2_216, %c0_217, %c0_218] : memref<4x32x8xbf16, #tpu.memory_space<vmem>>, vector<1x32x8xbf16>
    %370 = vector.shape_cast %369 : vector<1x32x8xbf16> to vector<32x8xbf16>
    %cst_219 = arith.constant dense<0.000000e+00> : vector<16x8xf32>
    %371 = tpu.matmul %268, %370, %cst_219 {dimension_numbers = #tpu.dot_dimension_numbers<[1], [0], [0], [1], [0, 0, 1, 1], [], []>} : vector<16x32xbf16>, vector<32x8xbf16>, vector<16x8xf32> -> vector<16x8xf32>
    %c2_220 = arith.constant 2 : index
    %c0_221 = arith.constant 0 : index
    %c0_222 = arith.constant 0 : index
    %372 = vector.load %arg23[%c2_220, %c0_221, %c0_222] : memref<4x1x8xf32, #tpu.memory_space<vmem>>, vector<1x1x8xf32>
    %373 = vector.shape_cast %372 : vector<1x1x8xf32> to vector<1x8xf32>
    %374 = vector.broadcast %373 : vector<1x8xf32> to vector<16x8xf32>
    %375 = arith.addf %371, %374 : vector<16x8xf32>
    %c2_223 = arith.constant 2 : index
    %c0_224 = arith.constant 0 : index
    %c0_225 = arith.constant 0 : index
    %376 = vector.load %arg21[%c2_223, %c0_224, %c0_225] : memref<4x32x8xbf16, #tpu.memory_space<vmem>>, vector<1x32x8xbf16>
    %377 = vector.shape_cast %376 : vector<1x32x8xbf16> to vector<32x8xbf16>
    %cst_226 = arith.constant dense<0.000000e+00> : vector<16x8xf32>
    %378 = tpu.matmul %268, %377, %cst_226 {dimension_numbers = #tpu.dot_dimension_numbers<[1], [0], [0], [1], [0, 0, 1, 1], [], []>} : vector<16x32xbf16>, vector<32x8xbf16>, vector<16x8xf32> -> vector<16x8xf32>
    %c2_227 = arith.constant 2 : index
    %c0_228 = arith.constant 0 : index
    %c0_229 = arith.constant 0 : index
    %379 = vector.load %arg24[%c2_227, %c0_228, %c0_229] : memref<4x1x8xf32, #tpu.memory_space<vmem>>, vector<1x1x8xf32>
    %380 = vector.shape_cast %379 : vector<1x1x8xf32> to vector<1x8xf32>
    %381 = vector.broadcast %380 : vector<1x8xf32> to vector<16x8xf32>
    %382 = arith.addf %378, %381 : vector<16x8xf32>
    %383 = vector.shape_cast %368 : vector<16x8xf32> to vector<2x8x8xf32>
    %384 = arith.truncf %383 : vector<2x8x8xf32> to vector<2x8x8xbf16>
    %385 = vector.shape_cast %375 : vector<16x8xf32> to vector<2x8x8xf32>
    %386 = arith.truncf %385 : vector<2x8x8xf32> to vector<2x8x8xbf16>
    %387 = vector.shape_cast %382 : vector<16x8xf32> to vector<2x8x8xf32>
    %388 = arith.truncf %387 : vector<2x8x8xf32> to vector<2x8x8xbf16>
    "tpu.trace_start"() <{level = 10 : i32, message = "bsd,btd->bst"}> : () -> ()
    %cst_230 = arith.constant dense<0.000000e+00> : vector<2x8x8xf32>
    %389 = tpu.matmul %384, %386, %cst_230 {dimension_numbers = #tpu.dot_dimension_numbers<[2], [2], [1], [1], [0, 0, 0, 1, 1, 1], [0], [0]>} : vector<2x8x8xbf16>, vector<2x8x8xbf16>, vector<2x8x8xf32> -> vector<2x8x8xf32>
    "tpu.trace_stop"() : () -> ()
    %cst_231 = arith.constant dense<0xFF800000> : vector<2x8xf32>
    %390 = vector.multi_reduction <maximumf>, %389, %cst_231 [2] : vector<2x8x8xf32> to vector<2x8xf32>
    %391 = vector.shape_cast %390 : vector<2x8xf32> to vector<2x8x1xf32>
    %392 = vector.broadcast %391 : vector<2x8x1xf32> to vector<2x8x8xf32>
    %393 = arith.subf %389, %392 : vector<2x8x8xf32>
    %394 = math.exp %393 : vector<2x8x8xf32>
    %cst_232 = arith.constant dense<0.000000e+00> : vector<2x8xf32>
    %395 = vector.multi_reduction <add>, %394, %cst_232 [2] : vector<2x8x8xf32> to vector<2x8xf32>
    %396 = vector.shape_cast %395 : vector<2x8xf32> to vector<2x8x1xf32>
    %397 = tpu.reciprocal %396 {approx = true} : vector<2x8x1xf32> -> vector<2x8x1xf32>
    %398 = vector.broadcast %397 : vector<2x8x1xf32> to vector<2x8x8xf32>
    %399 = arith.mulf %394, %398 : vector<2x8x8xf32>
    %400 = arith.truncf %399 : vector<2x8x8xf32> to vector<2x8x8xbf16>
    "tpu.trace_start"() <{level = 10 : i32, message = "bst,btd->bsd"}> : () -> ()
    %cst_233 = arith.constant dense<0.000000e+00> : vector<2x8x8xf32>
    %401 = tpu.matmul %400, %388, %cst_233 {dimension_numbers = #tpu.dot_dimension_numbers<[2], [1], [1], [2], [0, 0, 0, 1, 1, 2], [0], [0]>} : vector<2x8x8xbf16>, vector<2x8x8xbf16>, vector<2x8x8xf32> -> vector<2x8x8xf32>
    "tpu.trace_stop"() : () -> ()
    %402 = vector.shape_cast %401 : vector<2x8x8xf32> to vector<16x8xf32>
    %403 = arith.truncf %402 : vector<16x8xf32> to vector<16x8xbf16>
    %c2_234 = arith.constant 2 : index
    %c0_235 = arith.constant 0 : index
    %c0_236 = arith.constant 0 : index
    %404 = vector.load %arg25[%c2_234, %c0_235, %c0_236] : memref<4x8x32xbf16, #tpu.memory_space<vmem>>, vector<1x8x32xbf16>
    %405 = vector.shape_cast %404 : vector<1x8x32xbf16> to vector<8x32xbf16>
    %cst_237 = arith.constant dense<0.000000e+00> : vector<16x32xf32>
    %406 = tpu.matmul %403, %405, %cst_237 {dimension_numbers = #tpu.dot_dimension_numbers<[1], [0], [0], [1], [0, 0, 1, 1], [], []>} : vector<16x8xbf16>, vector<8x32xbf16>, vector<16x32xf32> -> vector<16x32xf32>
    %407 = arith.addf %361, %406 : vector<16x32xf32>
    %c3_238 = arith.constant 3 : index
    %c0_239 = arith.constant 0 : index
    %c0_240 = arith.constant 0 : index
    %408 = vector.load %arg19[%c3_238, %c0_239, %c0_240] : memref<4x32x8xbf16, #tpu.memory_space<vmem>>, vector<1x32x8xbf16>
    %409 = vector.shape_cast %408 : vector<1x32x8xbf16> to vector<32x8xbf16>
    %cst_241 = arith.constant dense<0.000000e+00> : vector<16x8xf32>
    %410 = tpu.matmul %268, %409, %cst_241 {dimension_numbers = #tpu.dot_dimension_numbers<[1], [0], [0], [1], [0, 0, 1, 1], [], []>} : vector<16x32xbf16>, vector<32x8xbf16>, vector<16x8xf32> -> vector<16x8xf32>
    %c3_242 = arith.constant 3 : index
    %c0_243 = arith.constant 0 : index
    %c0_244 = arith.constant 0 : index
    %411 = vector.load %arg22[%c3_242, %c0_243, %c0_244] : memref<4x1x8xf32, #tpu.memory_space<vmem>>, vector<1x1x8xf32>
    %412 = vector.shape_cast %411 : vector<1x1x8xf32> to vector<1x8xf32>
    %413 = vector.broadcast %412 : vector<1x8xf32> to vector<16x8xf32>
    %414 = arith.addf %410, %413 : vector<16x8xf32>
    %c3_245 = arith.constant 3 : index
    %c0_246 = arith.constant 0 : index
    %c0_247 = arith.constant 0 : index
    %415 = vector.load %arg20[%c3_245, %c0_246, %c0_247] : memref<4x32x8xbf16, #tpu.memory_space<vmem>>, vector<1x32x8xbf16>
    %416 = vector.shape_cast %415 : vector<1x32x8xbf16> to vector<32x8xbf16>
    %cst_248 = arith.constant dense<0.000000e+00> : vector<16x8xf32>
    %417 = tpu.matmul %268, %416, %cst_248 {dimension_numbers = #tpu.dot_dimension_numbers<[1], [0], [0], [1], [0, 0, 1, 1], [], []>} : vector<16x32xbf16>, vector<32x8xbf16>, vector<16x8xf32> -> vector<16x8xf32>
    %c3_249 = arith.constant 3 : index
    %c0_250 = arith.constant 0 : index
    %c0_251 = arith.constant 0 : index
    %418 = vector.load %arg23[%c3_249, %c0_250, %c0_251] : memref<4x1x8xf32, #tpu.memory_space<vmem>>, vector<1x1x8xf32>
    %419 = vector.shape_cast %418 : vector<1x1x8xf32> to vector<1x8xf32>
    %420 = vector.broadcast %419 : vector<1x8xf32> to vector<16x8xf32>
    %421 = arith.addf %417, %420 : vector<16x8xf32>
    %c3_252 = arith.constant 3 : index
    %c0_253 = arith.constant 0 : index
    %c0_254 = arith.constant 0 : index
    %422 = vector.load %arg21[%c3_252, %c0_253, %c0_254] : memref<4x32x8xbf16, #tpu.memory_space<vmem>>, vector<1x32x8xbf16>
    %423 = vector.shape_cast %422 : vector<1x32x8xbf16> to vector<32x8xbf16>
    %cst_255 = arith.constant dense<0.000000e+00> : vector<16x8xf32>
    %424 = tpu.matmul %268, %423, %cst_255 {dimension_numbers = #tpu.dot_dimension_numbers<[1], [0], [0], [1], [0, 0, 1, 1], [], []>} : vector<16x32xbf16>, vector<32x8xbf16>, vector<16x8xf32> -> vector<16x8xf32>
    %c3_256 = arith.constant 3 : index
    %c0_257 = arith.constant 0 : index
    %c0_258 = arith.constant 0 : index
    %425 = vector.load %arg24[%c3_256, %c0_257, %c0_258] : memref<4x1x8xf32, #tpu.memory_space<vmem>>, vector<1x1x8xf32>
    %426 = vector.shape_cast %425 : vector<1x1x8xf32> to vector<1x8xf32>
    %427 = vector.broadcast %426 : vector<1x8xf32> to vector<16x8xf32>
    %428 = arith.addf %424, %427 : vector<16x8xf32>
    %429 = vector.shape_cast %414 : vector<16x8xf32> to vector<2x8x8xf32>
    %430 = arith.truncf %429 : vector<2x8x8xf32> to vector<2x8x8xbf16>
    %431 = vector.shape_cast %421 : vector<16x8xf32> to vector<2x8x8xf32>
    %432 = arith.truncf %431 : vector<2x8x8xf32> to vector<2x8x8xbf16>
    %433 = vector.shape_cast %428 : vector<16x8xf32> to vector<2x8x8xf32>
    %434 = arith.truncf %433 : vector<2x8x8xf32> to vector<2x8x8xbf16>
    "tpu.trace_start"() <{level = 10 : i32, message = "bsd,btd->bst"}> : () -> ()
    %cst_259 = arith.constant dense<0.000000e+00> : vector<2x8x8xf32>
    %435 = tpu.matmul %430, %432, %cst_259 {dimension_numbers = #tpu.dot_dimension_numbers<[2], [2], [1], [1], [0, 0, 0, 1, 1, 1], [0], [0]>} : vector<2x8x8xbf16>, vector<2x8x8xbf16>, vector<2x8x8xf32> -> vector<2x8x8xf32>
    "tpu.trace_stop"() : () -> ()
    %cst_260 = arith.constant dense<0xFF800000> : vector<2x8xf32>
    %436 = vector.multi_reduction <maximumf>, %435, %cst_260 [2] : vector<2x8x8xf32> to vector<2x8xf32>
    %437 = vector.shape_cast %436 : vector<2x8xf32> to vector<2x8x1xf32>
    %438 = vector.broadcast %437 : vector<2x8x1xf32> to vector<2x8x8xf32>
    %439 = arith.subf %435, %438 : vector<2x8x8xf32>
    %440 = math.exp %439 : vector<2x8x8xf32>
    %cst_261 = arith.constant dense<0.000000e+00> : vector<2x8xf32>
    %441 = vector.multi_reduction <add>, %440, %cst_261 [2] : vector<2x8x8xf32> to vector<2x8xf32>
    %442 = vector.shape_cast %441 : vector<2x8xf32> to vector<2x8x1xf32>
    %443 = tpu.reciprocal %442 {approx = true} : vector<2x8x1xf32> -> vector<2x8x1xf32>
    %444 = vector.broadcast %443 : vector<2x8x1xf32> to vector<2x8x8xf32>
    %445 = arith.mulf %440, %444 : vector<2x8x8xf32>
    %446 = arith.truncf %445 : vector<2x8x8xf32> to vector<2x8x8xbf16>
    "tpu.trace_start"() <{level = 10 : i32, message = "bst,btd->bsd"}> : () -> ()
    %cst_262 = arith.constant dense<0.000000e+00> : vector<2x8x8xf32>
    %447 = tpu.matmul %446, %434, %cst_262 {dimension_numbers = #tpu.dot_dimension_numbers<[2], [1], [1], [2], [0, 0, 0, 1, 1, 2], [0], [0]>} : vector<2x8x8xbf16>, vector<2x8x8xbf16>, vector<2x8x8xf32> -> vector<2x8x8xf32>
    "tpu.trace_stop"() : () -> ()
    %448 = vector.shape_cast %447 : vector<2x8x8xf32> to vector<16x8xf32>
    %449 = arith.truncf %448 : vector<16x8xf32> to vector<16x8xbf16>
    %c3_263 = arith.constant 3 : index
    %c0_264 = arith.constant 0 : index
    %c0_265 = arith.constant 0 : index
    %450 = vector.load %arg25[%c3_263, %c0_264, %c0_265] : memref<4x8x32xbf16, #tpu.memory_space<vmem>>, vector<1x8x32xbf16>
    %451 = vector.shape_cast %450 : vector<1x8x32xbf16> to vector<8x32xbf16>
    %cst_266 = arith.constant dense<0.000000e+00> : vector<16x32xf32>
    %452 = tpu.matmul %449, %451, %cst_266 {dimension_numbers = #tpu.dot_dimension_numbers<[1], [0], [0], [1], [0, 0, 1, 1], [], []>} : vector<16x8xbf16>, vector<8x32xbf16>, vector<16x32xf32> -> vector<16x32xf32>
    %453 = arith.addf %407, %452 : vector<16x32xf32>
    %454 = arith.addf %267, %453 : vector<16x32xf32>
    %c0_267 = arith.constant 0 : index
    %c0_268 = arith.constant 0 : index
    %455 = vector.load %arg26[%c0_267, %c0_268] : memref<1x32xf32, #tpu.memory_space<vmem>>, vector<1x32xf32>
    %456 = vector.broadcast %455 : vector<1x32xf32> to vector<16x32xf32>
    %457 = arith.addf %454, %456 : vector<16x32xf32>
    %c0_269 = arith.constant 0 : index
    %c0_270 = arith.constant 0 : index
    %458 = vector.load %arg27[%c0_269, %c0_270] : memref<1x32xf32, #tpu.memory_space<vmem>>, vector<1x32xf32>
    %c0_271 = arith.constant 0 : index
    %c0_272 = arith.constant 0 : index
    %459 = vector.load %arg28[%c0_271, %c0_272] : memref<1x32xf32, #tpu.memory_space<vmem>>, vector<1x32xf32>
    %cst_273 = arith.constant dense<0.000000e+00> : vector<16xf32>
    %460 = vector.multi_reduction <add>, %457, %cst_273 [1] : vector<16x32xf32> to vector<16xf32>
    %461 = vector.shape_cast %460 : vector<16xf32> to vector<16x1xf32>
    %cst_274 = arith.constant 3.200000e+01 : f32
    %462 = vector.broadcast %cst_274 : f32 to vector<16x1xf32>
    %463 = arith.divf %461, %462 : vector<16x1xf32>
    %464 = arith.mulf %457, %457 : vector<16x32xf32>
    %cst_275 = arith.constant dense<0.000000e+00> : vector<16xf32>
    %465 = vector.multi_reduction <add>, %464, %cst_275 [1] : vector<16x32xf32> to vector<16xf32>
    %466 = vector.shape_cast %465 : vector<16xf32> to vector<16x1xf32>
    %cst_276 = arith.constant 3.200000e+01 : f32
    %467 = vector.broadcast %cst_276 : f32 to vector<16x1xf32>
    %468 = arith.divf %466, %467 : vector<16x1xf32>
    %469 = arith.mulf %463, %463 : vector<16x1xf32>
    %470 = arith.subf %468, %469 : vector<16x1xf32>
    %cst_277 = arith.constant 9.99999974E-6 : f32
    %471 = vector.broadcast %cst_277 : f32 to vector<16x1xf32>
    %472 = arith.addf %470, %471 : vector<16x1xf32>
    %473 = math.rsqrt %472 : vector<16x1xf32>
    %474 = vector.broadcast %473 : vector<16x1xf32> to vector<16x32xf32>
    %475 = vector.broadcast %458 : vector<1x32xf32> to vector<16x32xf32>
    %476 = arith.mulf %474, %475 : vector<16x32xf32>
    %477 = vector.broadcast %463 : vector<16x1xf32> to vector<16x32xf32>
    %478 = arith.subf %457, %477 : vector<16x32xf32>
    %479 = arith.mulf %478, %476 : vector<16x32xf32>
    %480 = vector.broadcast %459 : vector<1x32xf32> to vector<16x32xf32>
    %481 = arith.addf %479, %480 : vector<16x32xf32>
    %482 = arith.truncf %481 : vector<16x32xf32> to vector<16x32xbf16>
    %c0_278 = arith.constant 0 : index
    %c0_279 = arith.constant 0 : index
    %483 = vector.load %arg29[%c0_278, %c0_279] : memref<32x64xbf16, #tpu.memory_space<vmem>>, vector<32x64xbf16>
    %cst_280 = arith.constant dense<0.000000e+00> : vector<16x64xf32>
    %484 = tpu.matmul %482, %483, %cst_280 {dimension_numbers = #tpu.dot_dimension_numbers<[1], [0], [0], [1], [0, 0, 1, 1], [], []>} : vector<16x32xbf16>, vector<32x64xbf16>, vector<16x64xf32> -> vector<16x64xf32>
    %c0_281 = arith.constant 0 : index
    %c0_282 = arith.constant 0 : index
    %485 = vector.load %arg30[%c0_281, %c0_282] : memref<1x64xf32, #tpu.memory_space<vmem>>, vector<1x64xf32>
    %486 = vector.broadcast %485 : vector<1x64xf32> to vector<16x64xf32>
    %487 = arith.addf %484, %486 : vector<16x64xf32>
    %cst_283 = arith.constant 0.000000e+00 : f32
    %488 = vector.broadcast %cst_283 : f32 to vector<16x64xf32>
    %489 = arith.maximumf %487, %488 : vector<16x64xf32>
    %490 = arith.truncf %489 : vector<16x64xf32> to vector<16x64xbf16>
    %c0_284 = arith.constant 0 : index
    %c0_285 = arith.constant 0 : index
    %491 = vector.load %arg31[%c0_284, %c0_285] : memref<64x32xbf16, #tpu.memory_space<vmem>>, vector<64x32xbf16>
    %cst_286 = arith.constant dense<0.000000e+00> : vector<16x32xf32>
    %492 = tpu.matmul %490, %491, %cst_286 {dimension_numbers = #tpu.dot_dimension_numbers<[1], [0], [0], [1], [0, 0, 1, 1], [], []>} : vector<16x64xbf16>, vector<64x32xbf16>, vector<16x32xf32> -> vector<16x32xf32>
    %c0_287 = arith.constant 0 : index
    %c0_288 = arith.constant 0 : index
    %493 = vector.load %arg32[%c0_287, %c0_288] : memref<1x32xf32, #tpu.memory_space<vmem>>, vector<1x32xf32>
    %494 = vector.broadcast %493 : vector<1x32xf32> to vector<16x32xf32>
    %495 = arith.addf %492, %494 : vector<16x32xf32>
    %496 = arith.addf %481, %495 : vector<16x32xf32>
    %c0_289 = arith.constant 0 : index
    %c0_290 = arith.constant 0 : index
    %497 = vector.load %arg33[%c0_289, %c0_290] : memref<1x32xf32, #tpu.memory_space<vmem>>, vector<1x32xf32>
    %c0_291 = arith.constant 0 : index
    %c0_292 = arith.constant 0 : index
    %498 = vector.load %arg34[%c0_291, %c0_292] : memref<1x32xf32, #tpu.memory_space<vmem>>, vector<1x32xf32>
    %cst_293 = arith.constant dense<0.000000e+00> : vector<16xf32>
    %499 = vector.multi_reduction <add>, %496, %cst_293 [1] : vector<16x32xf32> to vector<16xf32>
    %500 = vector.shape_cast %499 : vector<16xf32> to vector<16x1xf32>
    %cst_294 = arith.constant 3.200000e+01 : f32
    %501 = vector.broadcast %cst_294 : f32 to vector<16x1xf32>
    %502 = arith.divf %500, %501 : vector<16x1xf32>
    %503 = arith.mulf %496, %496 : vector<16x32xf32>
    %cst_295 = arith.constant dense<0.000000e+00> : vector<16xf32>
    %504 = vector.multi_reduction <add>, %503, %cst_295 [1] : vector<16x32xf32> to vector<16xf32>
    %505 = vector.shape_cast %504 : vector<16xf32> to vector<16x1xf32>
    %cst_296 = arith.constant 3.200000e+01 : f32
    %506 = vector.broadcast %cst_296 : f32 to vector<16x1xf32>
    %507 = arith.divf %505, %506 : vector<16x1xf32>
    %508 = arith.mulf %502, %502 : vector<16x1xf32>
    %509 = arith.subf %507, %508 : vector<16x1xf32>
    %cst_297 = arith.constant 9.99999974E-6 : f32
    %510 = vector.broadcast %cst_297 : f32 to vector<16x1xf32>
    %511 = arith.addf %509, %510 : vector<16x1xf32>
    %512 = math.rsqrt %511 : vector<16x1xf32>
    %513 = vector.broadcast %512 : vector<16x1xf32> to vector<16x32xf32>
    %514 = vector.broadcast %497 : vector<1x32xf32> to vector<16x32xf32>
    %515 = arith.mulf %513, %514 : vector<16x32xf32>
    %516 = vector.broadcast %502 : vector<16x1xf32> to vector<16x32xf32>
    %517 = arith.subf %496, %516 : vector<16x32xf32>
    %518 = arith.mulf %517, %515 : vector<16x32xf32>
    %519 = vector.broadcast %498 : vector<1x32xf32> to vector<16x32xf32>
    %520 = arith.addf %518, %519 : vector<16x32xf32>
    %521 = vector.shape_cast %520 : vector<16x32xf32> to vector<2x8x32xf32>
    %cst_298 = arith.constant dense<0.000000e+00> : vector<2x32xf32>
    %522 = vector.multi_reduction <add>, %521, %cst_298 [1] : vector<2x8x32xf32> to vector<2x32xf32>
    %cst_299 = arith.constant 8.000000e+00 : f32
    %523 = vector.broadcast %cst_299 : f32 to vector<2x32xf32>
    %524 = arith.divf %522, %523 : vector<2x32xf32>
    %c0_300 = arith.constant 0 : index
    %c0_301 = arith.constant 0 : index
    %525 = vector.load %arg35[%c0_300, %c0_301] : memref<1x32xf32, #tpu.memory_space<vmem>>, vector<1x32xf32>
    %526 = vector.broadcast %525 : vector<1x32xf32> to vector<2x32xf32>
    %527 = arith.mulf %524, %526 : vector<2x32xf32>
    %cst_302 = arith.constant dense<0.000000e+00> : vector<2xf32>
    %528 = vector.multi_reduction <add>, %527, %cst_302 [1] : vector<2x32xf32> to vector<2xf32>
    %529 = vector.shape_cast %528 : vector<2xf32> to vector<2x1xf32>
    %c0_303 = arith.constant 0 : index
    %c0_304 = arith.constant 0 : index
    %530 = vector.load %arg36[%c0_303, %c0_304] : memref<1x1xf32, #tpu.memory_space<vmem>>, vector<1x1xf32>
    %531 = vector.broadcast %530 : vector<1x1xf32> to vector<2x1xf32>
    %532 = arith.addf %529, %531 : vector<2x1xf32>
    %cst_305 = arith.constant 0.000000e+00 : f32
    %533 = vector.broadcast %cst_305 : f32 to vector<2x1xf32>
    %534 = arith.subf %533, %532 : vector<2x1xf32>
    %535 = math.exp %534 : vector<2x1xf32>
    %cst_306 = arith.constant 1.000000e+00 : f32
    %536 = vector.broadcast %cst_306 : f32 to vector<2x1xf32>
    %537 = arith.addf %536, %535 : vector<2x1xf32>
    %cst_307 = arith.constant 1.000000e+00 : f32
    %538 = vector.broadcast %cst_307 : f32 to vector<2x1xf32>
    %539 = arith.divf %538, %537 : vector<2x1xf32>
    %c0_308 = arith.constant 0 : index
    %c0_309 = arith.constant 0 : index
    %540 = vector.load %arg37[%c0_308, %c0_309] : memref<2x1xf32, #tpu.memory_space<vmem>>, vector<2x1xf32>
    tpu.vector_store %arg37[%c0_308, %c0_309], %539 {strides = array<i32>} : memref<2x1xf32, #tpu.memory_space<vmem>>, vector<2x1xf32>,
    return
  }
}

</mosaic_0001>

<bundles_post_ra>
// kernel: _lambda_.1
= control target key start
LH: loop header
LB: loop body
LE: loop exit
PB: predicated region body
PF: predicated region fallthrough
CT: control target
= control target key end

     0   :  { %v3320_v0 = vmov 0   ;;  %s3321_s6 = smov 1   ;;  %v159_v5 = vlaneseq  ;;  %v3322_v9 = vmov 0.0   ;;  %vm190_vm2 = vcmask 261120   ;;  %s3323_s10 = smov 6   ;;  %s3899_s0 = inlined_call_operand.smem [shape: u32[38], index: -1, kind: input, shape index: {}] }
   0x1   :  { %3191 = vset.pattern.permute.xlu0 %v3320_v0  ;;  %s1_s5 = sld [smem:[%s3899_s0]]   ;;  %s3324_s14 = smov 3   ;;  %vm323_vm3 = vcmask 64512   ;;  %vm389_vm4 = vcmask 1043456   ;;  %vm1314_vm12 = vcmask 523264  }
   0x2   :  { %s2636_s9 = sld [smem:[%s3899_s0 + %s3321_s6]]   ;;  %v160_v7 = vand.u32 127, %v159_v5  ;;  %s3325_s18 = smov 4  }
   0x3   :  { %s3376_s13 = sld [smem:[%s3899_s0 + %s3323_s10]]   ;;  %s3326_s22 = smov 5  }
   0x4   :  { %s3381_s17 = sld [smem:[%s3899_s0 + %s3324_s14]]   ;;  %s3327_s26 = smov 2  }
   0x5   :  { %s3386_s21 = sld [smem:[%s3899_s0 + %s3325_s18]]   ;;  %s3328_s30 = smov 7  }
   0x6   :  { %s3391_s25 = sld [smem:[%s3899_s0 + %s3326_s22]]   ;;  %s3329_s4 = smov 8  }
   0x7   :  { %v157_v1 = vld [vmem:[%s1_s5] sm:$0xff]  ;;  %v158_v2 = vld [vmem:[%s1_s5 + $0x8] sm:$0xff]  ;;  %s2637_s29 = sld [smem:[%s3899_s0 + %s3327_s26]]   ;;  %s3330_s8 = smov 9  }
   0x8   :  { %162 = vperm.xlu0 %3191, %v157_v1   ;;  %v3089_v3 = vld [vmem:[%s2636_s9 + $0x8] sm:$0xff]  ;;  %v3088_v4 = vld [vmem:[%s2636_s9] sm:$0xff]  ;;  %s3409_s3 = sld [smem:[%s3899_s0 + %s3328_s30]]   ;;  %s3331_s12 = smov 10  }
   0x9   :  { %200 = vmatpush.bf16.msra.mxu0 %v3089_v3  ;;  %s3418_s7 = sld [smem:[%s3899_s0 + %s3329_s4]]   ;;  %v3192_v32 = vld [vmem:[%s3376_s13] ss:$0 sm:$0xff]  ;;  %v3195_v59 = vld [vmem:[%s3376_s13 + $0x1] ss:$0 sm:$0xff]  ;;  %s3332_s16 = smov 11  }
   0xa   :  { %v3091_v13 = vld [vmem:[%s3381_s17 + $0x8] sm:$0xff]  ;;  %v3090_v16 = vld [vmem:[%s3381_s17] sm:$0xff]  ;;  %v3097_v34 = vld [vmem:[%s3381_s17 + $0x18] sm:$0xff]  ;;  %s3464_s11 = sld [smem:[%s3899_s0 + %s3330_s8]]   ;;  %s3333_s20 = smov 12  }
   0xb   :  { %v3093_v14 = vld [vmem:[%s3386_s21 + $0x8] sm:$0xff]  ;;  %241 = vmatpush.bf16.msra.mxu1 %v3091_v13  ;;  %v3092_v17 = vld [vmem:[%s3386_s21] sm:$0xff]  ;;  %v3096_v39 = vld [vmem:[%s3381_s17 + $0x10] sm:$0xff]  ;;  %s2645_s15 = sld [smem:[%s3899_s0 + %s3331_s12]]   ;;  %s3334_s24 = smov 14  }
   0xc   :  { %v3095_v15 = vld [vmem:[%s3391_s25 + $0x8] sm:$0xff]  ;;  %275 = vmatpush.bf16.msra.mxu2 %v3093_v14  ;;  %v3094_v18 = vld [vmem:[%s3391_s25] sm:$0xff]  ;;  %v3099_v46 = vld [vmem:[%s3386_s21 + $0x18] sm:$0xff]  ;;  %s3555_s19 = sld [smem:[%s3899_s0 + %s3332_s16]]   ;;  %s3336_s28 = smov 13  }
   0xd   :  { %201 = vmatpush.bf16.msra.mxu0 %v3088_v4  ;;  %309 = vmatpush.bf16.msra.mxu3 %v3095_v15  ;;  %v208_v20 = vld [vmem:[%s2637_s29] sm:$0xff]  ;;  %v3098_v52 = vld [vmem:[%s3386_s21 + $0x10] sm:$0xff]  ;;  %s3578_s23 = sld [smem:[%s3899_s0 + %s3333_s20]]   ;;  %s3337_s2 = smov 16  }
   0xe   :  { %v3193_v25 = vld [vmem:[%s3409_s3] ss:$0 sm:$0xff]  ;;  %v3196_v63 = vld [vmem:[%s3409_s3 + $0x1] ss:$0 sm:$0xff]  ;;  %s3583_s27 = sld [smem:[%s3899_s0 + %s3334_s24]]   ;;  %s3338_s6 = smov 15  }
   0xf   :  { %242 = vmatpush.bf16.msra.mxu1 %v3090_v16  ;;  %v3194_v26 = vld [vmem:[%s3418_s7] ss:$0 sm:$0xff]  ;;  %s2648_s1 = sld [smem:[%s3899_s0 + %s3336_s28]]   ;;  %s3339_s10 = smov 17  }
  0x10   :  { %165 = vperm.xlu0 %3191, %v158_v2   ;;  %276 = vmatpush.bf16.msra.mxu2 %v3092_v17  ;;  %s2651_s5 = sld [smem:[%s3899_s0 + %s3337_s2]]   ;;  %s3340_s14 = smov 18  }
  0x11   :  { %310 = vmatpush.bf16.msra.mxu3 %v3094_v18  ;;  %s2650_s9 = sld [smem:[%s3899_s0 + %s3338_s6]]   ;;  %s3341_s18 = smov 23  }
  0x12   :  { %s3342_s22 = smov 19   ;;  %s3343_s26 = smov 20  }
  0x13   :  { %s3644_s29 = sld [smem:[%s3899_s0 + %s3343_s26]]   ;;  %s3344_s30 = smov 21  }
  0x14   :  { %s3345_s4 = smov 24   ;;  %s3346_s8 = smov 22  }
  0x15   :  { %s3347_s12 = smov 25   ;;  %s3348_s16 = smov 26  }
  0x16   :  { %s3349_s20 = smov 27   ;;  %s3350_s24 = smov 28  }
  0x17   :  { %s3351_s28 = smov 30   ;;  %s3352_s2 = smov 29  }
  0x18   :  { %s3353_s6 = smov 32   ;;  %s3359_s26 = smov 36  }
  0x7a   :  { %v163_v6 = vpop.permute.xlu0 %162 }
  0x7b   :  { %vm167_vm0 = vcmp.eq.s32.totalorder %v160_v7, %v163_v6 }
  0x7c   :  { %v2673_v10 = vsel %vm167_vm0, 1.0, %v3322_v9 }
  0x82   :  { %v166_v8 = vpop.permute.xlu0 %165 }
  0x83   :  { %vm168_vm1 = vcmp.eq.s32.totalorder %v160_v7, %v166_v8 }
  0x84   :  { %v2674_v11 = vsel %vm168_vm1, 1.0, %v3322_v9 }
  0x85   :  { %v173_v12 = vpack.c.bf16 %v2674_v11, %v2673_v10 }
  0x87   :  { %2683 = vmatmul.msk.bf16.vlgmr.msra.gmra.mxu0 %vm190_vm2, %v173_v12 }
 0x104   :  { %v203_v19 = vpop.f32.mrf.mxu0 }
 0x105   :  { %v3402_v22 = vadd.f32 %v208_v20, %v203_v19 }
 0x10c   :  { %v205_v21 = vpop.f32.mrf.mxu0 }
 0x10d   :  { %v3404_v23 = vadd.f32 %v208_v20, %v205_v21 }
 0x10f   :  { %v3413_v24 = vpack.c.bf16 %v3404_v23, %v3402_v22 }
 0x111   :  { %2692 = vmatmul.msk.bf16.vlgmr.msra.gmra.mxu1 %vm190_vm2, %v3413_v24  ;;  %2701 = vmatmul.msk.bf16.vlgmr.msra.gmra.mxu2 %vm190_vm2, %v3413_v24 }
 0x112   :  { %2710 = vmatmul.msk.bf16.vlgmr.msra.gmra.mxu3 %vm190_vm2, %v3413_v24 }
 0x18e   :  { %v244_v30 = vpop.f32.mrf.mxu1 }
 0x18f   :  { %v245_v38 = vadd.f32 %v3192_v32, %v244_v30 }
 0x191   :  { %v317_v44 = vpack.c.bf16 %v245_v38, %v245_v38 }
 0x194   :  { %v278_v27 = vpop.f32.mrf.mxu2 }
 0x195   :  { %v279_v28 = vadd.f32 %v3193_v25, %v278_v27  ;;  %v312_v29 = vpop.f32.mrf.mxu3  ;;  %v3101_v27 = vld [vmem:[%s3391_s25 + $0x18] sm:$0xff] }
 0x196   :  { %v313_v31 = vadd.f32 %v3194_v26, %v312_v29  ;;  %v246_v47 = vpop.f32.mrf.mxu1 }
 0x197   :  { %v319_v33 = vpack.c.bf16 %v279_v28, %v279_v28  ;;  %v247_v51 = vadd.f32 %v3192_v32, %v246_v47  ;;  %v3100_v28 = vld [vmem:[%s3391_s25 + $0x10] sm:$0xff] }
 0x198   :  { %v321_v35 = vpack.c.bf16 %v313_v31, %v313_v31 }
 0x199   :  { %v328_v36 = vsel %vm323_vm3, %v319_v33, 0  ;;  %v318_v53 = vpack.c.bf16 %v247_v51, %v247_v51 }
 0x19a   :  { %337 = vmatpush.bf16.xpose.msrb.mxu0 %v328_v36  ;;  %v391_v37 = vsel %vm389_vm4, %v321_v35, 0 }
 0x19b   :  { %400 = vmatpush.bf16.msrb.mxu2 %v391_v37 }
 0x19c   :  { %v280_v40 = vpop.f32.mrf.mxu2 }
 0x19d   :  { %v281_v41 = vadd.f32 %v3193_v25, %v280_v40  ;;  %v314_v42 = vpop.f32.mrf.mxu3 }
 0x19e   :  { %v315_v43 = vadd.f32 %v3194_v26, %v314_v42 }
 0x19f   :  { %v320_v45 = vpack.c.bf16 %v281_v41, %v281_v41  ;;  %527 = vmatpush.bf16.msra.mxu2 %v3101_v27 }
 0x1a0   :  { %v322_v48 = vpack.c.bf16 %v315_v43, %v315_v43  ;;  %v426_v43 = vld [vmem:[%s3464_s11] sm:$0xf] }
 0x1a1   :  { %2711 = vmatmul.msk.bf16.vlgmr.msrb.gmra.mxu0 %vm323_vm3, %v317_v44  ;;  %v347_v49 = vsel %vm323_vm3, %v320_v45, 0  ;;  %v668_v44 = vsel %vm389_vm4, %v426_v43, 0 }
 0x1a2   :  { %455 = vmatpush.bf16.msra.mxu0 %v3097_v34  ;;  %356 = vmatpush.bf16.xpose.msrb.mxu1 %v347_v49  ;;  %v410_v50 = vsel %vm389_vm4, %v322_v48, 0  ;;  %v3197_v49 = vld [vmem:[%s3418_s7 + $0x1] ss:$0 sm:$0xff] }
 0x1a3   :  { %419 = vmatpush.bf16.msrb.mxu3 %v410_v50  ;;  %528 = vmatpush.bf16.msra.mxu2 %v3100_v28 }
 0x1a6   :  { %456 = vmatpush.bf16.msra.mxu0 %v3096_v39 }
 0x1a9   :  { %2712 = vmatmul.msk.bf16.vlgmr.msrb.gmra.mxu1 %vm323_vm3, %v318_v53 }
 0x1aa   :  { %491 = vmatpush.bf16.msra.mxu1 %v3099_v46 }
 0x1ae   :  { %492 = vmatpush.bf16.msra.mxu1 %v3098_v52 }
 0x1b1   :  { %2728 = vmatmul.msk.bf16.vlgmr.msra.gmra.mxu0 %vm190_vm2, %v3413_v24 }
 0x1b9   :  { %2742 = vmatmul.msk.bf16.vlgmr.msra.gmra.mxu1 %vm190_vm2, %v3413_v24 }
 0x21e   :  { %v339_v54 = vpop.f32.mrf.mxu0 }
 0x21f   :  { %v362_v55 = vsel %vm323_vm3, %v339_v54, -inf }
 0x220   :  { %363 = vmax.xlane.f32.xlu2 %v362_v55 }
 0x226   :  { %v341_v56 = vpop.f32.mrf.mxu0  ;;  %v358_v57 = vpop.f32.mrf.mxu1 }
 0x227   :  { %v365_v58 = vsel %vm323_vm3, %v358_v57, -inf }
 0x228   :  { %366 = vmax.xlane.f32.xlu1 %v365_v58 }
 0x22e   :  { %v360_v60 = vpop.f32.mrf.mxu1  ;;  %v458_v61 = vpop.f32.mrf.mxu0 }
 0x22f   :  { %v459_v62 = vadd.f32 %v3195_v59, %v458_v61  ;;  %v3105_v61 = vld [vmem:[%s3386_s21 + $0x28] sm:$0xff] }
 0x231   :  { %v535_v37 = vpack.c.bf16 %v459_v62, %v459_v62 }
 0x236   :  { %v494_v0 = vpop.f32.mrf.mxu1  ;;  %v460_v7 = vpop.f32.mrf.mxu0 }
 0x237   :  { %v495_v1 = vadd.f32 %v3196_v63, %v494_v0  ;;  %v461_v9 = vadd.f32 %v3195_v59, %v460_v7 }
 0x239   :  { %v537_v2 = vpack.c.bf16 %v495_v1, %v495_v1  ;;  %v536_v10 = vpack.c.bf16 %v461_v9, %v461_v9 }
 0x23b   :  { %v545_v3 = vsel %vm323_vm3, %v537_v2, 0 }
 0x23c   :  { %554 = vmatpush.bf16.xpose.msra.mxu3 %v545_v3 }
 0x23e   :  { %v496_v4 = vpop.f32.mrf.mxu1 }
 0x23f   :  { %v497_v5 = vadd.f32 %v3196_v63, %v496_v4  ;;  %v3104_v63 = vld [vmem:[%s3386_s21 + $0x20] sm:$0xff] }
 0x241   :  { %v538_v6 = vpack.c.bf16 %v497_v5, %v497_v5 }
 0x243   :  { %v564_v8 = vsel %vm323_vm3, %v538_v6, 0 }
 0x244   :  { %573 = vmatpush.bf16.xpose.msrb.mxu0 %v564_v8 }
 0x24b   :  { %2758 = vmatmul.msk.bf16.vlgmr.msrb.gmra.mxu0 %vm323_vm3, %v536_v10 }
 0x24c   :  { %677 = vmatpush.bf16.msra.mxu0 %v668_v44 }
 0x293   :  { %v364_v11 = vpop.xlane.xlu2 %363 }
 0x294   :  { %v368_v12 = vsub.f32 %v339_v54, %v364_v11  ;;  %v3198_v11 = vld [vmem:[%s3409_s3 + $0x2] ss:$0 sm:$0xff] }
 0x296   :  { %v370_v13 = vmul.f32 1.442695, %v368_v12 }
 0x298   :  { %3232 = vpow2.f32 %v370_v13 }
 0x29b   :  { %v367_v14 = vpop.xlane.xlu1 %366 }
 0x29c   :  { %v369_v15 = vsub.f32 %v358_v57, %v367_v14 }
 0x29e   :  { %v3233_v16 = vpop.eup %3232  ;;  %v372_v17 = vmul.f32 1.442695, %v369_v15 }
 0x29f   :  { %v374_v18 = vsel %vm323_vm3, %v3233_v16, 0.0 }
 0x2a0   :  { %3234 = vpow2.f32 %v372_v17  ;;  %375 = vadd.xlane.f32.xlu2 %v374_v18  ;;  %v3102_v17 = vld [vmem:[%s3381_s17 + $0x20] sm:$0xff] }
 0x2a6   :  { %v3235_v19 = vpop.eup %3234 }
 0x2a7   :  { %v377_v20 = vsel %vm323_vm3, %v3235_v19, 0.0 }
 0x2a8   :  { %378 = vadd.xlane.f32.xlu1 %v377_v20 }
 0x2c8   :  { %v575_v21 = vpop.f32.mrf.mxu0 }
 0x2c9   :  { %v582_v25 = vsel %vm323_vm3, %v575_v21, -inf }
 0x2ca   :  { %583 = vmax.xlane.f32.xlu0 %v582_v25 }
 0x2d0   :  { %v577_v26 = vpop.f32.mrf.mxu0 }
 0x313   :  { %v376_v29 = vpop.xlane.xlu2 %375 }
 0x314   :  { %3236 = vrcp.f32 %v376_v29  ;;  %v2761_v29 = vld [vmem:[%s3464_s11 + $0x4] sm:$0xf] }
 0x31a   :  { %v3237_v30 = vpop.eup %3236 }
 0x31b   :  { %v382_v31 = vmul.f32 %v3237_v30, %v3233_v16  ;;  %v379_v32 = vpop.xlane.xlu1 %378  ;;  %v3103_v16 = vld [vmem:[%s3381_s17 + $0x28] sm:$0xff]  ;;  %v648_v30 = vsel %vm389_vm4, %v2761_v29, 0 }
 0x31c   :  { %3238 = vrcp.f32 %v379_v32  ;;  %v3106_v32 = vld [vmem:[%s3391_s25 + $0x20] sm:$0xff] }
 0x31d   :  { %v384_v33 = vpack.c.bf16 %v382_v31, %v382_v31  ;;  %v3107_v31 = vld [vmem:[%s3391_s25 + $0x28] sm:$0xff] }
 0x31f   :  { %2713 = vmatmul.msk.bf16.vlgmr.msrb.gmra.mxu2 %vm323_vm3, %v384_v33  ;;  %v3109_v33 = vld [vmem:[%s3381_s17 + $0x38] sm:$0xff] }
 0x322   :  { %v3239_v34 = vpop.eup %3238 }
 0x323   :  { %v383_v35 = vmul.f32 %v3239_v34, %v3235_v19  ;;  %v3108_v34 = vld [vmem:[%s3381_s17 + $0x30] sm:$0xff]  ;;  %s3615_s17 = sld [smem:[%s3899_s0 + %s3340_s14]]   ;;  %s3355_s14 = smov 33  }
 0x325   :  { %v385_v36 = vpack.c.bf16 %v383_v35, %v383_v35 }
 0x327   :  { %2714 = vmatmul.msk.bf16.vlgmr.msrb.gmra.mxu3 %vm323_vm3, %v385_v36 }
 0x328   :  { %657 = vmatpush.bf16.msrb.mxu3 %v648_v30 }
 0x32f   :  { %2756 = vmatmul.msk.bf16.vlgmr.msra.gmra.mxu2 %vm190_vm2, %v3413_v24 }
 0x337   :  { %2757 = vmatmul.msk.bf16.vlgmr.msra.gmra.mxu3 %vm323_vm3, %v535_v37 }
 0x338   :  { %784 = vmatpush.bf16.msra.mxu3 %v3107_v31  ;;  %v3202_v31 = vld [vmem:[%s3409_s3 + $0x3] ss:$0 sm:$0xff]  ;;  %s3649_s3 = sld [smem:[%s3899_s0 + %s3344_s30]]   ;;  %s3360_s30 = smov 37  }
 0x33c   :  { %785 = vmatpush.bf16.msra.mxu3 %v3106_v32 }
 0x33d   :  { %v584_v38 = vpop.xlane.xlu0 %583 }
 0x33e   :  { %v586_v39 = vsub.f32 %v575_v21, %v584_v38  ;;  %v3199_v38 = vld [vmem:[%s3376_s13 + $0x2] ss:$0 sm:$0xff] }
 0x340   :  { %v589_v40 = vmul.f32 1.442695, %v586_v39 }
 0x342   :  { %3240 = vpow2.f32 %v589_v40 }
 0x348   :  { %v3241_v41 = vpop.eup %3240 }
 0x349   :  { %v594_v42 = vsel %vm323_vm3, %v3241_v41, 0.0 }
 0x34a   :  { %595 = vadd.xlane.f32.xlu2 %v594_v42 }
 0x3a2   :  { %v402_v45 = vpop.f32.mrf.mxu2 }
 0x3aa   :  { %v404_v46 = vpop.f32.mrf.mxu2  ;;  %v421_v47 = vpop.f32.mrf.mxu3 }
 0x3ab   :  { %v425_v48 = vpack.c.bf16 %v421_v47, %v402_v45 }
 0x3ad   :  { %2763 = vmatmul.msk.bf16.vlgmr.msra.gmra.mxu0 %vm323_vm3, %v425_v48 }
 0x3b2   :  { %v423_v50 = vpop.f32.mrf.mxu3  ;;  %v530_v51 = vpop.f32.mrf.mxu2 }
 0x3b3   :  { %v531_v52 = vadd.f32 %v3197_v49, %v530_v51  ;;  %v3200_v51 = vld [vmem:[%s3418_s7 + $0x2] ss:$0 sm:$0xff] }
 0x3b5   :  { %v539_v53 = vpack.c.bf16 %v531_v52, %v531_v52 }
 0x3b7   :  { %v607_v54 = vsel %vm389_vm4, %v539_v53, 0 }
 0x3b8   :  { %616 = vmatpush.bf16.msrb.mxu1 %v607_v54 }
 0x3ba   :  { %v532_v55 = vpop.f32.mrf.mxu2  ;;  %v556_v56 = vpop.f32.mrf.mxu3 }
 0x3bb   :  { %v533_v57 = vadd.f32 %v3197_v49, %v532_v55  ;;  %v579_v58 = vsel %vm323_vm3, %v556_v56, -inf }
 0x3bc   :  { %580 = vmax.xlane.f32.xlu1 %v579_v58  ;;  %712 = vmatpush.bf16.msra.mxu1 %v3103_v16 }
 0x3bd   :  { %v540_v59 = vpack.c.bf16 %v533_v57, %v533_v57  ;;  %v596_v60 = vpop.xlane.xlu2 %595 }
 0x3be   :  { %3242 = vrcp.f32 %v596_v60 }
 0x3bf   :  { %v626_v62 = vsel %vm389_vm4, %v540_v59, 0 }
 0x3c0   :  { %635 = vmatpush.bf16.msrb.mxu2 %v626_v62  ;;  %713 = vmatpush.bf16.msra.mxu1 %v3102_v17 }
 0x3c2   :  { %v558_v0 = vpop.f32.mrf.mxu3 }
 0x3c4   :  { %748 = vmatpush.bf16.msra.mxu2 %v3105_v61  ;;  %v3243_v1 = vpop.eup %3242 }
 0x3c5   :  { %v600_v2 = vmul.f32 %v3243_v1, %v3241_v41 }
 0x3c7   :  { %v602_v3 = vpack.c.bf16 %v600_v2, %v600_v2 }
 0x3c8   :  { %749 = vmatpush.bf16.msra.mxu2 %v3104_v63 }
 0x3c9   :  { %2760 = vmatmul.msk.bf16.vlgmr.msrb.gmra.mxu2 %vm323_vm3, %v602_v3 }
 0x3d9   :  { %2791 = vmatmul.msk.bf16.vlgmr.msra.gmra.mxu2 %vm190_vm2, %v3413_v24 }
 0x42a   :  { %v3501_v45 = vpop.f32.mrf.mxu0 }
 0x42f   :  { %v581_v4 = vpop.xlane.xlu1 %580 }
 0x430   :  { %v585_v5 = vsub.f32 %v556_v56, %v581_v4 }
 0x432   :  { %v587_v6 = vmul.f32 1.442695, %v585_v5  ;;  %v3505_v47 = vpop.f32.mrf.mxu0 }
 0x434   :  { %3244 = vpow2.f32 %v587_v6 }
 0x43a   :  { %v3245_v7 = vpop.eup %3244 }
 0x43b   :  { %v591_v8 = vsel %vm323_vm3, %v3245_v7, 0.0 }
 0x43c   :  { %592 = vadd.xlane.f32.xlu1 %v591_v8 }
 0x44c   :  { %v637_v9 = vpop.f32.mrf.mxu2 }
 0x454   :  { %v639_v10 = vpop.f32.mrf.mxu2 }
 0x455   :  { %v3111_v10 = vld [vmem:[%s3386_s21 + $0x38] sm:$0xff] }
 0x45c   :  { %v751_v12 = vpop.f32.mrf.mxu2 }
 0x45d   :  { %v752_v13 = vadd.f32 %v3198_v11, %v751_v12  ;;  %v3113_v12 = vld [vmem:[%s3391_s25 + $0x38] sm:$0xff] }
 0x45f   :  { %v794_v14 = vpack.c.bf16 %v752_v13, %v752_v13  ;;  %v3112_v13 = vld [vmem:[%s3391_s25 + $0x30] sm:$0xff]  ;;  %s3639_s25 = sld [smem:[%s3899_s0 + %s3342_s22]]   ;;  %s3357_s22 = smov 35  }
 0x461   :  { %v802_v15 = vsel %vm323_vm3, %v794_v14, 0 }
 0x462   :  { %811 = vmatpush.bf16.xpose.msrb.mxu0 %v802_v15 }
 0x464   :  { %v753_v19 = vpop.f32.mrf.mxu2 }
 0x465   :  { %v754_v20 = vadd.f32 %v3198_v11, %v753_v19  ;;  %v3110_v11 = vld [vmem:[%s3386_s21 + $0x30] sm:$0xff]  ;;  %s3634_s21 = sld [smem:[%s3899_s0 + %s3341_s18]]   ;;  %s3356_s18 = smov 34  }
 0x467   :  { %v795_v25 = vpack.c.bf16 %v754_v20, %v754_v20 }
 0x469   :  { %v821_v28 = vsel %vm323_vm3, %v795_v25, 0  ;;  %v2810_v25 = vld [vmem:[%s3464_s11 + $0x8] sm:$0xf] }
 0x4af   :  { %v593_v18 = vpop.xlane.xlu1 %592 }
 0x4b0   :  { %3246 = vrcp.f32 %v593_v18 }
 0x4b6   :  { %v3247_v21 = vpop.eup %3246 }
 0x4b7   :  { %v599_v26 = vmul.f32 %v3247_v21, %v3245_v7 }
 0x4b9   :  { %v601_v27 = vpack.c.bf16 %v599_v26, %v599_v26  ;;  %v905_v26 = vsel %vm389_vm4, %v2810_v25, 0  ;;  %v2858_v25 = vld [vmem:[%s3464_s11 + $0xc] sm:$0xf]  ;;  %s3677_s11 = sld [smem:[%s3899_s0 + %s3346_s8]]  }
 0x4ba   :  { %914 = vmatpush.bf16.msra.mxu0 %v905_v26  ;;  %v1144_v26 = vsel %vm389_vm4, %v2858_v25, 0 }
 0x4bb   :  { %2759 = vmatmul.msk.bf16.vlgmr.msrb.gmra.mxu1 %vm323_vm3, %v601_v27 }
 0x4bc   :  { %830 = vmatpush.bf16.xpose.msrb.mxu1 %v821_v28 }
 0x4cb   :  { %2777 = vmatmul.msk.bf16.vlgmr.msra.gmra.mxu1 %vm190_vm2, %v3413_v24 }
 0x4cc   :  { %951 = vmatpush.bf16.msra.mxu1 %v3109_v33 }
 0x4d0   :  { %952 = vmatpush.bf16.msra.mxu1 %v3108_v34 }
 0x538   :  { %v618_v35 = vpop.f32.mrf.mxu1 }
 0x539   :  { %v641_v36 = vpack.c.bf16 %v637_v9, %v618_v35 }
 0x53b   :  { %2762 = vmatmul.msk.bf16.vlgmr.msrb.gmra.mxu3 %vm323_vm3, %v641_v36  ;;  %v3201_v36 = vld [vmem:[%s3376_s13 + $0x3] ss:$0 sm:$0xff]  ;;  %s3610_s13 = sld [smem:[%s3899_s0 + %s3339_s10]]   ;;  %s3354_s10 = smov 31  }
 0x540   :  { %v620_v37 = vpop.f32.mrf.mxu1 }
 0x548   :  { %v715_v39 = vpop.f32.mrf.mxu1 }
 0x549   :  { %v716_v40 = vadd.f32 %v3199_v38, %v715_v39 }
 0x54b   :  { %v792_v41 = vpack.c.bf16 %v716_v40, %v716_v40  ;;  %2805 = vmatmul.msk.bf16.vlgmr.msra.gmra.mxu3 %vm190_vm2, %v3413_v24 }
 0x54d   :  { %2806 = vmatmul.msk.bf16.vlgmr.msrb.gmra.mxu0 %vm323_vm3, %v792_v41 }
 0x550   :  { %v717_v42 = vpop.f32.mrf.mxu1 }
 0x551   :  { %v718_v43 = vadd.f32 %v3199_v38, %v717_v42  ;;  %v3203_v38 = vld [vmem:[%s3418_s7 + $0x3] ss:$0 sm:$0xff]  ;;  %s3666_s7 = sld [smem:[%s3899_s0 + %s3345_s4]]  }
 0x553   :  { %v793_v44 = vpack.c.bf16 %v718_v43, %v718_v43 }
 0x555   :  { %2807 = vmatmul.msk.bf16.vlgmr.msrb.gmra.mxu1 %vm323_vm3, %v793_v44 }
 0x565   :  { %2825 = vmatmul.msk.bf16.vlgmr.msra.gmra.mxu1 %vm190_vm2, %v3413_v24 }
 0x5be   :  { %v3503_v46 = vpop.f32.mrf.mxu3 }
 0x5c6   :  { %v3507_v48 = vpop.f32.mrf.mxu3 }
 0x5ca   :  { %v813_v49 = vpop.f32.mrf.mxu0 }
 0x5cb   :  { %v836_v50 = vsel %vm323_vm3, %v813_v49, -inf }
 0x5cc   :  { %837 = vmax.xlane.f32.xlu2 %v836_v50 }
 0x5ce   :  { %v787_v52 = vpop.f32.mrf.mxu3 }
 0x5cf   :  { %v788_v53 = vadd.f32 %v3200_v51, %v787_v52 }
 0x5d1   :  { %v796_v54 = vpack.c.bf16 %v788_v53, %v788_v53 }
 0x5d2   :  { %v815_v55 = vpop.f32.mrf.mxu0  ;;  %v832_v56 = vpop.f32.mrf.mxu1 }
 0x5d3   :  { %v864_v57 = vsel %vm389_vm4, %v796_v54, 0  ;;  %v839_v58 = vsel %vm323_vm3, %v832_v56, -inf }
 0x5d4   :  { %840 = vmax.xlane.f32.xlu1 %v839_v58  ;;  %873 = vmatpush.bf16.msrb.mxu2 %v864_v57 }
 0x5d6   :  { %v789_v59 = vpop.f32.mrf.mxu3 }
 0x5d7   :  { %v790_v60 = vadd.f32 %v3200_v51, %v789_v59 }
 0x5d8   :  { %987 = vmatpush.bf16.msra.mxu2 %v3111_v10 }
 0x5d9   :  { %v797_v61 = vpack.c.bf16 %v790_v60, %v790_v60  ;;  %v680_v60 = vadd.f32 %v3501_v45, %v3503_v46 }
 0x5da   :  { %v834_v62 = vpop.f32.mrf.mxu1 }
 0x5db   :  { %v883_v63 = vsel %vm389_vm4, %v797_v61, 0 }
 0x5dc   :  { %892 = vmatpush.bf16.msrb.mxu3 %v883_v63  ;;  %988 = vmatpush.bf16.msra.mxu2 %v3110_v11 }
 0x5e0   :  { %1023 = vmatpush.bf16.msra.mxu3 %v3113_v12 }
 0x5e2   :  { %v954_v35 = vpop.f32.mrf.mxu1 }
 0x5e3   :  { %v955_v39 = vadd.f32 %v3201_v36, %v954_v35 }
 0x5e4   :  { %1024 = vmatpush.bf16.msra.mxu3 %v3112_v13 }
 0x5e5   :  { %v1031_v44 = vpack.c.bf16 %v955_v39, %v955_v39 }
 0x5ea   :  { %v956_v51 = vpop.f32.mrf.mxu1 }
 0x5eb   :  { %v957_v54 = vadd.f32 %v3201_v36, %v956_v51  ;;  %v682_v36 = vadd.f32 %v3505_v47, %v3507_v48 }
 0x5ed   :  { %v1032_v57 = vpack.c.bf16 %v957_v54, %v957_v54 }
 0x63f   :  { %v838_v0 = vpop.xlane.xlu2 %837 }
 0x640   :  { %v842_v1 = vsub.f32 %v813_v49, %v838_v0 }
 0x642   :  { %v844_v2 = vmul.f32 1.442695, %v842_v1 }
 0x644   :  { %3248 = vpow2.f32 %v844_v2 }
 0x647   :  { %v841_v3 = vpop.xlane.xlu1 %840 }
 0x648   :  { %v843_v4 = vsub.f32 %v832_v56, %v841_v3 }
 0x64a   :  { %v3249_v5 = vpop.eup %3248  ;;  %v846_v6 = vmul.f32 1.442695, %v843_v4 }
 0x64b   :  { %v848_v7 = vsel %vm323_vm3, %v3249_v5, 0.0 }
 0x64c   :  { %3250 = vpow2.f32 %v846_v6  ;;  %849 = vadd.xlane.f32.xlu2 %v848_v7 }
 0x652   :  { %v3251_v8 = vpop.eup %3250 }
 0x653   :  { %v851_v9 = vsel %vm323_vm3, %v3251_v8, 0.0 }
 0x654   :  { %852 = vadd.xlane.f32.xlu1 %v851_v9 }
 0x6bf   :  { %v850_v14 = vpop.xlane.xlu2 %849 }
 0x6c0   :  { %3252 = vrcp.f32 %v850_v14 }
 0x6c6   :  { %v3253_v15 = vpop.eup %3252 }
 0x6c7   :  { %v856_v16 = vmul.f32 %v3253_v15, %v3249_v5  ;;  %v853_v17 = vpop.xlane.xlu1 %852 }
 0x6c8   :  { %3254 = vrcp.f32 %v853_v17 }
 0x6c9   :  { %v858_v18 = vpack.c.bf16 %v856_v16, %v856_v16 }
 0x6cb   :  { %2808 = vmatmul.msk.bf16.vlgmr.msrb.gmra.mxu2 %vm323_vm3, %v858_v18 }
 0x6ce   :  { %v3255_v19 = vpop.eup %3254 }
 0x6cf   :  { %v857_v20 = vmul.f32 %v3255_v19, %v3251_v8 }
 0x6d1   :  { %v859_v21 = vpack.c.bf16 %v857_v20, %v857_v20 }
 0x6d3   :  { %2809 = vmatmul.msk.bf16.vlgmr.msrb.gmra.mxu3 %vm323_vm3, %v859_v21 }
 0x6db   :  { %2839 = vmatmul.msk.bf16.vlgmr.msra.gmra.mxu2 %vm190_vm2, %v3413_v24 }
 0x6e3   :  { %2853 = vmatmul.msk.bf16.vlgmr.msra.gmra.mxu3 %vm190_vm2, %v3413_v24 }
 0x74e   :  { %v875_v27 = vpop.f32.mrf.mxu2 }
 0x756   :  { %v877_v28 = vpop.f32.mrf.mxu2  ;;  %v894_v29 = vpop.f32.mrf.mxu3 }
 0x757   :  { %v898_v30 = vpack.c.bf16 %v894_v29, %v875_v27 }
 0x759   :  { %2811 = vmatmul.msk.bf16.vlgmr.msra.gmra.mxu0 %vm323_vm3, %v898_v30 }
 0x75e   :  { %v896_v32 = vpop.f32.mrf.mxu3  ;;  %v990_v33 = vpop.f32.mrf.mxu2 }
 0x75f   :  { %v991_v34 = vadd.f32 %v3202_v31, %v990_v33 }
 0x761   :  { %v1033_v37 = vpack.c.bf16 %v991_v34, %v991_v34  ;;  %v3204_v34 = vld [vmem:[%s2645_s15] ss:$0 sm:$0xff]  ;;  %s3727_s15 = sld [smem:[%s3899_s0 + %s3347_s12]]  }
 0x763   :  { %v1041_v24 = vsel %vm323_vm3, %v1033_v37, 0 }
 0x764   :  { %1050 = vmatpush.bf16.xpose.msrb.mxu0 %v1041_v24 }
 0x766   :  { %v992_v40 = vpop.f32.mrf.mxu2  ;;  %v1026_v41 = vpop.f32.mrf.mxu3 }
 0x767   :  { %v993_v42 = vadd.f32 %v3202_v31, %v992_v40  ;;  %v1027_v43 = vadd.f32 %v3203_v38, %v1026_v41 }
 0x769   :  { %v1034_v49 = vpack.c.bf16 %v993_v42, %v993_v42  ;;  %v1035_v50 = vpack.c.bf16 %v1027_v43, %v1027_v43 }
 0x76b   :  { %v1060_v52 = vsel %vm323_vm3, %v1034_v49, 0  ;;  %v1103_v53 = vsel %vm389_vm4, %v1035_v50, 0  ;;  %2854 = vmatmul.msk.bf16.vlgmr.msrb.gmra.mxu0 %vm323_vm3, %v1031_v44 }
 0x76c   :  { %1069 = vmatpush.bf16.xpose.msrb.mxu1 %v1060_v52  ;;  %1112 = vmatpush.bf16.msrb.mxu2 %v1103_v53 }
 0x76d   :  { %1153 = vmatpush.bf16.msra.mxu0 %v1144_v26 }
 0x76e   :  { %v1028_v55 = vpop.f32.mrf.mxu3 }
 0x76f   :  { %v1029_v56 = vadd.f32 %v3203_v38, %v1028_v55 }
 0x771   :  { %v1036_v58 = vpack.c.bf16 %v1029_v56, %v1029_v56 }
 0x773   :  { %v1122_v59 = vsel %vm389_vm4, %v1036_v58, 0  ;;  %2855 = vmatmul.msk.bf16.vlgmr.msrb.gmra.mxu1 %vm323_vm3, %v1032_v57 }
 0x774   :  { %1131 = vmatpush.bf16.msrb.mxu3 %v1122_v59 }
 0x7d6   :  { %v916_v61 = vpop.f32.mrf.mxu0 }
 0x7d7   :  { %v921_v62 = vadd.f32 %v916_v61, %v680_v60  ;;  %v3115_v60 = vld [vmem:[%s2648_s1 + $0x8] sm:$0xff] }
 0x7d8   :  { %1267 = vmatpush.bf16.msra.mxu1 %v3115_v60 }
 0x7de   :  { %v918_v63 = vpop.f32.mrf.mxu0 }
 0x7df   :  { %v922_v24 = vadd.f32 %v918_v63, %v682_v36  ;;  %v3116_v36 = vld [vmem:[%s2650_s9] sm:$0xff] }
 0x7e8   :  { %v1052_v0 = vpop.f32.mrf.mxu0 }
 0x7e9   :  { %v1075_v1 = vsel %vm323_vm3, %v1052_v0, -inf }
 0x7ea   :  { %1076 = vmax.xlane.f32.xlu2 %v1075_v1 }
 0x7f0   :  { %v1054_v2 = vpop.f32.mrf.mxu0  ;;  %v1071_v3 = vpop.f32.mrf.mxu1 }
 0x7f1   :  { %v1078_v4 = vsel %vm323_vm3, %v1071_v3, -inf }
 0x7f2   :  { %1079 = vmax.xlane.f32.xlu1 %v1078_v4 }
 0x7f8   :  { %v1073_v5 = vpop.f32.mrf.mxu1 }
 0x85d   :  { %v1077_v6 = vpop.xlane.xlu2 %1076 }
 0x85e   :  { %v1081_v7 = vsub.f32 %v1052_v0, %v1077_v6 }
 0x860   :  { %v1083_v8 = vmul.f32 1.442695, %v1081_v7 }
 0x862   :  { %3256 = vpow2.f32 %v1083_v8 }
 0x865   :  { %v1080_v9 = vpop.xlane.xlu1 %1079 }
 0x866   :  { %v1082_v10 = vsub.f32 %v1071_v3, %v1080_v9 }
 0x868   :  { %v3257_v45 = vpop.eup %3256  ;;  %v1085_v46 = vmul.f32 1.442695, %v1082_v10 }
 0x869   :  { %v1087_v11 = vsel %vm323_vm3, %v3257_v45, 0.0 }
 0x86a   :  { %3258 = vpow2.f32 %v1085_v46  ;;  %1088 = vadd.xlane.f32.xlu2 %v1087_v11 }
 0x870   :  { %v3259_v12 = vpop.eup %3258 }
 0x871   :  { %v1090_v13 = vsel %vm323_vm3, %v3259_v12, 0.0 }
 0x872   :  { %1091 = vadd.xlane.f32.xlu1 %v1090_v13 }
 0x8dd   :  { %v1089_v14 = vpop.xlane.xlu2 %1088 }
 0x8de   :  { %3260 = vrcp.f32 %v1089_v14  ;;  %v3205_v14 = vld [vmem:[%s3555_s19] ss:$0 sm:$0xff]  ;;  %s2661_s19 = sld [smem:[%s3899_s0 + %s3348_s16]]  }
 0x8e4   :  { %v3261_v15 = vpop.eup %3260 }
 0x8e5   :  { %v1095_v16 = vmul.f32 %v3261_v15, %v3257_v45  ;;  %v1092_v17 = vpop.xlane.xlu1 %1091 }
 0x8e6   :  { %3262 = vrcp.f32 %v1092_v17 }
 0x8e7   :  { %v1097_v18 = vpack.c.bf16 %v1095_v16, %v1095_v16 }
 0x8e9   :  { %2856 = vmatmul.msk.bf16.vlgmr.msrb.gmra.mxu2 %vm323_vm3, %v1097_v18 }
 0x8ec   :  { %v3263_v19 = vpop.eup %3262 }
 0x8ed   :  { %v1096_v20 = vmul.f32 %v3263_v19, %v3259_v12 }
 0x8ef   :  { %v1098_v21 = vpack.c.bf16 %v1096_v20, %v1096_v20 }
 0x8f1   :  { %2857 = vmatmul.msk.bf16.vlgmr.msrb.gmra.mxu3 %vm323_vm3, %v1098_v21 }
 0x96c   :  { %v1114_v27 = vpop.f32.mrf.mxu2 }
 0x974   :  { %v1116_v28 = vpop.f32.mrf.mxu2  ;;  %v1133_v29 = vpop.f32.mrf.mxu3 }
 0x975   :  { %v1137_v30 = vpack.c.bf16 %v1133_v29, %v1114_v27  ;;  %v3206_v28 = vld [vmem:[%s3578_s23] ss:$0 sm:$0xff]  ;;  %s3817_s23 = sld [smem:[%s3899_s0 + %s3349_s20]]  }
 0x977   :  { %2859 = vmatmul.msk.bf16.vlgmr.msra.gmra.mxu0 %vm323_vm3, %v1137_v30 }
 0x97c   :  { %v1135_v31 = vpop.f32.mrf.mxu3 }
 0x9f4   :  { %v1155_v32 = vpop.f32.mrf.mxu0 }
 0x9f5   :  { %v1160_v33 = vadd.f32 %v1155_v32, %v921_v62  ;;  %v3114_v62 = vld [vmem:[%s2648_s1] sm:$0xff]  ;;  %s3838_s1 = sld [smem:[%s3899_s0 + %s3351_s28]]  }
 0x9f6   :  { %1268 = vmatpush.bf16.msra.mxu1 %v3114_v62 }
 0x9f7   :  { %v1162_v35 = vadd.f32 %v1160_v33, %v3402_v22  ;;  %v3119_v33 = vld [vmem:[%s2650_s9 + $0x18] sm:$0xff] }
 0x9f8   :  { %1322 = vmatpush.bf16.msra.mxu2 %v3119_v33 }
 0x9f9   :  { %v3560_v37 = vadd.f32 %v3204_v34, %v1162_v35  ;;  %v3117_v35 = vld [vmem:[%s2650_s9 + $0x8] sm:$0xff] }
 0x9fb   :  { %v1172_v38 = vsel %vm190_vm2, %v3560_v37, 0.0  ;;  %v1187_v39 = vmul.f32 %v3560_v37, %v3560_v37 }
 0x9fc   :  { %1173 = vadd.xlane.f32.xlu2 %v1172_v38  ;;  %v1157_v40 = vpop.f32.mrf.mxu0 }
 0x9fd   :  { %v1161_v41 = vadd.f32 %v1157_v40, %v922_v24  ;;  %v1189_v42 = vsel %vm190_vm2, %v1187_v39, 0.0  ;;  %v3207_v24 = vld [vmem:[%s3583_s27] ss:$0 sm:$0xff]  ;;  %s3822_s27 = sld [smem:[%s3899_s0 + %s3350_s24]]  }
 0x9fe   :  { %1190 = vadd.xlane.f32.xlu1 %v1189_v42 }
 0x9ff   :  { %v1163_v22 = vadd.f32 %v1161_v41, %v3404_v23  ;;  %v3335_v23 = vmov 32.0  }
 0xa00   :  { %3264 = vrcp.f32 %v3335_v23 }
 0xa01   :  { %v3568_v43 = vadd.f32 %v3204_v34, %v1163_v22  ;;  %v3118_v34 = vld [vmem:[%s2650_s9 + $0x10] sm:$0xff]  ;;  %s2667_s9 = sld [smem:[%s3899_s0 + %s3353_s6]]  }
 0xa02   :  { %1323 = vmatpush.bf16.msra.mxu2 %v3118_v34 }
 0xa03   :  { %v1175_v47 = vsel %vm190_vm2, %v3568_v43, 0.0  ;;  %v1188_v48 = vmul.f32 %v3568_v43, %v3568_v43 }
 0xa04   :  { %1176 = vadd.xlane.f32.xlu0 %v1175_v47 }
 0xa05   :  { %v1192_v44 = vsel %vm190_vm2, %v1188_v48, 0.0 }
 0xa06   :  { %1193 = vadd.xlane.f32.xlu2 %v1192_v44  ;;  %v3265_v49 = vpop.eup %3264  ;;  %1324 = vmatpush.bf16.msra.mxu2 %v3117_v35 }
 0xa07   :  { %v1179_v50 = vmul.f32 32.0, %v3265_v49  ;;  %vm1183_vm5 = vweird.f32 %v3265_v49 }
 0xa09   :  { %v1180_v51 = vsub.f32 1.0, %v1179_v50 }
 0xa0a   :  { %1325 = vmatpush.bf16.msra.mxu2 %v3116_v36 }
 0xa0b   :  { %v1181_v52 = vmul.f32 %v3265_v49, %v1180_v51 }
 0xa0d   :  { %v1182_v53 = vadd.f32 %v3265_v49, %v1181_v52 }
 0xa0f   :  { %v3588_v54 = vsel %vm1183_vm5, %v3265_v49, %v1182_v53 }
 0xa6f   :  { %v1174_v55 = vpop.xlane.xlu2 %1173 }
 0xa70   :  { %v1185_v56 = vmul.f32 %v3588_v54, %v1174_v55 }
 0xa71   :  { %v1191_v57 = vpop.xlane.xlu1 %1190 }
 0xa72   :  { %v1197_v58 = vmul.f32 %v1185_v56, %v1185_v56  ;;  %v1195_v59 = vmul.f32 %v1191_v57, %v3588_v54  ;;  %v1228_v20 = vsub.f32 %v3560_v37, %v1185_v56 }
 0xa74   :  { %v1199_v61 = vsub.f32 %v1195_v59, %v1197_v58 }
 0xa76   :  { %v1201_v63 = vadd.f32 1e-05, %v1199_v61 }
 0xa77   :  { %v1177_v0 = vpop.xlane.xlu0 %1176 }
 0xa78   :  { %3266 = vrsqrt.f32 %v1201_v63  ;;  %v1186_v1 = vmul.f32 %v3588_v54, %v1177_v0  ;;  %vm1209_vm7 = vweird.f32 %v1201_v63  ;;  %v3123_v0 = vld [vmem:[%s3644_s29 + $0x8] sm:$0xff] }
 0xa79   :  { %v1194_v2 = vpop.xlane.xlu2 %1193  ;;  %1458 = vmatpush.bf16.msrb.mxu0 %v3123_v0 }
 0xa7a   :  { %v1198_v3 = vmul.f32 %v1186_v1, %v1186_v1  ;;  %v1196_v4 = vmul.f32 %v1194_v2, %v3588_v54  ;;  %v1229_v26 = vsub.f32 %v3568_v43, %v1186_v1  ;;  %v3208_v43 = vld [vmem:[%s2651_s5] ss:$0 sm:$0xff]  ;;  %v3125_v1 = vld [vmem:[%s3649_s3 + $0x8] sm:$0xff]  ;;  %s2664_s5 = sld [smem:[%s3899_s0 + %s3352_s2]]  }
 0xa7b   :  { %1492 = vmatpush.bf16.msrb.mxu1 %v3125_v1 }
 0xa7c   :  { %v1200_v5 = vsub.f32 %v1196_v4, %v1198_v3  ;;  %v3120_v4 = vld [vmem:[%s3639_s25] sm:$0xff] }
 0xa7e   :  { %v3267_v6 = vpop.eup %3266  ;;  %v1202_v7 = vadd.f32 1e-05, %v1200_v5  ;;  %v3122_v5 = vld [vmem:[%s3644_s29] sm:$0xff] }
 0xa7f   :  { %v1204_v8 = vmul.f32 %v3267_v6, %v1201_v63  ;;  %vm1210_vm6 = vweird.f32 %v3267_v6  ;;  %v3121_v63 = vld [vmem:[%s3639_s25 + $0x8] sm:$0xff]  ;;  %1459 = vmatpush.bf16.msrb.mxu0 %v3122_v5 }
 0xa80   :  { %3268 = vrsqrt.f32 %v1202_v7  ;;  %vm1211_vm8 = vmor %vm1209_vm7, %vm1210_vm6  ;;  %vm1219_vm10 = vweird.f32 %v1202_v7  ;;  %1424 = vmatpush.bf16.msra.mxu3 %v3121_v63 }
 0xa81   :  { %v1205_v9 = vmul.f32 %v3267_v6, %v1204_v8 }
 0xa83   :  { %v1206_v10 = vmul.f32 0.5, %v1205_v9 }
 0xa84   :  { %1425 = vmatpush.bf16.msra.mxu3 %v3120_v4 }
 0xa85   :  { %v1207_v45 = vsub.f32 1.5, %v1206_v10 }
 0xa86   :  { %v3269_v46 = vpop.eup %3268 }
 0xa87   :  { %v1208_v11 = vmul.f32 %v3267_v6, %v1207_v45  ;;  %v1214_v12 = vmul.f32 %v3269_v46, %v1202_v7  ;;  %vm1220_vm9 = vweird.f32 %v3269_v46 }
 0xa88   :  { %vm1221_vm11 = vmor %vm1219_vm10, %vm1220_vm9 }
 0xa89   :  { %v1215_v13 = vmul.f32 %v3269_v46, %v1214_v12  ;;  %v1212_v15 = vsel %vm1211_vm8, %v3267_v6, %v1208_v11  ;;  %v3124_v6 = vld [vmem:[%s3649_s3] sm:$0xff] }
 0xa8a   :  { %v1226_v18 = vmul.f32 %v3205_v14, %v1212_v15  ;;  %1493 = vmatpush.bf16.msrb.mxu1 %v3124_v6 }
 0xa8b   :  { %v1216_v16 = vmul.f32 0.5, %v1215_v13 }
 0xa8c   :  { %v1230_v25 = vmul.f32 %v1228_v20, %v1226_v18 }
 0xa8d   :  { %v1217_v17 = vsub.f32 1.5, %v1216_v16 }
 0xa8e   :  { %v1235_v30 = vadd.f32 %v3206_v28, %v1230_v25 }
 0xa8f   :  { %v1218_v19 = vmul.f32 %v3269_v46, %v1217_v17 }
 0xa91   :  { %v1222_v21 = vsel %vm1221_vm11, %v3269_v46, %v1218_v19 }
 0xa92   :  { %v1227_v27 = vmul.f32 %v3205_v14, %v1222_v21  ;;  %v3209_v21 = vld [vmem:[%s3610_s13] ss:$0 sm:$0xff]  ;;  %s2666_s13 = sld [smem:[%s3899_s0 + %s3354_s10]]  }
 0xa94   :  { %v1231_v29 = vmul.f32 %v1229_v26, %v1227_v27 }
 0xa96   :  { %v1236_v31 = vadd.f32 %v3206_v28, %v1231_v29 }
 0xa98   :  { %v1237_v32 = vpack.c.bf16 %v1236_v31, %v1235_v30 }
 0xa9a   :  { %2868 = vmatmul.msk.bf16.vlgmr.msra.gmra.mxu1 %vm190_vm2, %v1237_v32  ;;  %v3210_v32 = vld [vmem:[%s3615_s17] ss:$0 sm:$0xff]  ;;  %s3866_s17 = sld [smem:[%s3899_s0 + %s3355_s14]]  }
 0xb17   :  { %v1270_v37 = vpop.f32.mrf.mxu1 }
 0xb18   :  { %v1271_v38 = vadd.f32 %v3207_v24, %v1270_v37 }
 0xb1a   :  { %v1275_v41 = vmax.f32 %v1271_v38, 0.0 }
 0xb1f   :  { %v1272_v39 = vpop.f32.mrf.mxu1 }
 0xb20   :  { %v1273_v40 = vadd.f32 %v3207_v24, %v1272_v39  ;;  %v3211_v39 = vld [vmem:[%s3634_s21] ss:$0 sm:$0xff] }
 0xb22   :  { %v1276_v42 = vmax.f32 %v1273_v40, 0.0  ;;  %v3212_v40 = vld [vmem:[%s3666_s7] ss:$0 sm:$0xff] }
 0xb24   :  { %v1277_v22 = vpack.c.bf16 %v1276_v42, %v1275_v41 }
 0xb26   :  { %2885 = vmatmul.msk.bf16.vlgmr.msra.gmra.mxu2 %vm1314_vm12, %v1277_v22 }
 0xba9   :  { %v1327_v47 = vpop.f32.mrf.mxu2 }
 0xbaa   :  { %v1328_v48 = vadd.f32 %v3208_v43, %v1327_v47 }
 0xbac   :  { %v3617_v44 = vadd.f32 %v1328_v48, %v1235_v30  ;;  %v3213_v48 = vld [vmem:[%s3677_s11] ss:$0 sm:$0xff] }
 0xbae   :  { %v1336_v23 = vsel %vm190_vm2, %v3617_v44, 0.0  ;;  %v1344_v49 = vmul.f32 %v3617_v44, %v3617_v44 }
 0xbaf   :  { %1337 = vadd.xlane.f32.xlu0 %v1336_v23 }
 0xbb0   :  { %v1346_v50 = vsel %vm190_vm2, %v1344_v49, 0.0 }
 0xbb1   :  { %v1329_v51 = vpop.f32.mrf.mxu2  ;;  %1347 = vadd.xlane.f32.xlu2 %v1346_v50 }
 0xbb2   :  { %v1330_v52 = vadd.f32 %v3208_v43, %v1329_v51 }
 0xbb4   :  { %v3624_v53 = vadd.f32 %v1330_v52, %v1236_v31 }
 0xbb6   :  { %v1339_v55 = vsel %vm190_vm2, %v3624_v53, 0.0  ;;  %v1345_v56 = vmul.f32 %v3624_v53, %v3624_v53 }
 0xbb7   :  { %1340 = vadd.xlane.f32.xlu1 %v1339_v55 }
 0xbb8   :  { %v1349_v57 = vsel %vm190_vm2, %v1345_v56, 0.0 }
 0xbb9   :  { %1350 = vadd.xlane.f32.xlu0 %v1349_v57 }
 0xc22   :  { %v1338_v58 = vpop.xlane.xlu0 %1337 }
 0xc23   :  { %v1342_v59 = vmul.f32 %v1338_v58, %v3588_v54 }
 0xc24   :  { %v1348_v60 = vpop.xlane.xlu2 %1347 }
 0xc25   :  { %v1354_v61 = vmul.f32 %v1342_v59, %v1342_v59  ;;  %v1352_v62 = vmul.f32 %v1348_v60, %v3588_v54  ;;  %v1385_v30 = vsub.f32 %v3617_v44, %v1342_v59  ;;  %v3127_v44 = vld [vmem:[%s3639_s25 + $0x18] sm:$0xff] }
 0xc27   :  { %v1356_v2 = vsub.f32 %v1352_v62, %v1354_v61  ;;  %v3129_v61 = vld [vmem:[%s3644_s29 + $0x18] sm:$0xff] }
 0xc29   :  { %v1358_v3 = vadd.f32 1e-05, %v1356_v2 }
 0xc2a   :  { %v1341_v7 = vpop.xlane.xlu1 %1340 }
 0xc2b   :  { %3270 = vrsqrt.f32 %v1358_v3  ;;  %v1343_v8 = vmul.f32 %v1341_v7, %v3588_v54  ;;  %vm1366_vm14 = vweird.f32 %v1358_v3 }
 0xc2c   :  { %v1351_v9 = vpop.xlane.xlu0 %1350 }
 0xc2d   :  { %v1355_v10 = vmul.f32 %v1343_v8, %v1343_v8  ;;  %v1353_v45 = vmul.f32 %v1351_v9, %v3588_v54  ;;  %v1386_v34 = vsub.f32 %v3624_v53, %v1343_v8  ;;  %v3126_v53 = vld [vmem:[%s3639_s25 + $0x10] sm:$0xff] }
 0xc2f   :  { %v1357_v46 = vsub.f32 %v1353_v45, %v1355_v10  ;;  %v3214_v10 = vld [vmem:[%s3677_s11 + $0x1] ss:$0 sm:$0xff] }
 0xc31   :  { %v3271_v11 = vpop.eup %3270  ;;  %v1359_v12 = vadd.f32 1e-05, %v1357_v46 }
 0xc32   :  { %v1361_v13 = vmul.f32 %v3271_v11, %v1358_v3  ;;  %vm1367_vm13 = vweird.f32 %v3271_v11  ;;  %v3128_v3 = vld [vmem:[%s3644_s29 + $0x10] sm:$0xff] }
 0xc33   :  { %3272 = vrsqrt.f32 %v1359_v12  ;;  %vm1368_vm15 = vmor %vm1366_vm14, %vm1367_vm13  ;;  %vm1376_vm1 = vweird.f32 %v1359_v12 }
 0xc34   :  { %v1362_v14 = vmul.f32 %v3271_v11, %v1361_v13 }
 0xc36   :  { %v1363_v15 = vmul.f32 0.5, %v1362_v14 }
 0xc38   :  { %v1364_v16 = vsub.f32 1.5, %v1363_v15 }
 0xc39   :  { %v3273_v17 = vpop.eup %3272 }
 0xc3a   :  { %v1365_v18 = vmul.f32 %v3271_v11, %v1364_v16  ;;  %v1371_v19 = vmul.f32 %v3273_v17, %v1359_v12  ;;  %vm1377_vm0 = vweird.f32 %v3273_v17  ;;  %v3215_v12 = vld [vmem:[%s3634_s21 + $0x1] ss:$0 sm:$0xff] }
 0xc3b   :  { %vm1378_vm5 = vmor %vm1376_vm1, %vm1377_vm0  ;;  %vm2599_vm1 = vcmask 1041409  }
 0xc3c   :  { %v1372_v20 = vmul.f32 %v3273_v17, %v1371_v19  ;;  %v1369_v25 = vsel %vm1368_vm15, %v3271_v11, %v1365_v18 }
 0xc3d   :  { %v1383_v28 = vmul.f32 %v3209_v21, %v1369_v25 }
 0xc3e   :  { %v1373_v26 = vmul.f32 0.5, %v1372_v20 }
 0xc3f   :  { %v1387_v33 = vmul.f32 %v1385_v30, %v1383_v28 }
 0xc40   :  { %v1374_v27 = vsub.f32 1.5, %v1373_v26 }
 0xc41   :  { %v3670_v37 = vadd.f32 %v3210_v32, %v1387_v33 }
 0xc42   :  { %v1375_v29 = vmul.f32 %v3273_v17, %v1374_v27 }
 0xc44   :  { %v1379_v31 = vsel %vm1378_vm5, %v3273_v17, %v1375_v29 }
 0xc45   :  { %v1384_v35 = vmul.f32 %v3209_v21, %v1379_v31 }
 0xc47   :  { %v1388_v36 = vmul.f32 %v1386_v34, %v1384_v35 }
 0xc49   :  { %v3672_v24 = vadd.f32 %v3210_v32, %v1388_v36 }
 0xc4b   :  { %v3681_v38 = vpack.c.bf16 %v3672_v24, %v3670_v37 }
 0xc4d   :  { %2894 = vmatmul.msk.bf16.vlgmr.msra.gmra.mxu3 %vm190_vm2, %v3681_v38  ;;  %2903 = vmatmul.msk.bf16.vlgmr.msrb.gmra.mxu0 %vm190_vm2, %v3681_v38 }
 0xc4e   :  { %2912 = vmatmul.msk.bf16.vlgmr.msrb.gmra.mxu1 %vm190_vm2, %v3681_v38 }
 0xcca   :  { %v1461_v41 = vpop.f32.mrf.mxu0 }
 0xccb   :  { %v1462_v42 = vadd.f32 %v3211_v39, %v1461_v41  ;;  %v1495_v22 = vpop.f32.mrf.mxu1 }
 0xccc   :  { %v1496_v43 = vadd.f32 %v3212_v40, %v1495_v22  ;;  %v3130_v22 = vld [vmem:[%s3649_s3 + $0x10] sm:$0xff] }
 0xccd   :  { %v1502_v47 = vpack.c.bf16 %v1462_v42, %v1462_v42  ;;  %v3131_v42 = vld [vmem:[%s3649_s3 + $0x18] sm:$0xff] }
 0xcce   :  { %v1504_v23 = vpack.c.bf16 %v1496_v43, %v1496_v43 }
 0xccf   :  { %v1510_v49 = vsel %vm323_vm3, %v1502_v47, 0 }
 0xcd0   :  { %v1572_v50 = vsel %vm389_vm4, %v1504_v23, 0  ;;  %v1427_v51 = vpop.f32.mrf.mxu3  ;;  %1519 = vmatpush.bf16.xpose.msrb.mxu2 %v1510_v49 }
 0xcd1   :  { %v1428_v52 = vadd.f32 %v3213_v48, %v1427_v51  ;;  %1581 = vmatpush.bf16.msra.mxu0 %v1572_v50 }
 0xcd2   :  { %v1463_v55 = vpop.f32.mrf.mxu0 }
 0xcd3   :  { %v1464_v56 = vadd.f32 %v3211_v39, %v1463_v55  ;;  %v1497_v57 = vpop.f32.mrf.mxu1  ;;  %v1500_v59 = vpack.c.bf16 %v1428_v52, %v1428_v52 }
 0xcd4   :  { %v1498_v58 = vadd.f32 %v3212_v40, %v1497_v57 }
 0xcd5   :  { %v1503_v60 = vpack.c.bf16 %v1464_v56, %v1464_v56  ;;  %1708 = vmatpush.bf16.msrb.mxu0 %v3131_v42 }
 0xcd6   :  { %v1505_v62 = vpack.c.bf16 %v1498_v58, %v1498_v58 }
 0xcd7   :  { %v1529_v63 = vsel %vm323_vm3, %v1503_v60, 0  ;;  %2913 = vmatmul.msk.bf16.vlgmr.msrb.gmra.mxu2 %vm323_vm3, %v1500_v59  ;;  %v1607_v59 = vld [vmem:[%s3727_s15] sm:$0xf] }
 0xcd8   :  { %1636 = vmatpush.bf16.msra.mxu2 %v3127_v44  ;;  %v1591_v0 = vsel %vm389_vm4, %v1505_v62, 0  ;;  %v1429_v1 = vpop.f32.mrf.mxu3  ;;  %1538 = vmatpush.bf16.xpose.msrb.mxu3 %v1529_v63  ;;  %v1849_v60 = vsel %vm389_vm4, %v1607_v59, 0 }
 0xcd9   :  { %v1430_v2 = vadd.f32 %v3213_v48, %v1429_v1  ;;  %1600 = vmatpush.bf16.msra.mxu1 %v1591_v0  ;;  %1709 = vmatpush.bf16.msrb.mxu0 %v3130_v22  ;;  %v3216_v1 = vld [vmem:[%s3666_s7 + $0x1] ss:$0 sm:$0xff] }
 0xcdb   :  { %v1501_v4 = vpack.c.bf16 %v1430_v2, %v1430_v2 }
 0xcdc   :  { %1637 = vmatpush.bf16.msra.mxu2 %v3126_v53 }
 0xcdf   :  { %2914 = vmatmul.msk.bf16.vlgmr.msrb.gmra.mxu3 %vm323_vm3, %v1501_v4 }
 0xce0   :  { %1672 = vmatpush.bf16.msra.mxu3 %v3129_v61 }
 0xce4   :  { %1673 = vmatpush.bf16.msra.mxu3 %v3128_v3 }
 0xce7   :  { %2930 = vmatmul.msk.bf16.vlgmr.msra.gmra.mxu2 %vm190_vm2, %v3681_v38 }
 0xcef   :  { %2944 = vmatmul.msk.bf16.vlgmr.msra.gmra.mxu3 %vm190_vm2, %v3681_v38 }
 0xd5a   :  { %v1521_v5 = vpop.f32.mrf.mxu2 }
 0xd5b   :  { %v1544_v6 = vsel %vm323_vm3, %v1521_v5, -inf }
 0xd5c   :  { %1545 = vmax.xlane.f32.xlu0 %v1544_v6 }
 0xd62   :  { %v1523_v7 = vpop.f32.mrf.mxu2  ;;  %v1540_v8 = vpop.f32.mrf.mxu3 }
 0xd63   :  { %v1547_v9 = vsel %vm323_vm3, %v1540_v8, -inf }
 0xd64   :  { %1548 = vmax.xlane.f32.xlu1 %v1547_v9 }
 0xd6a   :  { %v1542_v45 = vpop.f32.mrf.mxu3  ;;  %v1639_v46 = vpop.f32.mrf.mxu2 }
 0xd6b   :  { %v1640_v11 = vadd.f32 %v3214_v10, %v1639_v46  ;;  %v3135_v46 = vld [vmem:[%s3644_s29 + $0x28] sm:$0xff] }
 0xd6d   :  { %v1716_v52 = vpack.c.bf16 %v1640_v11, %v1640_v11 }
 0xd72   :  { %v1675_v13 = vpop.f32.mrf.mxu3  ;;  %v1641_v20 = vpop.f32.mrf.mxu2 }
 0xd73   :  { %v1676_v14 = vadd.f32 %v3215_v12, %v1675_v13  ;;  %v1642_v25 = vadd.f32 %v3214_v10, %v1641_v20 }
 0xd75   :  { %v1718_v15 = vpack.c.bf16 %v1676_v14, %v1676_v14  ;;  %v1717_v26 = vpack.c.bf16 %v1642_v25, %v1642_v25 }
 0xd77   :  { %v1726_v16 = vsel %vm323_vm3, %v1718_v15, 0 }
 0xd78   :  { %1735 = vmatpush.bf16.xpose.msrb.mxu1 %v1726_v16 }
 0xd7a   :  { %v1677_v17 = vpop.f32.mrf.mxu3 }
 0xd7b   :  { %v1678_v18 = vadd.f32 %v3215_v12, %v1677_v17  ;;  %v3134_v12 = vld [vmem:[%s3644_s29 + $0x20] sm:$0xff] }
 0xd7d   :  { %v1719_v19 = vpack.c.bf16 %v1678_v18, %v1678_v18 }
 0xd7f   :  { %v1745_v21 = vsel %vm323_vm3, %v1719_v19, 0 }
 0xd80   :  { %1754 = vmatpush.bf16.xpose.msrb.mxu2 %v1745_v21 }
 0xd87   :  { %2960 = vmatmul.msk.bf16.vlgmr.msrb.gmra.mxu2 %vm323_vm3, %v1717_v26 }
 0xd88   :  { %1858 = vmatpush.bf16.msra.mxu2 %v1849_v60 }
 0xdcf   :  { %v1546_v27 = vpop.xlane.xlu0 %1545 }
 0xdd0   :  { %v1550_v28 = vsub.f32 %v1521_v5, %v1546_v27 }
 0xdd2   :  { %v1552_v29 = vmul.f32 1.442695, %v1550_v28  ;;  %v3217_v28 = vld [vmem:[%s3634_s21 + $0x2] ss:$0 sm:$0xff] }
 0xdd4   :  { %3274 = vpow2.f32 %v1552_v29 }
 0xdd7   :  { %v1549_v30 = vpop.xlane.xlu1 %1548 }
 0xdd8   :  { %v1551_v31 = vsub.f32 %v1540_v8, %v1549_v30 }
 0xdda   :  { %v3275_v32 = vpop.eup %3274  ;;  %v1554_v33 = vmul.f32 1.442695, %v1551_v31 }
 0xddb   :  { %v1556_v34 = vsel %vm323_vm3, %v3275_v32, 0.0 }
 0xddc   :  { %3276 = vpow2.f32 %v1554_v33  ;;  %1557 = vadd.xlane.f32.xlu1 %v1556_v34  ;;  %v3133_v33 = vld [vmem:[%s3639_s25 + $0x28] sm:$0xff]  ;;  %v3132_v34 = vld [vmem:[%s3639_s25 + $0x20] sm:$0xff] }
 0xde2   :  { %v3277_v35 = vpop.eup %3276 }
 0xde3   :  { %v1559_v36 = vsel %vm323_vm3, %v3277_v35, 0.0 }
 0xde4   :  { %1560 = vadd.xlane.f32.xlu2 %v1559_v36 }
 0xe0a   :  { %v1756_v39 = vpop.f32.mrf.mxu2 }
 0xe0b   :  { %v1763_v40 = vsel %vm323_vm3, %v1756_v39, -inf }
 0xe0c   :  { %1764 = vmax.xlane.f32.xlu2 %v1763_v40 }
 0xe12   :  { %v1758_v41 = vpop.f32.mrf.mxu2 }
 0xe4f   :  { %v1558_v43 = vpop.xlane.xlu1 %1557 }
 0xe50   :  { %3278 = vrcp.f32 %v1558_v43 }
 0xe56   :  { %v3279_v47 = vpop.eup %3278 }
 0xe57   :  { %v1564_v48 = vmul.f32 %v3279_v47, %v3275_v32  ;;  %v1561_v44 = vpop.xlane.xlu2 %1560  ;;  %v2963_v47 = vld [vmem:[%s3727_s15 + $0x4] sm:$0xf] }
 0xe58   :  { %3280 = vrcp.f32 %v1561_v44  ;;  %v3137_v44 = vld [vmem:[%s3649_s3 + $0x28] sm:$0xff] }
 0xe59   :  { %v1566_v23 = vpack.c.bf16 %v1564_v48, %v1564_v48  ;;  %v1829_v48 = vsel %vm389_vm4, %v2963_v47, 0 }
 0xe5b   :  { %2915 = vmatmul.msk.bf16.vlgmr.msra.gmra.mxu0 %vm323_vm3, %v1566_v23  ;;  %v3136_v23 = vld [vmem:[%s3649_s3 + $0x20] sm:$0xff] }
 0xe5e   :  { %v3281_v49 = vpop.eup %3280 }
 0xe5f   :  { %v1565_v50 = vmul.f32 %v3281_v49, %v3277_v35  ;;  %v3139_v49 = vld [vmem:[%s3639_s25 + $0x38] sm:$0xff] }
 0xe61   :  { %v1567_v51 = vpack.c.bf16 %v1565_v50, %v1565_v50  ;;  %v3138_v50 = vld [vmem:[%s3639_s25 + $0x30] sm:$0xff]  ;;  %s3881_s25 = sld [smem:[%s3899_s0 + %s3357_s22]]  }
 0xe63   :  { %2916 = vmatmul.msk.bf16.vlgmr.msra.gmra.mxu1 %vm323_vm3, %v1567_v51 }
 0xe64   :  { %1838 = vmatpush.bf16.msra.mxu1 %v1829_v48 }
 0xe6b   :  { %2958 = vmatmul.msk.bf16.vlgmr.msrb.gmra.mxu0 %vm190_vm2, %v3681_v38 }
 0xe73   :  { %2959 = vmatmul.msk.bf16.vlgmr.msrb.gmra.mxu1 %vm323_vm3, %v1716_v52 }
 0xe74   :  { %1965 = vmatpush.bf16.msrb.mxu1 %v3137_v44 }
 0xe78   :  { %1966 = vmatpush.bf16.msrb.mxu1 %v3136_v23 }
 0xe7f   :  { %v1765_v53 = vpop.xlane.xlu2 %1764 }
 0xe80   :  { %v1767_v55 = vsub.f32 %v1756_v39, %v1765_v53 }
 0xe82   :  { %v1770_v56 = vmul.f32 1.442695, %v1767_v55  ;;  %v3218_v55 = vld [vmem:[%s3677_s11 + $0x2] ss:$0 sm:$0xff] }
 0xe84   :  { %3282 = vpow2.f32 %v1770_v56 }
 0xe8a   :  { %v3283_v57 = vpop.eup %3282 }
 0xe8b   :  { %v1775_v58 = vsel %vm323_vm3, %v3283_v57, 0.0 }
 0xe8c   :  { %1776 = vadd.xlane.f32.xlu1 %v1775_v58 }
 0xed8   :  { %v1583_v61 = vpop.f32.mrf.mxu0 }
 0xee0   :  { %v1585_v62 = vpop.f32.mrf.mxu0  ;;  %v1602_v63 = vpop.f32.mrf.mxu1 }
 0xee1   :  { %v1606_v0 = vpack.c.bf16 %v1602_v63, %v1583_v61 }
 0xee3   :  { %2965 = vmatmul.msk.bf16.vlgmr.msra.gmra.mxu2 %vm323_vm3, %v1606_v0 }
 0xee8   :  { %v1604_v2 = vpop.f32.mrf.mxu1  ;;  %v1711_v3 = vpop.f32.mrf.mxu0 }
 0xee9   :  { %v1712_v4 = vadd.f32 %v3216_v1, %v1711_v3  ;;  %v3219_v3 = vld [vmem:[%s3666_s7 + $0x2] ss:$0 sm:$0xff] }
 0xeeb   :  { %v1720_v5 = vpack.c.bf16 %v1712_v4, %v1712_v4 }
 0xeed   :  { %v1788_v6 = vsel %vm389_vm4, %v1720_v5, 0 }
 0xeee   :  { %1797 = vmatpush.bf16.msrb.mxu3 %v1788_v6 }
 0xef0   :  { %v1713_v7 = vpop.f32.mrf.mxu0  ;;  %v1737_v8 = vpop.f32.mrf.mxu1 }
 0xef1   :  { %v1714_v9 = vadd.f32 %v3216_v1, %v1713_v7  ;;  %v1760_v10 = vsel %vm323_vm3, %v1737_v8, -inf }
 0xef2   :  { %1761 = vmax.xlane.f32.xlu0 %v1760_v10  ;;  %1893 = vmatpush.bf16.msra.mxu3 %v3133_v33 }
 0xef3   :  { %v1721_v45 = vpack.c.bf16 %v1714_v9, %v1714_v9 }
 0xef5   :  { %v1807_v11 = vsel %vm389_vm4, %v1721_v45, 0 }
 0xef6   :  { %1816 = vmatpush.bf16.msra.mxu0 %v1807_v11  ;;  %1894 = vmatpush.bf16.msra.mxu3 %v3132_v34 }
 0xef8   :  { %v1739_v13 = vpop.f32.mrf.mxu1 }
 0xefa   :  { %1929 = vmatpush.bf16.msrb.mxu0 %v3135_v46 }
 0xefe   :  { %1930 = vmatpush.bf16.msrb.mxu0 %v3134_v12 }
 0xeff   :  { %v1777_v14 = vpop.xlane.xlu1 %1776 }
 0xf00   :  { %3284 = vrcp.f32 %v1777_v14 }
 0xf06   :  { %v3285_v15 = vpop.eup %3284 }
 0xf07   :  { %v1781_v16 = vmul.f32 %v3285_v15, %v3283_v57 }
 0xf09   :  { %v1783_v17 = vpack.c.bf16 %v1781_v16, %v1781_v16 }
 0xf0b   :  { %2962 = vmatmul.msk.bf16.vlgmr.msra.gmra.mxu0 %vm323_vm3, %v1783_v17 }
 0xf1b   :  { %2993 = vmatmul.msk.bf16.vlgmr.msrb.gmra.mxu0 %vm190_vm2, %v3681_v38 }
 0xf65   :  { %v1762_v18 = vpop.xlane.xlu0 %1761 }
 0xf66   :  { %v1766_v19 = vsub.f32 %v1737_v8, %v1762_v18  ;;  %v3764_v62 = vpop.f32.mrf.mxu2 }
 0xf68   :  { %v1768_v20 = vmul.f32 1.442695, %v1766_v19 }
 0xf6a   :  { %3286 = vpow2.f32 %v1768_v20 }
 0xf6e   :  { %v1862_v0 = vpop.f32.mrf.mxu2 }
 0xf70   :  { %v3287_v21 = vpop.eup %3286 }
 0xf71   :  { %v1772_v25 = vsel %vm323_vm3, %v3287_v21, 0.0 }
 0xf72   :  { %1773 = vadd.xlane.f32.xlu2 %v1772_v25 }
 0xf88   :  { %v1818_v26 = vpop.f32.mrf.mxu0 }
 0xf90   :  { %v1820_v27 = vpop.f32.mrf.mxu0 }
 0xf98   :  { %v1932_v29 = vpop.f32.mrf.mxu0 }
 0xf99   :  { %v1933_v30 = vadd.f32 %v3217_v28, %v1932_v29  ;;  %v3141_v29 = vld [vmem:[%s3644_s29 + $0x38] sm:$0xff] }
 0xf9b   :  { %v1975_v31 = vpack.c.bf16 %v1933_v30, %v1933_v30  ;;  %v3140_v30 = vld [vmem:[%s3644_s29 + $0x30] sm:$0xff]  ;;  %s2671_s29 = sld [smem:[%s3899_s0 + %s3359_s26]]  }
 0xf9d   :  { %v1983_v32 = vsel %vm323_vm3, %v1975_v31, 0  ;;  %v3143_v31 = vld [vmem:[%s3649_s3 + $0x38] sm:$0xff] }
 0xf9e   :  { %1992 = vmatpush.bf16.xpose.msrb.mxu2 %v1983_v32  ;;  %v3142_v32 = vld [vmem:[%s3649_s3 + $0x30] sm:$0xff]  ;;  %s2672_s3 = sld [smem:[%s3899_s0 + %s3360_s30]]  }
 0xfa0   :  { %v1934_v36 = vpop.f32.mrf.mxu0 }
 0xfa1   :  { %v1935_v39 = vadd.f32 %v3217_v28, %v1934_v36 }
 0xfa3   :  { %v1976_v41 = vpack.c.bf16 %v1935_v39, %v1935_v39 }
 0xfa5   :  { %v2002_v43 = vsel %vm323_vm3, %v1976_v41, 0 }
 0xfe5   :  { %v1774_v35 = vpop.xlane.xlu2 %1773 }
 0xfe6   :  { %3288 = vrcp.f32 %v1774_v35 }
 0xfec   :  { %v3289_v40 = vpop.eup %3288 }
 0xfed   :  { %v1780_v42 = vmul.f32 %v3289_v40, %v3287_v21 }
 0xfef   :  { %v1782_v22 = vpack.c.bf16 %v1780_v42, %v1780_v42 }
 0xff1   :  { %2961 = vmatmul.msk.bf16.vlgmr.msrb.gmra.mxu3 %vm323_vm3, %v1782_v22  ;;  %v3012_v22 = vld [vmem:[%s3727_s15 + $0x8] sm:$0xf] }
 0xff2   :  { %2011 = vmatpush.bf16.xpose.msrb.mxu3 %v2002_v43  ;;  %v2086_v43 = vsel %vm389_vm4, %v3012_v22, 0  ;;  %v3060_v22 = vld [vmem:[%s3727_s15 + $0xc] sm:$0xf] }
 0xff3   :  { %2095 = vmatpush.bf16.msra.mxu2 %v2086_v43  ;;  %v2325_v43 = vsel %vm389_vm4, %v3060_v22, 0  ;;  %v3149_v22 = vld [vmem:[%s2666_s13 + $0x18] sm:$0xff] }
0x1001   :  { %2979 = vmatmul.msk.bf16.vlgmr.msra.gmra.mxu3 %vm190_vm2, %v3681_v38 }
0x1002   :  { %2132 = vmatpush.bf16.msra.mxu3 %v3139_v49  ;;  %v3221_v49 = vld [vmem:[%s3634_s21 + $0x3] ss:$0 sm:$0xff]  ;;  %s3871_s21 = sld [smem:[%s3899_s0 + %s3356_s18]]  }
0x1006   :  { %2133 = vmatpush.bf16.msra.mxu3 %v3138_v50 }
0x1074   :  { %v1799_v51 = vpop.f32.mrf.mxu3 }
0x1075   :  { %v1822_v52 = vpack.c.bf16 %v1818_v26, %v1799_v51 }
0x1077   :  { %2964 = vmatmul.msk.bf16.vlgmr.msra.gmra.mxu1 %vm323_vm3, %v1822_v52 }
0x107c   :  { %v1801_v53 = vpop.f32.mrf.mxu3 }
0x1084   :  { %v1896_v56 = vpop.f32.mrf.mxu3 }
0x1085   :  { %v1897_v57 = vadd.f32 %v3218_v55, %v1896_v56 }
0x1087   :  { %v1973_v58 = vpack.c.bf16 %v1897_v57, %v1897_v57  ;;  %3007 = vmatmul.msk.bf16.vlgmr.msrb.gmra.mxu1 %vm190_vm2, %v3681_v38  ;;  %v3222_v57 = vld [vmem:[%s3666_s7 + $0x3] ss:$0 sm:$0xff] }
0x1089   :  { %3008 = vmatmul.msk.bf16.vlgmr.msrb.gmra.mxu2 %vm323_vm3, %v1973_v58 }
0x108c   :  { %v1898_v59 = vpop.f32.mrf.mxu3 }
0x108d   :  { %v1899_v60 = vadd.f32 %v3218_v55, %v1898_v59  ;;  %v3220_v55 = vld [vmem:[%s3677_s11 + $0x3] ss:$0 sm:$0xff] }
0x108f   :  { %v1974_v61 = vpack.c.bf16 %v1899_v60, %v1899_v60 }
0x1091   :  { %3009 = vmatmul.msk.bf16.vlgmr.msrb.gmra.mxu3 %vm323_vm3, %v1974_v61 }
0x10a1   :  { %3027 = vmatmul.msk.bf16.vlgmr.msra.gmra.mxu3 %vm190_vm2, %v3681_v38 }
0x10f4   :  { %v3766_v63 = vpop.f32.mrf.mxu1 }
0x10fc   :  { %v1842_v1 = vpop.f32.mrf.mxu1 }
0x10fd   :  { %v3768_v2 = vadd.f32 %v1862_v0, %v1842_v1 }
0x1104   :  { %v1968_v4 = vpop.f32.mrf.mxu1 }
0x1105   :  { %v1969_v5 = vadd.f32 %v3219_v3, %v1968_v4 }
0x1107   :  { %v1977_v6 = vpack.c.bf16 %v1969_v5, %v1969_v5 }
0x1109   :  { %v2045_v7 = vsel %vm389_vm4, %v1977_v6, 0 }
0x110a   :  { %2054 = vmatpush.bf16.msra.mxu0 %v2045_v7 }
0x110c   :  { %v1970_v8 = vpop.f32.mrf.mxu1  ;;  %v1994_v9 = vpop.f32.mrf.mxu2 }
0x110d   :  { %v1971_v10 = vadd.f32 %v3219_v3, %v1970_v8  ;;  %v2017_v45 = vsel %vm323_vm3, %v1994_v9, -inf }
0x110e   :  { %2018 = vmax.xlane.f32.xlu0 %v2017_v45  ;;  %2168 = vmatpush.bf16.msrb.mxu0 %v3141_v29 }
0x110f   :  { %v1978_v46 = vpack.c.bf16 %v1971_v10, %v1971_v10 }
0x1111   :  { %v2064_v11 = vsel %vm389_vm4, %v1978_v46, 0 }
0x1112   :  { %2073 = vmatpush.bf16.msra.mxu1 %v2064_v11  ;;  %2169 = vmatpush.bf16.msrb.mxu0 %v3140_v30 }
0x1114   :  { %v1996_v12 = vpop.f32.mrf.mxu2  ;;  %v2013_v13 = vpop.f32.mrf.mxu3 }
0x1115   :  { %v2020_v14 = vsel %vm323_vm3, %v2013_v13, -inf  ;;  %v1861_v12 = vadd.f32 %v3764_v62, %v3766_v63 }
0x1116   :  { %2021 = vmax.xlane.f32.xlu1 %v2020_v14  ;;  %2204 = vmatpush.bf16.msrb.mxu1 %v3143_v31 }
0x111a   :  { %2205 = vmatpush.bf16.msrb.mxu1 %v3142_v32 }
0x111c   :  { %v2015_v15 = vpop.f32.mrf.mxu3 }
0x1124   :  { %v2135_v53 = vpop.f32.mrf.mxu3 }
0x1125   :  { %v2136_v58 = vadd.f32 %v3220_v55, %v2135_v53 }
0x1127   :  { %v2212_v1 = vpack.c.bf16 %v2136_v58, %v2136_v58 }
0x112c   :  { %v2137_v5 = vpop.f32.mrf.mxu3 }
0x112d   :  { %v2138_v8 = vadd.f32 %v3220_v55, %v2137_v5 }
0x112f   :  { %v2213_v45 = vpack.c.bf16 %v2138_v8, %v2138_v8 }
0x1181   :  { %v2019_v16 = vpop.xlane.xlu0 %2018 }
0x1182   :  { %v2023_v17 = vsub.f32 %v1994_v9, %v2019_v16 }
0x1184   :  { %v2025_v18 = vmul.f32 1.442695, %v2023_v17 }
0x1186   :  { %3290 = vpow2.f32 %v2025_v18 }
0x1189   :  { %v2022_v19 = vpop.xlane.xlu1 %2021 }
0x118a   :  { %v2024_v20 = vsub.f32 %v2013_v13, %v2022_v19 }
0x118c   :  { %v3291_v21 = vpop.eup %3290  ;;  %v2027_v25 = vmul.f32 1.442695, %v2024_v20 }
0x118d   :  { %v2029_v26 = vsel %vm323_vm3, %v3291_v21, 0.0 }
0x118e   :  { %3292 = vpow2.f32 %v2027_v25  ;;  %2030 = vadd.xlane.f32.xlu2 %v2029_v26 }
0x1194   :  { %v3293_v27 = vpop.eup %3292 }
0x1195   :  { %v2032_v28 = vsel %vm323_vm3, %v3293_v27, 0.0 }
0x1196   :  { %2033 = vadd.xlane.f32.xlu0 %v2032_v28 }
0x1201   :  { %v2031_v33 = vpop.xlane.xlu2 %2030 }
0x1202   :  { %3294 = vrcp.f32 %v2031_v33 }
0x1208   :  { %v3295_v34 = vpop.eup %3294 }
0x1209   :  { %v2037_v35 = vmul.f32 %v3295_v34, %v3291_v21  ;;  %v2034_v36 = vpop.xlane.xlu0 %2033 }
0x120a   :  { %3296 = vrcp.f32 %v2034_v36 }
0x120b   :  { %v2039_v39 = vpack.c.bf16 %v2037_v35, %v2037_v35 }
0x120d   :  { %3010 = vmatmul.msk.bf16.vlgmr.msra.gmra.mxu0 %vm323_vm3, %v2039_v39 }
0x1210   :  { %v3297_v40 = vpop.eup %3296 }
0x1211   :  { %v2038_v41 = vmul.f32 %v3297_v40, %v3293_v27 }
0x1213   :  { %v2040_v42 = vpack.c.bf16 %v2038_v41, %v2038_v41 }
0x1215   :  { %3011 = vmatmul.msk.bf16.vlgmr.msra.gmra.mxu1 %vm323_vm3, %v2040_v42 }
0x121d   :  { %3041 = vmatmul.msk.bf16.vlgmr.msrb.gmra.mxu0 %vm190_vm2, %v3681_v38 }
0x1225   :  { %3055 = vmatmul.msk.bf16.vlgmr.msrb.gmra.mxu1 %vm190_vm2, %v3681_v38 }
0x128a   :  { %v2056_v47 = vpop.f32.mrf.mxu0 }
0x1292   :  { %v2058_v48 = vpop.f32.mrf.mxu0  ;;  %v2075_v44 = vpop.f32.mrf.mxu1 }
0x1293   :  { %v2079_v23 = vpack.c.bf16 %v2075_v44, %v2056_v47 }
0x1295   :  { %3013 = vmatmul.msk.bf16.vlgmr.msra.gmra.mxu2 %vm323_vm3, %v2079_v23 }
0x129a   :  { %v2077_v50 = vpop.f32.mrf.mxu1  ;;  %v2171_v51 = vpop.f32.mrf.mxu0 }
0x129b   :  { %v2172_v52 = vadd.f32 %v3221_v49, %v2171_v51 }
0x129d   :  { %v2214_v56 = vpack.c.bf16 %v2172_v52, %v2172_v52  ;;  %v3223_v52 = vld [vmem:[%s2661_s19] ss:$0 sm:$0xff] }
0x129f   :  { %v2222_v38 = vsel %vm323_vm3, %v2214_v56, 0 }
0x12a0   :  { %2231 = vmatpush.bf16.xpose.msrb.mxu2 %v2222_v38 }
0x12a2   :  { %v2173_v59 = vpop.f32.mrf.mxu0  ;;  %v2207_v60 = vpop.f32.mrf.mxu1 }
0x12a3   :  { %v2174_v61 = vadd.f32 %v3221_v49, %v2173_v59  ;;  %v2208_v0 = vadd.f32 %v3222_v57, %v2207_v60 }
0x12a5   :  { %v2215_v3 = vpack.c.bf16 %v2174_v61, %v2174_v61  ;;  %v2216_v4 = vpack.c.bf16 %v2208_v0, %v2208_v0 }
0x12a7   :  { %v2241_v6 = vsel %vm323_vm3, %v2215_v3, 0  ;;  %v2284_v7 = vsel %vm389_vm4, %v2216_v4, 0  ;;  %3056 = vmatmul.msk.bf16.vlgmr.msrb.gmra.mxu2 %vm323_vm3, %v2212_v1 }
0x12a8   :  { %2250 = vmatpush.bf16.xpose.msrb.mxu3 %v2241_v6  ;;  %2293 = vmatpush.bf16.msra.mxu0 %v2284_v7  ;;  %v3145_v7 = vld [vmem:[%s2664_s5 + $0x8] sm:$0xff] }
0x12a9   :  { %2334 = vmatpush.bf16.msra.mxu2 %v2325_v43  ;;  %v3148_v43 = vld [vmem:[%s2666_s13 + $0x10] sm:$0xff] }
0x12aa   :  { %v2209_v9 = vpop.f32.mrf.mxu1 }
0x12ab   :  { %v2210_v10 = vadd.f32 %v3222_v57, %v2209_v9 }
0x12ac   :  { %2495 = vmatpush.bf16.msrb.mxu0 %v3149_v22 }
0x12ad   :  { %v2217_v46 = vpack.c.bf16 %v2210_v10, %v2210_v10  ;;  %v3144_v10 = vld [vmem:[%s2664_s5] sm:$0xff] }
0x12af   :  { %v2303_v11 = vsel %vm389_vm4, %v2217_v46, 0  ;;  %3057 = vmatmul.msk.bf16.vlgmr.msrb.gmra.mxu3 %vm323_vm3, %v2213_v45 }
0x12b0   :  { %2312 = vmatpush.bf16.msra.mxu1 %v2303_v11  ;;  %2441 = vmatpush.bf16.msra.mxu3 %v3145_v7 }
0x12b1   :  { %2496 = vmatpush.bf16.msrb.mxu0 %v3148_v43 }
0x12b4   :  { %2442 = vmatpush.bf16.msra.mxu3 %v3144_v10 }
0x1318   :  { %v2097_v13 = vpop.f32.mrf.mxu2 }
0x1319   :  { %v2102_v14 = vadd.f32 %v2097_v13, %v1861_v12 }
0x1320   :  { %v2099_v15 = vpop.f32.mrf.mxu2 }
0x1321   :  { %v2103_v16 = vadd.f32 %v2099_v15, %v3768_v2 }
0x132a   :  { %v2233_v17 = vpop.f32.mrf.mxu2 }
0x132b   :  { %v2256_v18 = vsel %vm323_vm3, %v2233_v17, -inf }
0x132c   :  { %2257 = vmax.xlane.f32.xlu1 %v2256_v18 }
0x1332   :  { %v2235_v19 = vpop.f32.mrf.mxu2  ;;  %v2252_v20 = vpop.f32.mrf.mxu3 }
0x1333   :  { %v2259_v21 = vsel %vm323_vm3, %v2252_v20, -inf }
0x1334   :  { %2260 = vmax.xlane.f32.xlu2 %v2259_v21 }
0x133a   :  { %v2254_v25 = vpop.f32.mrf.mxu3 }
0x139f   :  { %v2258_v26 = vpop.xlane.xlu1 %2257 }
0x13a0   :  { %v2262_v27 = vsub.f32 %v2233_v17, %v2258_v26 }
0x13a2   :  { %v2264_v28 = vmul.f32 1.442695, %v2262_v27 }
0x13a4   :  { %3298 = vpow2.f32 %v2264_v28  ;;  %v3224_v28 = vld [vmem:[%s3817_s23] ss:$0 sm:$0xff] }
0x13a7   :  { %v2261_v62 = vpop.xlane.xlu2 %2260 }
0x13a8   :  { %v2263_v63 = vsub.f32 %v2252_v20, %v2261_v62 }
0x13aa   :  { %v3299_v29 = vpop.eup %3298  ;;  %v2266_v30 = vmul.f32 1.442695, %v2263_v63 }
0x13ab   :  { %v2268_v2 = vsel %vm323_vm3, %v3299_v29, 0.0 }
0x13ac   :  { %3300 = vpow2.f32 %v2266_v30  ;;  %2269 = vadd.xlane.f32.xlu0 %v2268_v2 }
0x13b2   :  { %v3301_v31 = vpop.eup %3300 }
0x13b3   :  { %v2271_v32 = vsel %vm323_vm3, %v3301_v31, 0.0 }
0x13b4   :  { %2272 = vadd.xlane.f32.xlu1 %v2271_v32 }
0x141f   :  { %v2270_v33 = vpop.xlane.xlu0 %2269 }
0x1420   :  { %3302 = vrcp.f32 %v2270_v33  ;;  %v3225_v33 = vld [vmem:[%s3822_s27] ss:$0 sm:$0xff] }
0x1426   :  { %v3303_v34 = vpop.eup %3302 }
0x1427   :  { %v2276_v35 = vmul.f32 %v3303_v34, %v3299_v29  ;;  %v2273_v36 = vpop.xlane.xlu1 %2272 }
0x1428   :  { %3304 = vrcp.f32 %v2273_v36 }
0x1429   :  { %v2278_v39 = vpack.c.bf16 %v2276_v35, %v2276_v35 }
0x142b   :  { %3058 = vmatmul.msk.bf16.vlgmr.msra.gmra.mxu0 %vm323_vm3, %v2278_v39 }
0x142e   :  { %v3305_v40 = vpop.eup %3304 }
0x142f   :  { %v2277_v41 = vmul.f32 %v3305_v40, %v3301_v31 }
0x1431   :  { %v2279_v42 = vpack.c.bf16 %v2277_v41, %v2277_v41 }
0x1433   :  { %3059 = vmatmul.msk.bf16.vlgmr.msra.gmra.mxu1 %vm323_vm3, %v2279_v42 }
0x14a8   :  { %v2295_v47 = vpop.f32.mrf.mxu0 }
0x14b0   :  { %v2297_v48 = vpop.f32.mrf.mxu0  ;;  %v2314_v44 = vpop.f32.mrf.mxu1 }
0x14b1   :  { %v2318_v23 = vpack.c.bf16 %v2314_v44, %v2295_v47  ;;  %v3147_v47 = vld [vmem:[%s2666_s13 + $0x8] sm:$0xff]  ;;  %v3146_v48 = vld [vmem:[%s2666_s13] sm:$0xff] }
0x14b2   :  { %2497 = vmatpush.bf16.msrb.mxu0 %v3147_v47 }
0x14b3   :  { %3061 = vmatmul.msk.bf16.vlgmr.msra.gmra.mxu2 %vm323_vm3, %v2318_v23  ;;  %v3226_v23 = vld [vmem:[%s3838_s1] ss:$0 sm:$0xff] }
0x14b6   :  { %2498 = vmatpush.bf16.msrb.mxu0 %v3146_v48 }
0x14b8   :  { %v2316_v49 = vpop.f32.mrf.mxu1 }
0x1536   :  { %v2336_v50 = vpop.f32.mrf.mxu2 }
0x1537   :  { %v2341_v51 = vadd.f32 %v2336_v50, %v2102_v14 }
0x1539   :  { %v2343_v53 = vadd.f32 %v2341_v51, %v3670_v37 }
0x153b   :  { %v3825_v55 = vadd.f32 %v3223_v52, %v2343_v53 }
0x153d   :  { %v2353_v56 = vsel %vm190_vm2, %v3825_v55, 0.0  ;;  %v2361_v38 = vmul.f32 %v3825_v55, %v3825_v55 }
0x153e   :  { %2354 = vadd.xlane.f32.xlu2 %v2353_v56  ;;  %v2338_v57 = vpop.f32.mrf.mxu2  ;;  %v3227_v56 = vld [vmem:[%s2667_s9] ss:$0 sm:$0xff] }
0x153f   :  { %v2342_v58 = vadd.f32 %v2338_v57, %v2103_v16  ;;  %v2363_v59 = vsel %vm190_vm2, %v2361_v38, 0.0 }
0x1540   :  { %2364 = vadd.xlane.f32.xlu1 %v2363_v59 }
0x1541   :  { %v2344_v60 = vadd.f32 %v2342_v58, %v3672_v24 }
0x1543   :  { %v2350_v61 = vadd.f32 %v3223_v52, %v2344_v60 }
0x1545   :  { %v2356_v0 = vsel %vm190_vm2, %v2350_v61, 0.0  ;;  %v2362_v37 = vmul.f32 %v2350_v61, %v2350_v61 }
0x1546   :  { %2357 = vadd.xlane.f32.xlu0 %v2356_v0 }
0x1547   :  { %v2366_v1 = vsel %vm190_vm2, %v2362_v37, 0.0 }
0x1548   :  { %2367 = vadd.xlane.f32.xlu2 %v2366_v1 }
0x15b1   :  { %v2355_v24 = vpop.xlane.xlu2 %2354 }
0x15b2   :  { %v2359_v3 = vmul.f32 %v2355_v24, %v3588_v54 }
0x15b3   :  { %v2365_v4 = vpop.xlane.xlu1 %2364 }
0x15b4   :  { %v2371_v5 = vmul.f32 %v2359_v3, %v2359_v3  ;;  %v2369_v6 = vmul.f32 %v2365_v4, %v3588_v54  ;;  %v2402_v31 = vsub.f32 %v3825_v55, %v2359_v3 }
0x15b6   :  { %v2373_v8 = vsub.f32 %v2369_v6, %v2371_v5 }
0x15b8   :  { %v2375_v9 = vadd.f32 1e-05, %v2373_v8 }
0x15b9   :  { %v2358_v45 = vpop.xlane.xlu0 %2357 }
0x15ba   :  { %3306 = vrsqrt.f32 %v2375_v9  ;;  %v2360_v46 = vmul.f32 %v2358_v45, %v3588_v54  ;;  %vm2383_vm4 = vweird.f32 %v2375_v9 }
0x15bb   :  { %v2368_v11 = vpop.xlane.xlu2 %2367 }
0x15bc   :  { %v2372_v12 = vmul.f32 %v2360_v46, %v2360_v46  ;;  %v2370_v13 = vmul.f32 %v2368_v11, %v3588_v54  ;;  %v2403_v35 = vsub.f32 %v2350_v61, %v2360_v46 }
0x15be   :  { %v2374_v14 = vsub.f32 %v2370_v13, %v2372_v12 }
0x15c0   :  { %v3307_v15 = vpop.eup %3306  ;;  %v2376_v16 = vadd.f32 1e-05, %v2374_v14 }
0x15c1   :  { %v2378_v17 = vmul.f32 %v3307_v15, %v2375_v9  ;;  %vm2384_vm3 = vweird.f32 %v3307_v15 }
0x15c2   :  { %3308 = vrsqrt.f32 %v2376_v16  ;;  %vm2385_vm6 = vmor %vm2383_vm4, %vm2384_vm3  ;;  %vm2393_vm8 = vweird.f32 %v2376_v16  ;;  %vm2630_vm4 = vcmask 1024  }
0x15c3   :  { %v2379_v18 = vmul.f32 %v3307_v15, %v2378_v17 }
0x15c5   :  { %v2380_v19 = vmul.f32 0.5, %v2379_v18 }
0x15c7   :  { %v2381_v20 = vsub.f32 1.5, %v2380_v19 }
0x15c8   :  { %v3309_v21 = vpop.eup %3308 }
0x15c9   :  { %v2382_v25 = vmul.f32 %v3307_v15, %v2381_v20  ;;  %v2388_v26 = vmul.f32 %v3309_v21, %v2376_v16  ;;  %vm2394_vm7 = vweird.f32 %v3309_v21  ;;  %v3358_v20 = vmov 8.0  }
0x15ca   :  { %vm2395_vm9 = vmor %vm2393_vm8, %vm2394_vm7 }
0x15cb   :  { %v2389_v27 = vmul.f32 %v3309_v21, %v2388_v26  ;;  %v2386_v62 = vsel %vm2385_vm6, %v3307_v15, %v2382_v25 }
0x15cc   :  { %v2400_v30 = vmul.f32 %v3224_v28, %v2386_v62 }
0x15cd   :  { %v2390_v63 = vmul.f32 0.5, %v2389_v27  ;;  %v3228_v27 = vld [vmem:[%s3866_s17] ss:$0 sm:$0xff] }
0x15ce   :  { %v2404_v34 = vmul.f32 %v2402_v31, %v2400_v30 }
0x15cf   :  { %v2391_v29 = vsub.f32 1.5, %v2390_v63 }
0x15d0   :  { %v2409_v40 = vadd.f32 %v3225_v33, %v2404_v34 }
0x15d1   :  { %v2392_v2 = vmul.f32 %v3309_v21, %v2391_v29 }
0x15d3   :  { %v2396_v32 = vsel %vm2395_vm9, %v3309_v21, %v2392_v2  ;;  %v80_v2 = vstv %s2671_s29 }
0x15d4   :  { %v2401_v36 = vmul.f32 %v3224_v28, %v2396_v32  ;;  %v3229_v32 = vld [vmem:[%s3871_s21] ss:$0 sm:$0xff]  ;;  %81 = vst [vmem:[#allocation2] sm:$0x1] %v80_v2 }
0x15d6   :  { %v2405_v39 = vmul.f32 %v2403_v35, %v2401_v36 }
0x15d8   :  { %v2410_v41 = vadd.f32 %v3225_v33, %v2405_v39 }
0x15da   :  { %v2411_v42 = vpack.c.bf16 %v2410_v41, %v2409_v40 }
0x15dc   :  { %3070 = vmatmul.msk.bf16.vlgmr.msra.gmra.mxu3 %vm190_vm2, %v2411_v42 }
0x165f   :  { %v2444_v44 = vpop.f32.mrf.mxu3 }
0x1660   :  { %v2445_v49 = vadd.f32 %v3226_v23, %v2444_v44 }
0x1662   :  { %v2449_v52 = vmax.f32 %v2445_v49, 0.0 }
0x1667   :  { %v2446_v50 = vpop.f32.mrf.mxu3 }
0x1668   :  { %v2447_v51 = vadd.f32 %v3226_v23, %v2446_v50 }
0x166a   :  { %v2450_v53 = vmax.f32 %v2447_v51, 0.0 }
0x166c   :  { %v2451_v55 = vpack.c.bf16 %v2450_v53, %v2449_v52 }
0x166e   :  { %3087 = vmatmul.msk.bf16.vlgmr.msrb.gmra.mxu0 %vm1314_vm12, %v2451_v55 }
0x16eb   :  { %v2500_v38 = vpop.f32.mrf.mxu0 }
0x16ec   :  { %v2501_v57 = vadd.f32 %v3227_v56, %v2500_v38 }
0x16ee   :  { %v3859_v58 = vadd.f32 %v2501_v57, %v2409_v40 }
0x16f0   :  { %v2509_v59 = vsel %vm190_vm2, %v3859_v58, 0.0  ;;  %v2517_v3 = vmul.f32 %v3859_v58, %v3859_v58 }
0x16f1   :  { %2510 = vadd.xlane.f32.xlu1 %v2509_v59 }
0x16f2   :  { %v2519_v4 = vsel %vm190_vm2, %v2517_v3, 0.0 }
0x16f3   :  { %v2502_v60 = vpop.f32.mrf.mxu0 }
0x16f4   :  { %v2503_v61 = vadd.f32 %v3227_v56, %v2502_v60 }
0x16f6   :  { %v2506_v0 = vadd.f32 %v2503_v61, %v2410_v41 }
0x16f8   :  { %v2512_v37 = vsel %vm190_vm2, %v2506_v0, 0.0  ;;  %v2518_v1 = vmul.f32 %v2506_v0, %v2506_v0 }
0x16f9   :  { %2513 = vadd.xlane.f32.xlu0 %v2512_v37  ;;  %v3230_v37 = vld [vmem:[%s3881_s25] ss:$0 sm:$0xff] }
0x16fa   :  { %v2522_v24 = vsel %vm190_vm2, %v2518_v1, 0.0 }
0x16fb   :  { %2523 = vadd.xlane.f32.xlu2 %v2522_v24 }
0x1701   :  { %2520 = vadd.xlane.f32.xlu0 %v2519_v4 }
0x1764   :  { %v2511_v7 = vpop.xlane.xlu1 %2510 }
0x1765   :  { %v2515_v45 = vmul.f32 %v2511_v7, %v3588_v54 }
0x1767   :  { %v2527_v13 = vmul.f32 %v2515_v45, %v2515_v45  ;;  %v2558_v22 = vsub.f32 %v3859_v58, %v2515_v45 }
0x176c   :  { %v2514_v5 = vpop.xlane.xlu0 %2513 }
0x176d   :  { %v2516_v6 = vmul.f32 %v2514_v5, %v3588_v54 }
0x176e   :  { %v2524_v8 = vpop.xlane.xlu2 %2523 }
0x176f   :  { %v2528_v9 = vmul.f32 %v2516_v6, %v2516_v6  ;;  %v2526_v10 = vmul.f32 %v2524_v8, %v3588_v54  ;;  %v2559_v31 = vsub.f32 %v2506_v0, %v2516_v6 }
0x1771   :  { %v2530_v46 = vsub.f32 %v2526_v10, %v2528_v9  ;;  %v3231_v9 = vld [vmem:[#allocation2] ss:$0 sm:$0xff] }
0x1773   :  { %v2532_v11 = vadd.f32 1e-05, %v2530_v46 }
0x1774   :  { %v2521_v12 = vpop.xlane.xlu0 %2520 }
0x1775   :  { %3310 = vrsqrt.f32 %v2532_v11  ;;  %v2525_v14 = vmul.f32 %v2521_v12, %v3588_v54  ;;  %vm2549_vm11 = vweird.f32 %v2532_v11 }
0x1777   :  { %v2529_v15 = vsub.f32 %v2525_v14, %v2527_v13 }
0x1779   :  { %v2531_v16 = vadd.f32 1e-05, %v2529_v15 }
0x177b   :  { %v3311_v17 = vpop.eup %3310  ;;  %3312 = vrsqrt.f32 %v2531_v16  ;;  %vm2539_vm14 = vweird.f32 %v2531_v16 }
0x177c   :  { %v2544_v18 = vmul.f32 %v3311_v17, %v2532_v11  ;;  %3314 = vrcp.f32 %v3358_v20  ;;  %vm2550_vm10 = vweird.f32 %v3311_v17 }
0x177d   :  { %vm2551_vm12 = vmor %vm2549_vm11, %vm2550_vm10 }
0x177e   :  { %v2545_v19 = vmul.f32 %v3311_v17, %v2544_v18 }
0x1780   :  { %v2546_v21 = vmul.f32 0.5, %v2545_v19 }
0x1781   :  { %v3313_v25 = vpop.eup %3312 }
0x1782   :  { %v2547_v26 = vsub.f32 1.5, %v2546_v21  ;;  %v2534_v54 = vmul.f32 %v3313_v25, %v2531_v16  ;;  %v3315_v28 = vpop.eup %3314  ;;  %vm2540_vm13 = vweird.f32 %v3313_v25 }
0x1783   :  { %v2582_v34 = vmul.f32 8.0, %v3315_v28  ;;  %vm2541_vm15 = vmor %vm2539_vm14, %vm2540_vm13  ;;  %vm2586_vm0 = vweird.f32 %v3315_v28 }
0x1784   :  { %v2548_v62 = vmul.f32 %v3311_v17, %v2547_v26  ;;  %v2535_v63 = vmul.f32 %v3313_v25, %v2534_v54 }
0x1785   :  { %v2583_v41 = vsub.f32 1.0, %v2582_v34 }
0x1786   :  { %v2552_v29 = vsel %vm2551_vm12, %v3311_v17, %v2548_v62  ;;  %v2536_v30 = vmul.f32 0.5, %v2535_v63 }
0x1787   :  { %v2557_v33 = vmul.f32 %v3228_v27, %v2552_v29  ;;  %v2584_v23 = vmul.f32 %v3315_v28, %v2583_v41 }
0x1788   :  { %v2537_v35 = vsub.f32 1.5, %v2536_v30 }
0x1789   :  { %v2561_v36 = vmul.f32 %v2559_v31, %v2557_v33  ;;  %v2585_v53 = vadd.f32 %v3315_v28, %v2584_v23 }
0x178a   :  { %v2538_v39 = vmul.f32 %v3313_v25, %v2537_v35 }
0x178b   :  { %v2566_v40 = vadd.f32 %v3229_v32, %v2561_v36  ;;  %v2587_v59 = vsel %vm2586_vm0, %v3315_v28, %v2585_v53 }
0x178c   :  { %v2542_v42 = vsel %vm2541_vm15, %v3313_v25, %v2538_v39 }
0x178d   :  { %v2556_v43 = vmul.f32 %v3228_v27, %v2542_v42  ;;  %v2574_v47 = vsel %vm190_vm2, %v2566_v40, 0.0 }
0x178e   :  { %v2575_v48 = vrot.slane %v2574_v47, 4 }
0x178f   :  { %v2560_v44 = vmul.f32 %v2558_v22, %v2556_v43 }
0x1790   :  { %v2576_v49 = vadd.f32 %v2575_v48, %v2574_v47 }
0x1791   :  { %v2565_v50 = vadd.f32 %v3229_v32, %v2560_v44 }
0x1792   :  { %v2577_v51 = vrot.slane %v2576_v49, 2 }
0x1793   :  { %v2567_v52 = vsel %vm190_vm2, %v2565_v50, 0.0  ;;  %vm2602_vm2 = vcmask 254976  }
0x1794   :  { %v2568_v55 = vrot.slane %v2567_v52, 4  ;;  %v2578_v56 = vadd.f32 %v2577_v51, %v2576_v49 }
0x1796   :  { %v2569_v38 = vadd.f32 %v2568_v55, %v2567_v52  ;;  %v2579_v57 = vrot.slane %v2578_v56, 1 }
0x1798   :  { %v2570_v58 = vrot.slane %v2569_v38, 2  ;;  %v2580_v60 = vadd.f32 %v2579_v57, %v2578_v56 }
0x179a   :  { %v2571_v61 = vadd.f32 %v2570_v58, %v2569_v38  ;;  %v2589_v0 = vmul.f32 %v2587_v59, %v2580_v60 }
0x179c   :  { %v2572_v1 = vrot.slane %v2571_v61, 1  ;;  %v2595_v3 = vmul.f32 %v3230_v37, %v2589_v0 }
0x179e   :  { %v2573_v24 = vadd.f32 %v2572_v1, %v2571_v61  ;;  %v2598_v6 = vrot.slane %v2595_v3, 7 }
0x17a0   :  { %v2588_v4 = vmul.f32 %v2587_v59, %v2573_v24 }
0x17a2   :  { %v2594_v5 = vmul.f32 %v3230_v37, %v2588_v4 }
0x17a4   :  { %v2600_v7 = vsel %vm2599_vm1, %v2598_v6, %v2594_v5 }
0x17a5   :  { %v2603_v8 = vsel %vm2602_vm2, %v2600_v7, 0.0 }
0x17a6   :  { %2604 = vadd.xlane.f32.xlu1 %v2603_v8 }
0x1819   :  { %v2605_v10 = vpop.xlane.xlu1 %2604 }
0x181a   :  { %v2610_v45 = vadd.f32 %v3231_v9, %v2605_v10 }
0x181c   :  { %v2611_v46 = vsub.f32 0.0, %v2610_v45 }
0x181e   :  { %v2612_v11 = vmul.f32 1.442695, %v2611_v46 }
0x1820   :  { %3316 = vpow2.f32 %v2612_v11 }
0x1826   :  { %v3317_v12 = vpop.eup %3316 }
0x1827   :  { %v2614_v13 = vadd.f32 1.0, %v3317_v12 }
0x1829   :  { %3318 = vrcp.f32 %v2614_v13  ;;  %v2626_v17 = vand.u32 2147483648, %v2614_v13  ;;  %v2624_v19 = vand.u32 2147483647, %v2614_v13  ;;  %vm2620_vm3 = vweird.f32 %v2614_v13 }
0x182b   :  { %v2627_v21 = vor.u32 1.1754944e-38, %v2626_v17  ;;  %vm2625_vm7 = vcmp.eq.f32.partialorder %v2624_v19, 8.507059e+37 }
0x182f   :  { %v3319_v14 = vpop.eup %3318 }
0x1830   :  { %v2616_v15 = vmul.f32 %v3319_v14, %v2614_v13  ;;  %vm2621_vm5 = vweird.f32 %v3319_v14 }
0x1831   :  { %vm2622_vm6 = vmor %vm2620_vm3, %vm2621_vm5 }
0x1832   :  { %v2617_v16 = vsub.f32 1.0, %v2616_v15 }
0x1834   :  { %v2618_v18 = vmul.f32 %v3319_v14, %v2617_v16 }
0x1836   :  { %v2619_v20 = vadd.f32 %v3319_v14, %v2618_v18 }
0x1838   :  { %v2623_v25 = vsel %vm2622_vm6, %v3319_v14, %v2619_v20 }
0x1839   :  { %v2628_v26 = vsel %vm2625_vm7, %v2627_v21, %v2623_v25 }
0x183a   :  { %2631 = vst.msk [vmem:[%s2672_s3] sm:$0x3] %vm2630_vm4, %v2628_v26 }

</bundles_post_ra>
